<compile_context>
chip_gen: v6e
topology: v6e:2x2x1
jax: 0.10.0
libtpu: 0.0.40
codegen_flags: <defaults>
</compile_context>

<pallas_src>
import functools

import numpy as np

import jax
import jax.numpy as jnp
from jax import lax
from jax.experimental import pallas as pl
from jax.experimental.pallas import tpu as pltpu

NUM_HEADS = 4
KSIZE = 7                    # spatial conv kernel size
KK = KSIZE * KSIZE           # 49 taps
KK_PAD = 56                  # 49 padded up to a sublane multiple


# -----------------------------------------------------------------------------
# Fused kernel: one grid step == one batch element.  Everything stays (C, N).
# -----------------------------------------------------------------------------
def _ca_cbam_kernel(x_ref, wqkv_ca_ref, wp_ca_ref, bp_ca_ref,
                    wqkv_sa_ref, wp_sa_ref, bp_sa_ref,
                    wconv_ref, vmask_ref, bconv_ref,
                    o_ref, *, scale, C, N, W):
    f32 = jnp.float32
    x = x_ref[...]                                           # (C, N) lane-dense

    def sigmoid(z):                                          # exact, single EUP op
        return 0.5 * (jnp.tanh(0.5 * z) + 1.0)

    def attention(t, wqkv_ref, wp_ref, bp_ref):
        """Single-head attention over N tokens of dim C; (C, N) in, (C, N) out."""
        # Fused q/k/v projection: one (3C, C) @ (C, N) MXU matmul.
        qkv = jnp.dot(wqkv_ref[...], t, preferred_element_type=f32)     # (3C, N)
        q = qkv[0:C, :] * scale                                         # (C, N)
        k = qkv[C:2 * C, :]                                             # (C, N)
        v = qkv[2 * C:3 * C, :]                                         # (C, N)
        # Scores: only transpose left in the kernel -- tiny (C,N)->(N,C) for q
        # so the score matmul is the plain lhs-last x rhs-first MXU pattern.
        qT = jnp.transpose(q)                                           # (N, C)
        s = jnp.dot(qT, k, preferred_element_type=f32)                  # (N, N)
        s = s - jnp.max(s, axis=-1, keepdims=True)
        e = jnp.exp(s)
        p = e * pl.reciprocal(jnp.sum(e, axis=-1, keepdims=True), approx=True)
        # Attention output directly channel-major: contract the key axis of
        # v (C, Nk) with the key axis of p (Nq, Nk)  -> (C, Nq).
        att = lax.dot_general(v, p, (((1,), (1,)), ((), ())),
                              preferred_element_type=f32)               # (C, N)
        # Output projection + bias, still channel-major.
        return jnp.dot(wp_ref[...], att, preferred_element_type=f32) + bp_ref[...]

    # --- ChannelAttention: y = sigmoid(CrossAttention(x, x)) * x -------------
    ca = attention(x, wqkv_ca_ref, wp_ca_ref, bp_ca_ref)                # (C, N)
    y = sigmoid(ca) * x                                                 # (C, N)

    # --- SpatialAttention: sigmoid(conv7x7(CrossAttention(y, y))) * y --------
    sa = attention(y, wqkv_sa_ref, wp_sa_ref, bp_sa_ref)                # (C, N)

    # 7x7 conv (C -> 1): channel mixing on the MXU -- rt[j, m] is the
    # channel-reduced value of tap j evaluated at pixel m.
    rt = jnp.dot(wconv_ref[...], sa, preferred_element_type=f32)        # (KK_PAD, N)

    # Spatial gather: each tap j needs rt[j, n + delta_j]; realize the shift as
    # a cyclic lane roll of a (1, N) row and zero invalid taps with the
    # precomputed (tap, token) validity mask.
    conv = jnp.zeros((1, N), f32)
    for ki in range(KSIZE):
        for kj in range(KSIZE):
            j = ki * KSIZE + kj
            delta = (ki - KSIZE // 2) * W + (kj - KSIZE // 2)
            row = rt[j:j + 1, :]                                        # (1, N)
            shift = (-delta) % N          # roll[n] = row[(n + delta) mod N]
            if shift != 0:
                row = pltpu.roll(row, shift=shift, axis=1)
            conv = conv + row * vmask_ref[j:j + 1, :]
    conv = conv + bconv_ref[0, 0]                                       # SMEM scalar
    gate = sigmoid(conv)                                                # (1, N)

    o_ref[...] = y * gate                                               # (C, N) store


# -----------------------------------------------------------------------------
# Host-side helpers / wrapper
# -----------------------------------------------------------------------------
def _spatial_valid_mask(H, W):
    """(KK_PAD, N) float mask: 1 where tap (ki,kj) of output token n is inside HxW."""
    N = H * W
    n = np.arange(N)
    row, col = n // W, n % W
    m = np.zeros((KK_PAD, N), np.float32)
    for ki in range(KSIZE):
        for kj in range(KSIZE):
            dy, dx = ki - KSIZE // 2, kj - KSIZE // 2
            ok = (row + dy >= 0) & (row + dy < H) & (col + dx >= 0) & (col + dx < W)
            m[ki * KSIZE + kj] = ok.astype(np.float32)
    return jnp.asarray(m)


def ca_cbam_forward(x_nchw, params):
    """Forward pass of CA_CBAM.  x_nchw: (B, C, H, W) float32 -> (B, C, H, W)."""
    B, C, H, W = x_nchw.shape
    N = H * W
    scale = float((C // NUM_HEADS) ** -0.5)

    x_cn = x_nchw.reshape(B, C, N).astype(jnp.float32)   # NCHW -> (B, C, N), no transpose
    vmask = _spatial_valid_mask(H, W)                    # (KK_PAD, N)
    wconv = jnp.zeros((KK_PAD, C), jnp.float32).at[:KK].set(params["conv_w"])

    kern = functools.partial(_ca_cbam_kernel, scale=scale, C=C, N=N, W=W)
    out_cn = pl.pallas_call(
        kern,
        out_shape=jax.ShapeDtypeStruct((B, C, N), jnp.float32),
        grid_spec=pltpu.PrefetchScalarGridSpec(
            num_scalar_prefetch=0,
            grid=(B,),
            in_specs=[
                pl.BlockSpec((None, C, N), lambda b: (b, 0, 0)),        # x
                pl.BlockSpec((3 * C, C), lambda b: (0, 0)),             # CA qkv weight
                pl.BlockSpec((C, C), lambda b: (0, 0)),                 # CA proj weight
                pl.BlockSpec((C, 1), lambda b: (0, 0)),                 # CA proj bias
                pl.BlockSpec((3 * C, C), lambda b: (0, 0)),             # SA qkv weight
                pl.BlockSpec((C, C), lambda b: (0, 0)),                 # SA proj weight
                pl.BlockSpec((C, 1), lambda b: (0, 0)),                 # SA proj bias
                pl.BlockSpec((KK_PAD, C), lambda b: (0, 0)),            # conv weight (taps, C)
                pl.BlockSpec((KK_PAD, N), lambda b: (0, 0)),            # tap validity mask
                pl.BlockSpec(memory_space=pltpu.MemorySpace.SMEM),      # conv bias scalar
            ],
            out_specs=pl.BlockSpec((None, C, N), lambda b: (b, 0, 0)),
        ),
        compiler_params=pltpu.CompilerParams(
            dimension_semantics=("parallel",)),   # 2 parallel steps -> both v7x TCs
    )(x_cn, params["ca_wqkv"], params["ca_wp"], params["ca_bp"],
      params["sa_wqkv"], params["sa_wp"], params["sa_bp"],
      wconv, vmask, params["conv_b"])

    return out_cn.reshape(B, C, H, W)


# -----------------------------------------------------------------------------
# Deterministic synthetic parameters (PyTorch-style layouts, all f32)
# -----------------------------------------------------------------------------
def init_params(C, key):
    ks = jax.random.split(key, 8)

    def rnd(k, shape, s=0.2):
        return jax.random.normal(k, shape, jnp.float32) * s

    return {
        # qkv / proj weights stored in PyTorch (out_features, in_features) order
        # so the kernel's channel-major matmuls W @ x_(C,N) need no reshuffle.
        "ca_wqkv": rnd(ks[0], (3 * C, C)),
        "ca_wp":   rnd(ks[1], (C, C)),
        "ca_bp":   rnd(ks[2], (C, 1)),
        "sa_wqkv": rnd(ks[3], (3 * C, C)),
        "sa_wp":   rnd(ks[4], (C, C)),
        "sa_bp":   rnd(ks[5], (C, 1)),
        # Conv2d(C, 1, 7, padding=3): weight (1, C, 7, 7) stored tap-major as (49, C).
        "conv_w":  rnd(ks[6], (KK, C)),
        "conv_b":  rnd(ks[7], (1, 1)),
    }


# -----------------------------------------------------------------------------
# Pure-JAX f32 reference (mirrors the PyTorch forward) for correctness check
# -----------------------------------------------------------------------------
def ref_forward(x_nchw, params):
    B, C, H, W = x_nchw.shape
    N = H * W
    scale = (C // NUM_HEADS) ** (-0.5)
    tok = jnp.transpose(x_nchw.reshape(B, C, N), (0, 2, 1))            # (B, N, C)

    def cross(t, wqkv, wp, bp):
        qkv = jnp.einsum("bnc,dc->bnd", t, wqkv)                       # (B, N, 3C)
        q, k, v = qkv[..., :C], qkv[..., C:2 * C], qkv[..., 2 * C:]
        a = jax.nn.softmax(jnp.einsum("bnc,bmc->bnm", q, k) * scale, axis=-1)
        o = jnp.einsum("bnm,bmc->bnc", a, v)
        return jnp.einsum("bnc,dc->bnd", o, wp) + bp[:, 0]

    ca = cross(tok, params["ca_wqkv"], params["ca_wp"], params["ca_bp"])
    y = jax.nn.sigmoid(ca) * tok                                       # (B, N, C)
    sa = cross(y, params["sa_wqkv"], params["sa_wp"], params["sa_bp"])

    w_hwio = params["conv_w"].reshape(KSIZE, KSIZE, C)[..., None]      # (7,7,C,1)
    conv = lax.conv_general_dilated(
        sa.reshape(B, H, W, C), w_hwio, (1, 1), "SAME",
        dimension_numbers=("NHWC", "HWIO", "NHWC")) + params["conv_b"][0, 0]
    out_nhwc = jax.nn.sigmoid(conv) * y.reshape(B, H, W, C)
    return jnp.transpose(out_nhwc, (0, 3, 1, 2))


if __name__ == "__main__":
    B, C, H, W = 2, 8, 16, 16          # C divisible by num_heads=4; N = 256 lanes
    key = jax.random.PRNGKey(0)
    kx, kp = jax.random.split(key)
    x = jax.random.normal(kx, (B, C, H, W), jnp.float32)
    params = init_params(C, kp)

    out = jax.block_until_ready(jax.jit(ca_cbam_forward)(x, params))

    ref = ref_forward(x, params)
    assert out.shape == (B, C, H, W)
    # f32 matmuls + exact sigmoid gates; remaining error comes from MXU default
    # precision and the approx softmax reciprocal -> comfortably within 2e-2.
    err = float(jnp.max(jnp.abs(out - ref)))
    assert jnp.allclose(out, ref, rtol=2e-2, atol=2e-2), \
        f"mismatch vs reference (max abs err {err})"

    print("KERNEL_OK")
</pallas_src>

<mosaic_0001>
module attributes {stable_mosaic.version = 11 : i64} {
  func.func @_ca_cbam_kernel(%arg0: i32, %arg1: memref<1x8x256xf32, #tpu.memory_space<vmem>>, %arg2: memref<24x8xf32, #tpu.memory_space<vmem>>, %arg3: memref<8x8xf32, #tpu.memory_space<vmem>>, %arg4: memref<8x1xf32, #tpu.memory_space<vmem>>, %arg5: memref<24x8xf32, #tpu.memory_space<vmem>>, %arg6: memref<8x8xf32, #tpu.memory_space<vmem>>, %arg7: memref<8x1xf32, #tpu.memory_space<vmem>>, %arg8: memref<56x8xf32, #tpu.memory_space<vmem>>, %arg9: memref<56x256xf32, #tpu.memory_space<vmem>>, %arg10: memref<1x1xf32, #tpu.memory_space<smem>>, %arg11: memref<1x8x256xf32, #tpu.memory_space<vmem>>) attributes {dimension_semantics = [#tpu.dimension_semantics<parallel>], iteration_bounds = array<i64: 2>, scalar_prefetch = 0 : i64, scratch_operands = 0 : i64, tpu.core_type = #tpu.core_type<tc>, window_params = [{transform_indices = @transform_0, window_bounds = array<i64: 1, 8, 256>}, {pipeline_mode = #tpu.pipeline_mode<synchronous>, transform_indices = @transform_1, window_bounds = array<i64: 24, 8>}, {pipeline_mode = #tpu.pipeline_mode<synchronous>, transform_indices = @transform_2, window_bounds = array<i64: 8, 8>}, {pipeline_mode = #tpu.pipeline_mode<synchronous>, transform_indices = @transform_3, window_bounds = array<i64: 8, 1>}, {pipeline_mode = #tpu.pipeline_mode<synchronous>, transform_indices = @transform_4, window_bounds = array<i64: 24, 8>}, {pipeline_mode = #tpu.pipeline_mode<synchronous>, transform_indices = @transform_5, window_bounds = array<i64: 8, 8>}, {pipeline_mode = #tpu.pipeline_mode<synchronous>, transform_indices = @transform_6, window_bounds = array<i64: 8, 1>}, {pipeline_mode = #tpu.pipeline_mode<synchronous>, transform_indices = @transform_7, window_bounds = array<i64: 56, 8>}, {pipeline_mode = #tpu.pipeline_mode<synchronous>, transform_indices = @transform_8, window_bounds = array<i64: 56, 256>}, {transform_indices = @transform_9, window_bounds = array<i64: 1, 1>}, {transform_indices = @transform_10, window_bounds = array<i64: 1, 8, 256>}]} {
    %c0 = arith.constant 0 : index
    %c0_0 = arith.constant 0 : index
    %c0_1 = arith.constant 0 : index
    %0 = vector.load %arg1[%c0, %c0_0, %c0_1] : memref<1x8x256xf32, #tpu.memory_space<vmem>>, vector<1x8x256xf32>
    %1 = vector.shape_cast %0 : vector<1x8x256xf32> to vector<8x256xf32>
    %c0_2 = arith.constant 0 : index
    %c0_3 = arith.constant 0 : index
    %2 = vector.load %arg2[%c0_2, %c0_3] : memref<24x8xf32, #tpu.memory_space<vmem>>, vector<24x8xf32>
    %cst = arith.constant dense<0.000000e+00> : vector<24x256xf32>
    %3 = tpu.matmul %2, %1, %cst {dimension_numbers = #tpu.dot_dimension_numbers<[1], [0], [0], [1], [0, 0, 1, 1], [], []>} : vector<24x8xf32>, vector<8x256xf32>, vector<24x256xf32> -> vector<24x256xf32>
    %4 = vector.extract_strided_slice %3 {offsets = [0, 0], sizes = [8, 256], strides = [1, 1]} : vector<24x256xf32> to vector<8x256xf32>
    %cst_4 = arith.constant 0.707106769 : f32
    %5 = vector.broadcast %cst_4 : f32 to vector<8x256xf32>
    %6 = arith.mulf %4, %5 : vector<8x256xf32>
    %7 = vector.extract_strided_slice %3 {offsets = [8, 0], sizes = [8, 256], strides = [1, 1]} : vector<24x256xf32> to vector<8x256xf32>
    %8 = vector.extract_strided_slice %3 {offsets = [16, 0], sizes = [8, 256], strides = [1, 1]} : vector<24x256xf32> to vector<8x256xf32>
    %9 = tpu.transpose %6, [1, 0] : vector<8x256xf32> -> vector<256x8xf32>
    %cst_5 = arith.constant dense<0.000000e+00> : vector<256x256xf32>
    %10 = tpu.matmul %9, %7, %cst_5 {dimension_numbers = #tpu.dot_dimension_numbers<[1], [0], [0], [1], [0, 0, 1, 1], [], []>} : vector<256x8xf32>, vector<8x256xf32>, vector<256x256xf32> -> vector<256x256xf32>
    %cst_6 = arith.constant dense<0xFF800000> : vector<256xf32>
    %11 = vector.multi_reduction <maximumf>, %10, %cst_6 [1] : vector<256x256xf32> to vector<256xf32>
    %12 = vector.shape_cast %11 : vector<256xf32> to vector<256x1xf32>
    %13 = vector.broadcast %12 : vector<256x1xf32> to vector<256x256xf32>
    %14 = arith.subf %10, %13 : vector<256x256xf32>
    %15 = math.exp %14 : vector<256x256xf32>
    %cst_7 = arith.constant dense<0.000000e+00> : vector<256xf32>
    %16 = vector.multi_reduction <add>, %15, %cst_7 [1] : vector<256x256xf32> to vector<256xf32>
    %17 = vector.shape_cast %16 : vector<256xf32> to vector<256x1xf32>
    %18 = tpu.reciprocal %17 {approx = true} : vector<256x1xf32> -> vector<256x1xf32>
    %19 = vector.broadcast %18 : vector<256x1xf32> to vector<256x256xf32>
    %20 = arith.mulf %15, %19 : vector<256x256xf32>
    %cst_8 = arith.constant dense<0.000000e+00> : vector<8x256xf32>
    %21 = tpu.matmul %8, %20, %cst_8 {dimension_numbers = #tpu.dot_dimension_numbers<[1], [1], [0], [0], [0, 0, 1, 0], [], []>} : vector<8x256xf32>, vector<256x256xf32>, vector<8x256xf32> -> vector<8x256xf32>
    %c0_9 = arith.constant 0 : index
    %c0_10 = arith.constant 0 : index
    %22 = vector.load %arg3[%c0_9, %c0_10] : memref<8x8xf32, #tpu.memory_space<vmem>>, vector<8x8xf32>
    %cst_11 = arith.constant dense<0.000000e+00> : vector<8x256xf32>
    %23 = tpu.matmul %22, %21, %cst_11 {dimension_numbers = #tpu.dot_dimension_numbers<[1], [0], [0], [1], [0, 0, 1, 1], [], []>} : vector<8x8xf32>, vector<8x256xf32>, vector<8x256xf32> -> vector<8x256xf32>
    %c0_12 = arith.constant 0 : index
    %c0_13 = arith.constant 0 : index
    %24 = vector.load %arg4[%c0_12, %c0_13] : memref<8x1xf32, #tpu.memory_space<vmem>>, vector<8x1xf32>
    %25 = vector.broadcast %24 : vector<8x1xf32> to vector<8x256xf32>
    %26 = arith.addf %23, %25 : vector<8x256xf32>
    %cst_14 = arith.constant 5.000000e-01 : f32
    %27 = vector.broadcast %cst_14 : f32 to vector<8x256xf32>
    %28 = arith.mulf %27, %26 : vector<8x256xf32>
    %29 = math.tanh %28 : vector<8x256xf32>
    %cst_15 = arith.constant 1.000000e+00 : f32
    %30 = vector.broadcast %cst_15 : f32 to vector<8x256xf32>
    %31 = arith.addf %29, %30 : vector<8x256xf32>
    %cst_16 = arith.constant 5.000000e-01 : f32
    %32 = vector.broadcast %cst_16 : f32 to vector<8x256xf32>
    %33 = arith.mulf %32, %31 : vector<8x256xf32>
    %34 = arith.mulf %33, %1 : vector<8x256xf32>
    %c0_17 = arith.constant 0 : index
    %c0_18 = arith.constant 0 : index
    %35 = vector.load %arg5[%c0_17, %c0_18] : memref<24x8xf32, #tpu.memory_space<vmem>>, vector<24x8xf32>
    %cst_19 = arith.constant dense<0.000000e+00> : vector<24x256xf32>
    %36 = tpu.matmul %35, %34, %cst_19 {dimension_numbers = #tpu.dot_dimension_numbers<[1], [0], [0], [1], [0, 0, 1, 1], [], []>} : vector<24x8xf32>, vector<8x256xf32>, vector<24x256xf32> -> vector<24x256xf32>
    %37 = vector.extract_strided_slice %36 {offsets = [0, 0], sizes = [8, 256], strides = [1, 1]} : vector<24x256xf32> to vector<8x256xf32>
    %cst_20 = arith.constant 0.707106769 : f32
    %38 = vector.broadcast %cst_20 : f32 to vector<8x256xf32>
    %39 = arith.mulf %37, %38 : vector<8x256xf32>
    %40 = vector.extract_strided_slice %36 {offsets = [8, 0], sizes = [8, 256], strides = [1, 1]} : vector<24x256xf32> to vector<8x256xf32>
    %41 = vector.extract_strided_slice %36 {offsets = [16, 0], sizes = [8, 256], strides = [1, 1]} : vector<24x256xf32> to vector<8x256xf32>
    %42 = tpu.transpose %39, [1, 0] : vector<8x256xf32> -> vector<256x8xf32>
    %cst_21 = arith.constant dense<0.000000e+00> : vector<256x256xf32>
    %43 = tpu.matmul %42, %40, %cst_21 {dimension_numbers = #tpu.dot_dimension_numbers<[1], [0], [0], [1], [0, 0, 1, 1], [], []>} : vector<256x8xf32>, vector<8x256xf32>, vector<256x256xf32> -> vector<256x256xf32>
    %cst_22 = arith.constant dense<0xFF800000> : vector<256xf32>
    %44 = vector.multi_reduction <maximumf>, %43, %cst_22 [1] : vector<256x256xf32> to vector<256xf32>
    %45 = vector.shape_cast %44 : vector<256xf32> to vector<256x1xf32>
    %46 = vector.broadcast %45 : vector<256x1xf32> to vector<256x256xf32>
    %47 = arith.subf %43, %46 : vector<256x256xf32>
    %48 = math.exp %47 : vector<256x256xf32>
    %cst_23 = arith.constant dense<0.000000e+00> : vector<256xf32>
    %49 = vector.multi_reduction <add>, %48, %cst_23 [1] : vector<256x256xf32> to vector<256xf32>
    %50 = vector.shape_cast %49 : vector<256xf32> to vector<256x1xf32>
    %51 = tpu.reciprocal %50 {approx = true} : vector<256x1xf32> -> vector<256x1xf32>
    %52 = vector.broadcast %51 : vector<256x1xf32> to vector<256x256xf32>
    %53 = arith.mulf %48, %52 : vector<256x256xf32>
    %cst_24 = arith.constant dense<0.000000e+00> : vector<8x256xf32>
    %54 = tpu.matmul %41, %53, %cst_24 {dimension_numbers = #tpu.dot_dimension_numbers<[1], [1], [0], [0], [0, 0, 1, 0], [], []>} : vector<8x256xf32>, vector<256x256xf32>, vector<8x256xf32> -> vector<8x256xf32>
    %c0_25 = arith.constant 0 : index
    %c0_26 = arith.constant 0 : index
    %55 = vector.load %arg6[%c0_25, %c0_26] : memref<8x8xf32, #tpu.memory_space<vmem>>, vector<8x8xf32>
    %cst_27 = arith.constant dense<0.000000e+00> : vector<8x256xf32>
    %56 = tpu.matmul %55, %54, %cst_27 {dimension_numbers = #tpu.dot_dimension_numbers<[1], [0], [0], [1], [0, 0, 1, 1], [], []>} : vector<8x8xf32>, vector<8x256xf32>, vector<8x256xf32> -> vector<8x256xf32>
    %c0_28 = arith.constant 0 : index
    %c0_29 = arith.constant 0 : index
    %57 = vector.load %arg7[%c0_28, %c0_29] : memref<8x1xf32, #tpu.memory_space<vmem>>, vector<8x1xf32>
    %58 = vector.broadcast %57 : vector<8x1xf32> to vector<8x256xf32>
    %59 = arith.addf %56, %58 : vector<8x256xf32>
    %c0_30 = arith.constant 0 : index
    %c0_31 = arith.constant 0 : index
    %60 = vector.load %arg8[%c0_30, %c0_31] : memref<56x8xf32, #tpu.memory_space<vmem>>, vector<56x8xf32>
    %cst_32 = arith.constant dense<0.000000e+00> : vector<56x256xf32>
    %61 = tpu.matmul %60, %59, %cst_32 {dimension_numbers = #tpu.dot_dimension_numbers<[1], [0], [0], [1], [0, 0, 1, 1], [], []>} : vector<56x8xf32>, vector<8x256xf32>, vector<56x256xf32> -> vector<56x256xf32>
    %cst_33 = arith.constant 0.000000e+00 : f32
    %62 = vector.broadcast %cst_33 : f32 to vector<1x256xf32>
    %63 = vector.extract_strided_slice %61 {offsets = [0, 0], sizes = [1, 256], strides = [1, 1]} : vector<56x256xf32> to vector<1x256xf32>
    %c51_i32 = arith.constant 51 : i32
    %64 = tpu.dynamic_rotate %63 by %c51_i32 dim 1 : vector<1x256xf32>, i32 -> vector<1x256xf32>
    %c0_34 = arith.constant 0 : index
    %c0_35 = arith.constant 0 : index
    %65 = vector.load %arg9[%c0_34, %c0_35] : memref<56x256xf32, #tpu.memory_space<vmem>>, vector<1x256xf32>
    %66 = arith.mulf %64, %65 : vector<1x256xf32>
    %67 = arith.addf %62, %66 : vector<1x256xf32>
    %68 = vector.extract_strided_slice %61 {offsets = [1, 0], sizes = [1, 256], strides = [1, 1]} : vector<56x256xf32> to vector<1x256xf32>
    %c50_i32 = arith.constant 50 : i32
    %69 = tpu.dynamic_rotate %68 by %c50_i32 dim 1 : vector<1x256xf32>, i32 -> vector<1x256xf32>
    %c1 = arith.constant 1 : index
    %c0_36 = arith.constant 0 : index
    %70 = vector.load %arg9[%c1, %c0_36] : memref<56x256xf32, #tpu.memory_space<vmem>>, vector<1x256xf32>
    %71 = arith.mulf %69, %70 : vector<1x256xf32>
    %72 = arith.addf %67, %71 : vector<1x256xf32>
    %73 = vector.extract_strided_slice %61 {offsets = [2, 0], sizes = [1, 256], strides = [1, 1]} : vector<56x256xf32> to vector<1x256xf32>
    %c49_i32 = arith.constant 49 : i32
    %74 = tpu.dynamic_rotate %73 by %c49_i32 dim 1 : vector<1x256xf32>, i32 -> vector<1x256xf32>
    %c2 = arith.constant 2 : index
    %c0_37 = arith.constant 0 : index
    %75 = vector.load %arg9[%c2, %c0_37] : memref<56x256xf32, #tpu.memory_space<vmem>>, vector<1x256xf32>
    %76 = arith.mulf %74, %75 : vector<1x256xf32>
    %77 = arith.addf %72, %76 : vector<1x256xf32>
    %78 = vector.extract_strided_slice %61 {offsets = [3, 0], sizes = [1, 256], strides = [1, 1]} : vector<56x256xf32> to vector<1x256xf32>
    %c48_i32 = arith.constant 48 : i32
    %79 = tpu.dynamic_rotate %78 by %c48_i32 dim 1 : vector<1x256xf32>, i32 -> vector<1x256xf32>
    %c3 = arith.constant 3 : index
    %c0_38 = arith.constant 0 : index
    %80 = vector.load %arg9[%c3, %c0_38] : memref<56x256xf32, #tpu.memory_space<vmem>>, vector<1x256xf32>
    %81 = arith.mulf %79, %80 : vector<1x256xf32>
    %82 = arith.addf %77, %81 : vector<1x256xf32>
    %83 = vector.extract_strided_slice %61 {offsets = [4, 0], sizes = [1, 256], strides = [1, 1]} : vector<56x256xf32> to vector<1x256xf32>
    %c47_i32 = arith.constant 47 : i32
    %84 = tpu.dynamic_rotate %83 by %c47_i32 dim 1 : vector<1x256xf32>, i32 -> vector<1x256xf32>
    %c4 = arith.constant 4 : index
    %c0_39 = arith.constant 0 : index
    %85 = vector.load %arg9[%c4, %c0_39] : memref<56x256xf32, #tpu.memory_space<vmem>>, vector<1x256xf32>
    %86 = arith.mulf %84, %85 : vector<1x256xf32>
    %87 = arith.addf %82, %86 : vector<1x256xf32>
    %88 = vector.extract_strided_slice %61 {offsets = [5, 0], sizes = [1, 256], strides = [1, 1]} : vector<56x256xf32> to vector<1x256xf32>
    %c46_i32 = arith.constant 46 : i32
    %89 = tpu.dynamic_rotate %88 by %c46_i32 dim 1 : vector<1x256xf32>, i32 -> vector<1x256xf32>
    %c5 = arith.constant 5 : index
    %c0_40 = arith.constant 0 : index
    %90 = vector.load %arg9[%c5, %c0_40] : memref<56x256xf32, #tpu.memory_space<vmem>>, vector<1x256xf32>
    %91 = arith.mulf %89, %90 : vector<1x256xf32>
    %92 = arith.addf %87, %91 : vector<1x256xf32>
    %93 = vector.extract_strided_slice %61 {offsets = [6, 0], sizes = [1, 256], strides = [1, 1]} : vector<56x256xf32> to vector<1x256xf32>
    %c45_i32 = arith.constant 45 : i32
    %94 = tpu.dynamic_rotate %93 by %c45_i32 dim 1 : vector<1x256xf32>, i32 -> vector<1x256xf32>
    %c6 = arith.constant 6 : index
    %c0_41 = arith.constant 0 : index
    %95 = vector.load %arg9[%c6, %c0_41] : memref<56x256xf32, #tpu.memory_space<vmem>>, vector<1x256xf32>
    %96 = arith.mulf %94, %95 : vector<1x256xf32>
    %97 = arith.addf %92, %96 : vector<1x256xf32>
    %98 = vector.extract_strided_slice %61 {offsets = [7, 0], sizes = [1, 256], strides = [1, 1]} : vector<56x256xf32> to vector<1x256xf32>
    %c35_i32 = arith.constant 35 : i32
    %99 = tpu.dynamic_rotate %98 by %c35_i32 dim 1 : vector<1x256xf32>, i32 -> vector<1x256xf32>
    %c7 = arith.constant 7 : index
    %c0_42 = arith.constant 0 : index
    %100 = vector.load %arg9[%c7, %c0_42] : memref<56x256xf32, #tpu.memory_space<vmem>>, vector<1x256xf32>
    %101 = arith.mulf %99, %100 : vector<1x256xf32>
    %102 = arith.addf %97, %101 : vector<1x256xf32>
    %103 = vector.extract_strided_slice %61 {offsets = [8, 0], sizes = [1, 256], strides = [1, 1]} : vector<56x256xf32> to vector<1x256xf32>
    %c34_i32 = arith.constant 34 : i32
    %104 = tpu.dynamic_rotate %103 by %c34_i32 dim 1 : vector<1x256xf32>, i32 -> vector<1x256xf32>
    %c8 = arith.constant 8 : index
    %c0_43 = arith.constant 0 : index
    %105 = vector.load %arg9[%c8, %c0_43] : memref<56x256xf32, #tpu.memory_space<vmem>>, vector<1x256xf32>
    %106 = arith.mulf %104, %105 : vector<1x256xf32>
    %107 = arith.addf %102, %106 : vector<1x256xf32>
    %108 = vector.extract_strided_slice %61 {offsets = [9, 0], sizes = [1, 256], strides = [1, 1]} : vector<56x256xf32> to vector<1x256xf32>
    %c33_i32 = arith.constant 33 : i32
    %109 = tpu.dynamic_rotate %108 by %c33_i32 dim 1 : vector<1x256xf32>, i32 -> vector<1x256xf32>
    %c9 = arith.constant 9 : index
    %c0_44 = arith.constant 0 : index
    %110 = vector.load %arg9[%c9, %c0_44] : memref<56x256xf32, #tpu.memory_space<vmem>>, vector<1x256xf32>
    %111 = arith.mulf %109, %110 : vector<1x256xf32>
    %112 = arith.addf %107, %111 : vector<1x256xf32>
    %113 = vector.extract_strided_slice %61 {offsets = [10, 0], sizes = [1, 256], strides = [1, 1]} : vector<56x256xf32> to vector<1x256xf32>
    %c32_i32 = arith.constant 32 : i32
    %114 = tpu.dynamic_rotate %113 by %c32_i32 dim 1 : vector<1x256xf32>, i32 -> vector<1x256xf32>
    %c10 = arith.constant 10 : index
    %c0_45 = arith.constant 0 : index
    %115 = vector.load %arg9[%c10, %c0_45] : memref<56x256xf32, #tpu.memory_space<vmem>>, vector<1x256xf32>
    %116 = arith.mulf %114, %115 : vector<1x256xf32>
    %117 = arith.addf %112, %116 : vector<1x256xf32>
    %118 = vector.extract_strided_slice %61 {offsets = [11, 0], sizes = [1, 256], strides = [1, 1]} : vector<56x256xf32> to vector<1x256xf32>
    %c31_i32 = arith.constant 31 : i32
    %119 = tpu.dynamic_rotate %118 by %c31_i32 dim 1 : vector<1x256xf32>, i32 -> vector<1x256xf32>
    %c11 = arith.constant 11 : index
    %c0_46 = arith.constant 0 : index
    %120 = vector.load %arg9[%c11, %c0_46] : memref<56x256xf32, #tpu.memory_space<vmem>>, vector<1x256xf32>
    %121 = arith.mulf %119, %120 : vector<1x256xf32>
    %122 = arith.addf %117, %121 : vector<1x256xf32>
    %123 = vector.extract_strided_slice %61 {offsets = [12, 0], sizes = [1, 256], strides = [1, 1]} : vector<56x256xf32> to vector<1x256xf32>
    %c30_i32 = arith.constant 30 : i32
    %124 = tpu.dynamic_rotate %123 by %c30_i32 dim 1 : vector<1x256xf32>, i32 -> vector<1x256xf32>
    %c12 = arith.constant 12 : index
    %c0_47 = arith.constant 0 : index
    %125 = vector.load %arg9[%c12, %c0_47] : memref<56x256xf32, #tpu.memory_space<vmem>>, vector<1x256xf32>
    %126 = arith.mulf %124, %125 : vector<1x256xf32>
    %127 = arith.addf %122, %126 : vector<1x256xf32>
    %128 = vector.extract_strided_slice %61 {offsets = [13, 0], sizes = [1, 256], strides = [1, 1]} : vector<56x256xf32> to vector<1x256xf32>
    %c29_i32 = arith.constant 29 : i32
    %129 = tpu.dynamic_rotate %128 by %c29_i32 dim 1 : vector<1x256xf32>, i32 -> vector<1x256xf32>
    %c13 = arith.constant 13 : index
    %c0_48 = arith.constant 0 : index
    %130 = vector.load %arg9[%c13, %c0_48] : memref<56x256xf32, #tpu.memory_space<vmem>>, vector<1x256xf32>
    %131 = arith.mulf %129, %130 : vector<1x256xf32>
    %132 = arith.addf %127, %131 : vector<1x256xf32>
    %133 = vector.extract_strided_slice %61 {offsets = [14, 0], sizes = [1, 256], strides = [1, 1]} : vector<56x256xf32> to vector<1x256xf32>
    %c19_i32 = arith.constant 19 : i32
    %134 = tpu.dynamic_rotate %133 by %c19_i32 dim 1 : vector<1x256xf32>, i32 -> vector<1x256xf32>
    %c14 = arith.constant 14 : index
    %c0_49 = arith.constant 0 : index
    %135 = vector.load %arg9[%c14, %c0_49] : memref<56x256xf32, #tpu.memory_space<vmem>>, vector<1x256xf32>
    %136 = arith.mulf %134, %135 : vector<1x256xf32>
    %137 = arith.addf %132, %136 : vector<1x256xf32>
    %138 = vector.extract_strided_slice %61 {offsets = [15, 0], sizes = [1, 256], strides = [1, 1]} : vector<56x256xf32> to vector<1x256xf32>
    %c18_i32 = arith.constant 18 : i32
    %139 = tpu.dynamic_rotate %138 by %c18_i32 dim 1 : vector<1x256xf32>, i32 -> vector<1x256xf32>
    %c15 = arith.constant 15 : index
    %c0_50 = arith.constant 0 : index
    %140 = vector.load %arg9[%c15, %c0_50] : memref<56x256xf32, #tpu.memory_space<vmem>>, vector<1x256xf32>
    %141 = arith.mulf %139, %140 : vector<1x256xf32>
    %142 = arith.addf %137, %141 : vector<1x256xf32>
    %143 = vector.extract_strided_slice %61 {offsets = [16, 0], sizes = [1, 256], strides = [1, 1]} : vector<56x256xf32> to vector<1x256xf32>
    %c17_i32 = arith.constant 17 : i32
    %144 = tpu.dynamic_rotate %143 by %c17_i32 dim 1 : vector<1x256xf32>, i32 -> vector<1x256xf32>
    %c16 = arith.constant 16 : index
    %c0_51 = arith.constant 0 : index
    %145 = vector.load %arg9[%c16, %c0_51] : memref<56x256xf32, #tpu.memory_space<vmem>>, vector<1x256xf32>
    %146 = arith.mulf %144, %145 : vector<1x256xf32>
    %147 = arith.addf %142, %146 : vector<1x256xf32>
    %148 = vector.extract_strided_slice %61 {offsets = [17, 0], sizes = [1, 256], strides = [1, 1]} : vector<56x256xf32> to vector<1x256xf32>
    %c16_i32 = arith.constant 16 : i32
    %149 = tpu.dynamic_rotate %148 by %c16_i32 dim 1 : vector<1x256xf32>, i32 -> vector<1x256xf32>
    %c17 = arith.constant 17 : index
    %c0_52 = arith.constant 0 : index
    %150 = vector.load %arg9[%c17, %c0_52] : memref<56x256xf32, #tpu.memory_space<vmem>>, vector<1x256xf32>
    %151 = arith.mulf %149, %150 : vector<1x256xf32>
    %152 = arith.addf %147, %151 : vector<1x256xf32>
    %153 = vector.extract_strided_slice %61 {offsets = [18, 0], sizes = [1, 256], strides = [1, 1]} : vector<56x256xf32> to vector<1x256xf32>
    %c15_i32 = arith.constant 15 : i32
    %154 = tpu.dynamic_rotate %153 by %c15_i32 dim 1 : vector<1x256xf32>, i32 -> vector<1x256xf32>
    %c18 = arith.constant 18 : index
    %c0_53 = arith.constant 0 : index
    %155 = vector.load %arg9[%c18, %c0_53] : memref<56x256xf32, #tpu.memory_space<vmem>>, vector<1x256xf32>
    %156 = arith.mulf %154, %155 : vector<1x256xf32>
    %157 = arith.addf %152, %156 : vector<1x256xf32>
    %158 = vector.extract_strided_slice %61 {offsets = [19, 0], sizes = [1, 256], strides = [1, 1]} : vector<56x256xf32> to vector<1x256xf32>
    %c14_i32 = arith.constant 14 : i32
    %159 = tpu.dynamic_rotate %158 by %c14_i32 dim 1 : vector<1x256xf32>, i32 -> vector<1x256xf32>
    %c19 = arith.constant 19 : index
    %c0_54 = arith.constant 0 : index
    %160 = vector.load %arg9[%c19, %c0_54] : memref<56x256xf32, #tpu.memory_space<vmem>>, vector<1x256xf32>
    %161 = arith.mulf %159, %160 : vector<1x256xf32>
    %162 = arith.addf %157, %161 : vector<1x256xf32>
    %163 = vector.extract_strided_slice %61 {offsets = [20, 0], sizes = [1, 256], strides = [1, 1]} : vector<56x256xf32> to vector<1x256xf32>
    %c13_i32 = arith.constant 13 : i32
    %164 = tpu.dynamic_rotate %163 by %c13_i32 dim 1 : vector<1x256xf32>, i32 -> vector<1x256xf32>
    %c20 = arith.constant 20 : index
    %c0_55 = arith.constant 0 : index
    %165 = vector.load %arg9[%c20, %c0_55] : memref<56x256xf32, #tpu.memory_space<vmem>>, vector<1x256xf32>
    %166 = arith.mulf %164, %165 : vector<1x256xf32>
    %167 = arith.addf %162, %166 : vector<1x256xf32>
    %168 = vector.extract_strided_slice %61 {offsets = [21, 0], sizes = [1, 256], strides = [1, 1]} : vector<56x256xf32> to vector<1x256xf32>
    %c3_i32 = arith.constant 3 : i32
    %169 = tpu.dynamic_rotate %168 by %c3_i32 dim 1 : vector<1x256xf32>, i32 -> vector<1x256xf32>
    %c21 = arith.constant 21 : index
    %c0_56 = arith.constant 0 : index
    %170 = vector.load %arg9[%c21, %c0_56] : memref<56x256xf32, #tpu.memory_space<vmem>>, vector<1x256xf32>
    %171 = arith.mulf %169, %170 : vector<1x256xf32>
    %172 = arith.addf %167, %171 : vector<1x256xf32>
    %173 = vector.extract_strided_slice %61 {offsets = [22, 0], sizes = [1, 256], strides = [1, 1]} : vector<56x256xf32> to vector<1x256xf32>
    %c2_i32 = arith.constant 2 : i32
    %174 = tpu.dynamic_rotate %173 by %c2_i32 dim 1 : vector<1x256xf32>, i32 -> vector<1x256xf32>
    %c22 = arith.constant 22 : index
    %c0_57 = arith.constant 0 : index
    %175 = vector.load %arg9[%c22, %c0_57] : memref<56x256xf32, #tpu.memory_space<vmem>>, vector<1x256xf32>
    %176 = arith.mulf %174, %175 : vector<1x256xf32>
    %177 = arith.addf %172, %176 : vector<1x256xf32>
    %178 = vector.extract_strided_slice %61 {offsets = [23, 0], sizes = [1, 256], strides = [1, 1]} : vector<56x256xf32> to vector<1x256xf32>
    %c1_i32 = arith.constant 1 : i32
    %179 = tpu.dynamic_rotate %178 by %c1_i32 dim 1 : vector<1x256xf32>, i32 -> vector<1x256xf32>
    %c23 = arith.constant 23 : index
    %c0_58 = arith.constant 0 : index
    %180 = vector.load %arg9[%c23, %c0_58] : memref<56x256xf32, #tpu.memory_space<vmem>>, vector<1x256xf32>
    %181 = arith.mulf %179, %180 : vector<1x256xf32>
    %182 = arith.addf %177, %181 : vector<1x256xf32>
    %183 = vector.extract_strided_slice %61 {offsets = [24, 0], sizes = [1, 256], strides = [1, 1]} : vector<56x256xf32> to vector<1x256xf32>
    %c24 = arith.constant 24 : index
    %c0_59 = arith.constant 0 : index
    %184 = vector.load %arg9[%c24, %c0_59] : memref<56x256xf32, #tpu.memory_space<vmem>>, vector<1x256xf32>
    %185 = arith.mulf %183, %184 : vector<1x256xf32>
    %186 = arith.addf %182, %185 : vector<1x256xf32>
    %187 = vector.extract_strided_slice %61 {offsets = [25, 0], sizes = [1, 256], strides = [1, 1]} : vector<56x256xf32> to vector<1x256xf32>
    %c255_i32 = arith.constant 255 : i32
    %188 = tpu.dynamic_rotate %187 by %c255_i32 dim 1 : vector<1x256xf32>, i32 -> vector<1x256xf32>
    %c25 = arith.constant 25 : index
    %c0_60 = arith.constant 0 : index
    %189 = vector.load %arg9[%c25, %c0_60] : memref<56x256xf32, #tpu.memory_space<vmem>>, vector<1x256xf32>
    %190 = arith.mulf %188, %189 : vector<1x256xf32>
    %191 = arith.addf %186, %190 : vector<1x256xf32>
    %192 = vector.extract_strided_slice %61 {offsets = [26, 0], sizes = [1, 256], strides = [1, 1]} : vector<56x256xf32> to vector<1x256xf32>
    %c254_i32 = arith.constant 254 : i32
    %193 = tpu.dynamic_rotate %192 by %c254_i32 dim 1 : vector<1x256xf32>, i32 -> vector<1x256xf32>
    %c26 = arith.constant 26 : index
    %c0_61 = arith.constant 0 : index
    %194 = vector.load %arg9[%c26, %c0_61] : memref<56x256xf32, #tpu.memory_space<vmem>>, vector<1x256xf32>
    %195 = arith.mulf %193, %194 : vector<1x256xf32>
    %196 = arith.addf %191, %195 : vector<1x256xf32>
    %197 = vector.extract_strided_slice %61 {offsets = [27, 0], sizes = [1, 256], strides = [1, 1]} : vector<56x256xf32> to vector<1x256xf32>
    %c253_i32 = arith.constant 253 : i32
    %198 = tpu.dynamic_rotate %197 by %c253_i32 dim 1 : vector<1x256xf32>, i32 -> vector<1x256xf32>
    %c27 = arith.constant 27 : index
    %c0_62 = arith.constant 0 : index
    %199 = vector.load %arg9[%c27, %c0_62] : memref<56x256xf32, #tpu.memory_space<vmem>>, vector<1x256xf32>
    %200 = arith.mulf %198, %199 : vector<1x256xf32>
    %201 = arith.addf %196, %200 : vector<1x256xf32>
    %202 = vector.extract_strided_slice %61 {offsets = [28, 0], sizes = [1, 256], strides = [1, 1]} : vector<56x256xf32> to vector<1x256xf32>
    %c243_i32 = arith.constant 243 : i32
    %203 = tpu.dynamic_rotate %202 by %c243_i32 dim 1 : vector<1x256xf32>, i32 -> vector<1x256xf32>
    %c28 = arith.constant 28 : index
    %c0_63 = arith.constant 0 : index
    %204 = vector.load %arg9[%c28, %c0_63] : memref<56x256xf32, #tpu.memory_space<vmem>>, vector<1x256xf32>
    %205 = arith.mulf %203, %204 : vector<1x256xf32>
    %206 = arith.addf %201, %205 : vector<1x256xf32>
    %207 = vector.extract_strided_slice %61 {offsets = [29, 0], sizes = [1, 256], strides = [1, 1]} : vector<56x256xf32> to vector<1x256xf32>
    %c242_i32 = arith.constant 242 : i32
    %208 = tpu.dynamic_rotate %207 by %c242_i32 dim 1 : vector<1x256xf32>, i32 -> vector<1x256xf32>
    %c29 = arith.constant 29 : index
    %c0_64 = arith.constant 0 : index
    %209 = vector.load %arg9[%c29, %c0_64] : memref<56x256xf32, #tpu.memory_space<vmem>>, vector<1x256xf32>
    %210 = arith.mulf %208, %209 : vector<1x256xf32>
    %211 = arith.addf %206, %210 : vector<1x256xf32>
    %212 = vector.extract_strided_slice %61 {offsets = [30, 0], sizes = [1, 256], strides = [1, 1]} : vector<56x256xf32> to vector<1x256xf32>
    %c241_i32 = arith.constant 241 : i32
    %213 = tpu.dynamic_rotate %212 by %c241_i32 dim 1 : vector<1x256xf32>, i32 -> vector<1x256xf32>
    %c30 = arith.constant 30 : index
    %c0_65 = arith.constant 0 : index
    %214 = vector.load %arg9[%c30, %c0_65] : memref<56x256xf32, #tpu.memory_space<vmem>>, vector<1x256xf32>
    %215 = arith.mulf %213, %214 : vector<1x256xf32>
    %216 = arith.addf %211, %215 : vector<1x256xf32>
    %217 = vector.extract_strided_slice %61 {offsets = [31, 0], sizes = [1, 256], strides = [1, 1]} : vector<56x256xf32> to vector<1x256xf32>
    %c240_i32 = arith.constant 240 : i32
    %218 = tpu.dynamic_rotate %217 by %c240_i32 dim 1 : vector<1x256xf32>, i32 -> vector<1x256xf32>
    %c31 = arith.constant 31 : index
    %c0_66 = arith.constant 0 : index
    %219 = vector.load %arg9[%c31, %c0_66] : memref<56x256xf32, #tpu.memory_space<vmem>>, vector<1x256xf32>
    %220 = arith.mulf %218, %219 : vector<1x256xf32>
    %221 = arith.addf %216, %220 : vector<1x256xf32>
    %222 = vector.extract_strided_slice %61 {offsets = [32, 0], sizes = [1, 256], strides = [1, 1]} : vector<56x256xf32> to vector<1x256xf32>
    %c239_i32 = arith.constant 239 : i32
    %223 = tpu.dynamic_rotate %222 by %c239_i32 dim 1 : vector<1x256xf32>, i32 -> vector<1x256xf32>
    %c32 = arith.constant 32 : index
    %c0_67 = arith.constant 0 : index
    %224 = vector.load %arg9[%c32, %c0_67] : memref<56x256xf32, #tpu.memory_space<vmem>>, vector<1x256xf32>
    %225 = arith.mulf %223, %224 : vector<1x256xf32>
    %226 = arith.addf %221, %225 : vector<1x256xf32>
    %227 = vector.extract_strided_slice %61 {offsets = [33, 0], sizes = [1, 256], strides = [1, 1]} : vector<56x256xf32> to vector<1x256xf32>
    %c238_i32 = arith.constant 238 : i32
    %228 = tpu.dynamic_rotate %227 by %c238_i32 dim 1 : vector<1x256xf32>, i32 -> vector<1x256xf32>
    %c33 = arith.constant 33 : index
    %c0_68 = arith.constant 0 : index
    %229 = vector.load %arg9[%c33, %c0_68] : memref<56x256xf32, #tpu.memory_space<vmem>>, vector<1x256xf32>
    %230 = arith.mulf %228, %229 : vector<1x256xf32>
    %231 = arith.addf %226, %230 : vector<1x256xf32>
    %232 = vector.extract_strided_slice %61 {offsets = [34, 0], sizes = [1, 256], strides = [1, 1]} : vector<56x256xf32> to vector<1x256xf32>
    %c237_i32 = arith.constant 237 : i32
    %233 = tpu.dynamic_rotate %232 by %c237_i32 dim 1 : vector<1x256xf32>, i32 -> vector<1x256xf32>
    %c34 = arith.constant 34 : index
    %c0_69 = arith.constant 0 : index
    %234 = vector.load %arg9[%c34, %c0_69] : memref<56x256xf32, #tpu.memory_space<vmem>>, vector<1x256xf32>
    %235 = arith.mulf %233, %234 : vector<1x256xf32>
    %236 = arith.addf %231, %235 : vector<1x256xf32>
    %237 = vector.extract_strided_slice %61 {offsets = [35, 0], sizes = [1, 256], strides = [1, 1]} : vector<56x256xf32> to vector<1x256xf32>
    %c227_i32 = arith.constant 227 : i32
    %238 = tpu.dynamic_rotate %237 by %c227_i32 dim 1 : vector<1x256xf32>, i32 -> vector<1x256xf32>
    %c35 = arith.constant 35 : index
    %c0_70 = arith.constant 0 : index
    %239 = vector.load %arg9[%c35, %c0_70] : memref<56x256xf32, #tpu.memory_space<vmem>>, vector<1x256xf32>
    %240 = arith.mulf %238, %239 : vector<1x256xf32>
    %241 = arith.addf %236, %240 : vector<1x256xf32>
    %242 = vector.extract_strided_slice %61 {offsets = [36, 0], sizes = [1, 256], strides = [1, 1]} : vector<56x256xf32> to vector<1x256xf32>
    %c226_i32 = arith.constant 226 : i32
    %243 = tpu.dynamic_rotate %242 by %c226_i32 dim 1 : vector<1x256xf32>, i32 -> vector<1x256xf32>
    %c36 = arith.constant 36 : index
    %c0_71 = arith.constant 0 : index
    %244 = vector.load %arg9[%c36, %c0_71] : memref<56x256xf32, #tpu.memory_space<vmem>>, vector<1x256xf32>
    %245 = arith.mulf %243, %244 : vector<1x256xf32>
    %246 = arith.addf %241, %245 : vector<1x256xf32>
    %247 = vector.extract_strided_slice %61 {offsets = [37, 0], sizes = [1, 256], strides = [1, 1]} : vector<56x256xf32> to vector<1x256xf32>
    %c225_i32 = arith.constant 225 : i32
    %248 = tpu.dynamic_rotate %247 by %c225_i32 dim 1 : vector<1x256xf32>, i32 -> vector<1x256xf32>
    %c37 = arith.constant 37 : index
    %c0_72 = arith.constant 0 : index
    %249 = vector.load %arg9[%c37, %c0_72] : memref<56x256xf32, #tpu.memory_space<vmem>>, vector<1x256xf32>
    %250 = arith.mulf %248, %249 : vector<1x256xf32>
    %251 = arith.addf %246, %250 : vector<1x256xf32>
    %252 = vector.extract_strided_slice %61 {offsets = [38, 0], sizes = [1, 256], strides = [1, 1]} : vector<56x256xf32> to vector<1x256xf32>
    %c224_i32 = arith.constant 224 : i32
    %253 = tpu.dynamic_rotate %252 by %c224_i32 dim 1 : vector<1x256xf32>, i32 -> vector<1x256xf32>
    %c38 = arith.constant 38 : index
    %c0_73 = arith.constant 0 : index
    %254 = vector.load %arg9[%c38, %c0_73] : memref<56x256xf32, #tpu.memory_space<vmem>>, vector<1x256xf32>
    %255 = arith.mulf %253, %254 : vector<1x256xf32>
    %256 = arith.addf %251, %255 : vector<1x256xf32>
    %257 = vector.extract_strided_slice %61 {offsets = [39, 0], sizes = [1, 256], strides = [1, 1]} : vector<56x256xf32> to vector<1x256xf32>
    %c223_i32 = arith.constant 223 : i32
    %258 = tpu.dynamic_rotate %257 by %c223_i32 dim 1 : vector<1x256xf32>, i32 -> vector<1x256xf32>
    %c39 = arith.constant 39 : index
    %c0_74 = arith.constant 0 : index
    %259 = vector.load %arg9[%c39, %c0_74] : memref<56x256xf32, #tpu.memory_space<vmem>>, vector<1x256xf32>
    %260 = arith.mulf %258, %259 : vector<1x256xf32>
    %261 = arith.addf %256, %260 : vector<1x256xf32>
    %262 = vector.extract_strided_slice %61 {offsets = [40, 0], sizes = [1, 256], strides = [1, 1]} : vector<56x256xf32> to vector<1x256xf32>
    %c222_i32 = arith.constant 222 : i32
    %263 = tpu.dynamic_rotate %262 by %c222_i32 dim 1 : vector<1x256xf32>, i32 -> vector<1x256xf32>
    %c40 = arith.constant 40 : index
    %c0_75 = arith.constant 0 : index
    %264 = vector.load %arg9[%c40, %c0_75] : memref<56x256xf32, #tpu.memory_space<vmem>>, vector<1x256xf32>
    %265 = arith.mulf %263, %264 : vector<1x256xf32>
    %266 = arith.addf %261, %265 : vector<1x256xf32>
    %267 = vector.extract_strided_slice %61 {offsets = [41, 0], sizes = [1, 256], strides = [1, 1]} : vector<56x256xf32> to vector<1x256xf32>
    %c221_i32 = arith.constant 221 : i32
    %268 = tpu.dynamic_rotate %267 by %c221_i32 dim 1 : vector<1x256xf32>, i32 -> vector<1x256xf32>
    %c41 = arith.constant 41 : index
    %c0_76 = arith.constant 0 : index
    %269 = vector.load %arg9[%c41, %c0_76] : memref<56x256xf32, #tpu.memory_space<vmem>>, vector<1x256xf32>
    %270 = arith.mulf %268, %269 : vector<1x256xf32>
    %271 = arith.addf %266, %270 : vector<1x256xf32>
    %272 = vector.extract_strided_slice %61 {offsets = [42, 0], sizes = [1, 256], strides = [1, 1]} : vector<56x256xf32> to vector<1x256xf32>
    %c211_i32 = arith.constant 211 : i32
    %273 = tpu.dynamic_rotate %272 by %c211_i32 dim 1 : vector<1x256xf32>, i32 -> vector<1x256xf32>
    %c42 = arith.constant 42 : index
    %c0_77 = arith.constant 0 : index
    %274 = vector.load %arg9[%c42, %c0_77] : memref<56x256xf32, #tpu.memory_space<vmem>>, vector<1x256xf32>
    %275 = arith.mulf %273, %274 : vector<1x256xf32>
    %276 = arith.addf %271, %275 : vector<1x256xf32>
    %277 = vector.extract_strided_slice %61 {offsets = [43, 0], sizes = [1, 256], strides = [1, 1]} : vector<56x256xf32> to vector<1x256xf32>
    %c210_i32 = arith.constant 210 : i32
    %278 = tpu.dynamic_rotate %277 by %c210_i32 dim 1 : vector<1x256xf32>, i32 -> vector<1x256xf32>
    %c43 = arith.constant 43 : index
    %c0_78 = arith.constant 0 : index
    %279 = vector.load %arg9[%c43, %c0_78] : memref<56x256xf32, #tpu.memory_space<vmem>>, vector<1x256xf32>
    %280 = arith.mulf %278, %279 : vector<1x256xf32>
    %281 = arith.addf %276, %280 : vector<1x256xf32>
    %282 = vector.extract_strided_slice %61 {offsets = [44, 0], sizes = [1, 256], strides = [1, 1]} : vector<56x256xf32> to vector<1x256xf32>
    %c209_i32 = arith.constant 209 : i32
    %283 = tpu.dynamic_rotate %282 by %c209_i32 dim 1 : vector<1x256xf32>, i32 -> vector<1x256xf32>
    %c44 = arith.constant 44 : index
    %c0_79 = arith.constant 0 : index
    %284 = vector.load %arg9[%c44, %c0_79] : memref<56x256xf32, #tpu.memory_space<vmem>>, vector<1x256xf32>
    %285 = arith.mulf %283, %284 : vector<1x256xf32>
    %286 = arith.addf %281, %285 : vector<1x256xf32>
    %287 = vector.extract_strided_slice %61 {offsets = [45, 0], sizes = [1, 256], strides = [1, 1]} : vector<56x256xf32> to vector<1x256xf32>
    %c208_i32 = arith.constant 208 : i32
    %288 = tpu.dynamic_rotate %287 by %c208_i32 dim 1 : vector<1x256xf32>, i32 -> vector<1x256xf32>
    %c45 = arith.constant 45 : index
    %c0_80 = arith.constant 0 : index
    %289 = vector.load %arg9[%c45, %c0_80] : memref<56x256xf32, #tpu.memory_space<vmem>>, vector<1x256xf32>
    %290 = arith.mulf %288, %289 : vector<1x256xf32>
    %291 = arith.addf %286, %290 : vector<1x256xf32>
    %292 = vector.extract_strided_slice %61 {offsets = [46, 0], sizes = [1, 256], strides = [1, 1]} : vector<56x256xf32> to vector<1x256xf32>
    %c207_i32 = arith.constant 207 : i32
    %293 = tpu.dynamic_rotate %292 by %c207_i32 dim 1 : vector<1x256xf32>, i32 -> vector<1x256xf32>
    %c46 = arith.constant 46 : index
    %c0_81 = arith.constant 0 : index
    %294 = vector.load %arg9[%c46, %c0_81] : memref<56x256xf32, #tpu.memory_space<vmem>>, vector<1x256xf32>
    %295 = arith.mulf %293, %294 : vector<1x256xf32>
    %296 = arith.addf %291, %295 : vector<1x256xf32>
    %297 = vector.extract_strided_slice %61 {offsets = [47, 0], sizes = [1, 256], strides = [1, 1]} : vector<56x256xf32> to vector<1x256xf32>
    %c206_i32 = arith.constant 206 : i32
    %298 = tpu.dynamic_rotate %297 by %c206_i32 dim 1 : vector<1x256xf32>, i32 -> vector<1x256xf32>
    %c47 = arith.constant 47 : index
    %c0_82 = arith.constant 0 : index
    %299 = vector.load %arg9[%c47, %c0_82] : memref<56x256xf32, #tpu.memory_space<vmem>>, vector<1x256xf32>
    %300 = arith.mulf %298, %299 : vector<1x256xf32>
    %301 = arith.addf %296, %300 : vector<1x256xf32>
    %302 = vector.extract_strided_slice %61 {offsets = [48, 0], sizes = [1, 256], strides = [1, 1]} : vector<56x256xf32> to vector<1x256xf32>
    %c205_i32 = arith.constant 205 : i32
    %303 = tpu.dynamic_rotate %302 by %c205_i32 dim 1 : vector<1x256xf32>, i32 -> vector<1x256xf32>
    %c48 = arith.constant 48 : index
    %c0_83 = arith.constant 0 : index
    %304 = vector.load %arg9[%c48, %c0_83] : memref<56x256xf32, #tpu.memory_space<vmem>>, vector<1x256xf32>
    %305 = arith.mulf %303, %304 : vector<1x256xf32>
    %306 = arith.addf %301, %305 : vector<1x256xf32>
    %c0_84 = arith.constant 0 : index
    %c0_85 = arith.constant 0 : index
    %307 = memref.load %arg10[%c0_84, %c0_85] : memref<1x1xf32, #tpu.memory_space<smem>>
    %308 = vector.broadcast %307 : f32 to vector<1x256xf32>
    %309 = arith.addf %306, %308 : vector<1x256xf32>
    %cst_86 = arith.constant 5.000000e-01 : f32
    %310 = vector.broadcast %cst_86 : f32 to vector<1x256xf32>
    %311 = arith.mulf %310, %309 : vector<1x256xf32>
    %312 = math.tanh %311 : vector<1x256xf32>
    %cst_87 = arith.constant 1.000000e+00 : f32
    %313 = vector.broadcast %cst_87 : f32 to vector<1x256xf32>
    %314 = arith.addf %312, %313 : vector<1x256xf32>
    %cst_88 = arith.constant 5.000000e-01 : f32
    %315 = vector.broadcast %cst_88 : f32 to vector<1x256xf32>
    %316 = arith.mulf %315, %314 : vector<1x256xf32>
    %317 = vector.broadcast %316 : vector<1x256xf32> to vector<8x256xf32>
    %318 = arith.mulf %34, %317 : vector<8x256xf32>
    %c0_89 = arith.constant 0 : index
    %c0_90 = arith.constant 0 : index
    %c0_91 = arith.constant 0 : index
    %319 = vector.load %arg11[%c0_89, %c0_90, %c0_91] : memref<1x8x256xf32, #tpu.memory_space<vmem>>, vector<1x8x256xf32>
    %320 = vector.shape_cast %319 : vector<1x8x256xf32> to vector<8x256xf32>
    %321 = vector.shape_cast %318 : vector<8x256xf32> to vector<1x8x256xf32>
    tpu.vector_store %arg11[%c0_89, %c0_90, %c0_91], %321 {strides = array<i32>} : memref<1x8x256xf32, #tpu.memory_space<vmem>>, vector<1x8x256xf32>,
    return
  }
  func.func @transform_0(%arg0: i32) -> (i32, i32, i32) {
    %c0_i32 = arith.constant 0 : i32
    %c0_i32_0 = arith.constant 0 : i32
    %c0_i32_1 = arith.constant 0 : i32
    return %arg0, %c0_i32, %c0_i32_0 : i32, i32, i32
  }
  func.func @transform_1(%arg0: i32) -> (i32, i32) {
    %c0_i32 = arith.constant 0 : i32
    %c0_i32_0 = arith.constant 0 : i32
    %c0_i32_1 = arith.constant 0 : i32
    return %c0_i32, %c0_i32_0 : i32, i32
  }
  func.func @transform_2(%arg0: i32) -> (i32, i32) {
    %c0_i32 = arith.constant 0 : i32
    %c0_i32_0 = arith.constant 0 : i32
    %c0_i32_1 = arith.constant 0 : i32
    return %c0_i32, %c0_i32_0 : i32, i32
  }
  func.func @transform_3(%arg0: i32) -> (i32, i32) {
    %c0_i32 = arith.constant 0 : i32
    %c0_i32_0 = arith.constant 0 : i32
    %c0_i32_1 = arith.constant 0 : i32
    return %c0_i32, %c0_i32_0 : i32, i32
  }
  func.func @transform_4(%arg0: i32) -> (i32, i32) {
    %c0_i32 = arith.constant 0 : i32
    %c0_i32_0 = arith.constant 0 : i32
    %c0_i32_1 = arith.constant 0 : i32
    return %c0_i32, %c0_i32_0 : i32, i32
  }
  func.func @transform_5(%arg0: i32) -> (i32, i32) {
    %c0_i32 = arith.constant 0 : i32
    %c0_i32_0 = arith.constant 0 : i32
    %c0_i32_1 = arith.constant 0 : i32
    return %c0_i32, %c0_i32_0 : i32, i32
  }
  func.func @transform_6(%arg0: i32) -> (i32, i32) {
    %c0_i32 = arith.constant 0 : i32
    %c0_i32_0 = arith.constant 0 : i32
    %c0_i32_1 = arith.constant 0 : i32
    return %c0_i32, %c0_i32_0 : i32, i32
  }
  func.func @transform_7(%arg0: i32) -> (i32, i32) {
    %c0_i32 = arith.constant 0 : i32
    %c0_i32_0 = arith.constant 0 : i32
    %c0_i32_1 = arith.constant 0 : i32
    return %c0_i32, %c0_i32_0 : i32, i32
  }
  func.func @transform_8(%arg0: i32) -> (i32, i32) {
    %c0_i32 = arith.constant 0 : i32
    %c0_i32_0 = arith.constant 0 : i32
    %c0_i32_1 = arith.constant 0 : i32
    return %c0_i32, %c0_i32_0 : i32, i32
  }
  func.func @transform_9(%arg0: i32) -> (i32, i32) {
    %c0_i32 = arith.constant 0 : i32
    %c0_i32_0 = arith.constant 0 : i32
    %c0_i32_1 = arith.constant 0 : i32
    return %c0_i32, %c0_i32_0 : i32, i32
  }
  func.func @transform_10(%arg0: i32) -> (i32, i32, i32) {
    %c0_i32 = arith.constant 0 : i32
    %c0_i32_0 = arith.constant 0 : i32
    %c0_i32_1 = arith.constant 0 : i32
    return %arg0, %c0_i32, %c0_i32_0 : i32, i32, i32
  }
}

</mosaic_0001>

<bundles_post_ra>
// kernel: ca_cbam_forward.1
= control target key start
LH: loop header
LB: loop body
LE: loop exit
PB: predicated region body
PF: predicated region fallthrough
CT: control target
= control target key end

     0   :  { %s4942_s15 = smov 0   ;;  %s7010_s0 = inlined_call_operand.vmem [shape: f32[2,8,256], index: 0, kind: input, shape index: {}]   ;;  %s7011_s1 = inlined_call_operand.vmem [shape: f32[24,8], index: 1, kind: input, shape index: {}]   ;;  %s7012_s2 = inlined_call_operand.vmem [shape: f32[8,8], index: 2, kind: input, shape index: {}]   ;;  %s7013_s3 = inlined_call_operand.vmem [shape: f32[8,1], index: 3, kind: input, shape index: {}]   ;;  %s7014_s4 = inlined_call_operand.vmem [shape: f32[24,8], index: 4, kind: input, shape index: {}]   ;;  %s7015_s5 = inlined_call_operand.vmem [shape: f32[8,8], index: 5, kind: input, shape index: {}]   ;;  %s7016_s6 = inlined_call_operand.vmem [shape: f32[8,1], index: 6, kind: input, shape index: {}]   ;;  %s7017_s7 = inlined_call_operand.vmem [shape: f32[56,8], index: 7, kind: input, shape index: {}]   ;;  %s7018_s8 = inlined_call_operand.vmem [shape: f32[56,256], index: 8, kind: input, shape index: {}]   ;;  %s7019_s9 = inlined_call_operand.<no memory space> [shape: f32[1,1], index: 9, kind: input, shape index: {}]   ;;  %s7020_s10 = inlined_call_operand.vmem [shape: f32[2,8,256], index: 10, kind: output, shape index: {}]  }
   0x1   :  { %15 = sst [smem:[#allocation2]] %s7019_s9 }
   0x2 LB: > { %s4230_s16 = sadd.s32 4294967295, %s4832_s15   ;;  %p4234_p0 = scmp.ge.s32.totalorder %s4832_s15, 1  ;;  %s4832_s15 = sphi %s4942_s15, %s21_s15  }
   0x3   : > { %p313_p1 = scmp.lt.s32.totalorder %s4832_s15, 3 }
   0x5   : > { %p314_p2 = pnand %p4234_p0, %p313_p1 }
   0x7   : > { %317 = sbr.rel (%p314_p2) target bundleno = 3469 (0xd8d), region = 60 }
   0xc   : > { %p351_p3 = scmp.lt.s32.totalorder %s4230_s16, 1  ;;  %v7021_v0 = vmov 0.0   ;;  %v363_v3 = vld [vmem:[%s7011_s1] sm:$0xff]  ;;  %vm366_vm0 = vcmask 64512   ;;  %v364_v4 = vld [vmem:[%s7011_s1 + $0x8] sm:$0xff]  ;;  %s4836_s18 = smov 34  }
   0xd   : > { %440 = vmatprep.mubr.f32.mxu0 %v7021_v0  ;;  %685 = vmatprep.mubr.f32.mxu1 %v7021_v0  ;;  %s4838_s20 = smov 50   ;;  %s4839_s21 = smov 49  }
   0xe   : > { %s7207_s16 = smov (!%p351_p3, %s4230_s16), 1  ;;  %s4840_s22 = smov 48  }
   0xf   : > { %s4368_s9 = sshll.u32 %s7207_s16, 4  ;;  %s4841_s23 = smov 47  }
  0x10   : > { %s4960_s19 = scalar_lea.vmem %s7010_s0, %s4368_s9  ;;  %s4842_s24 = smov 46  }
  0x11   : > { %v362_v1 = vld [vmem:[%s4960_s19 + $0x8] sm:$0xff]  ;;  %v361_v2 = vld [vmem:[%s4960_s19] sm:$0xff]  ;;  %s4843_s25 = smov 45   ;;  %s4844_s26 = smov 35  }
  0x12   : > { %406 = vmatprep.subr.mxu0 %v362_v1  ;;  %s4845_s27 = smov 33   ;;  %s4846_s28 = smov 32  }
  0x13   : > { %407 = vmatpush1.msra.mxu0 %v361_v2  ;;  %s4847_s29 = smov 31   ;;  %s4848_s30 = smov 30  }
  0x14   : > { %4239 = vmatmul.mubr.msk.f32.vlgmr.msra.gmra.mxu0 %vm366_vm0, %v363_v3  ;;  %s4849_s11 = smov 29   ;;  %s4850_s12 = smov 19  }
  0x15   : > { %446 = vmatprep.mubr.f32.mxu0 %v7021_v0  ;;  %s4851_s13 = smov 18   ;;  %s4852_s14 = smov 17  }
  0x16   : > { %s4853_s17 = smov 16  }
  0x18   : > { %4240 = vmatmul.mubr.msk.f32.gmra.mxu0 %vm366_vm0, %v364_v4 }
  0x19   : > { %452 = vmatprep.mubr.f32.mxu0 %v7021_v0 }
  0xd4   : > { %v442_v5 = vpop.f32.mrf.mxu0 }
  0xd5   : > { %v459_v6 = vmul.f32 0.70710677, %v442_v5 }
  0xd6   : > { %v444_v7 = vpop.f32.mrf.mxu0 }
  0xd7   : > { %461 = vxpose.xlu0.b32.start.end [1/1] (short) %v459_v6, 128  ;;  %v460_v10 = vmul.f32 0.70710677, %v444_v7 }
  0xd8   : > { %v448_v8 = vpop.f32.mrf.mxu0 }
  0xda   : > { %v450_v9 = vpop.f32.mrf.mxu0 }
  0xdb   : > { %651 = vmatprep.subr.mxu1 %v450_v9 }
  0xdc   : > { %652 = vmatpush1.msra.mxu1 %v448_v8 }
 0x114   : > { %493 = vxpose.xlu0.b32.start.end [1/1] (short) %v460_v10, 128 }
 0x153   : > { %v477_v11 = vpop.trf.xlu0 }
 0x154   : > { %4242 = vmatmul.mubr.msk.f32.vlgmr.msra.gmra.mxu1 %vm366_vm0, %v477_v11 }
 0x155   : > { %691 = vmatprep.mubr.f32.mxu1 %v7021_v0 }
 0x157   : > { %v478_v12 = vpop.trf.xlu0 }
 0x158   : > { %4243 = vmatmul.mubr.msk.f32.gmra.mxu1 %vm366_vm0, %v478_v12 }
 0x159   : > { %697 = vmatprep.mubr.f32.mxu1 %v7021_v0 }
 0x15b   : > { %v479_v13 = vpop.trf.xlu0 }
 0x15c   : > { %4244 = vmatmul.mubr.msk.f32.gmra.mxu1 %vm366_vm0, %v479_v13 }
 0x15d   : > { %703 = vmatprep.mubr.f32.mxu1 %v7021_v0 }
 0x15f   : > { %v480_v14 = vpop.trf.xlu0 }
 0x160   : > { %4245 = vmatmul.mubr.msk.f32.gmra.mxu1 %vm366_vm0, %v480_v14 }
 0x161   : > { %709 = vmatprep.mubr.f32.mxu1 %v7021_v0 }
 0x163   : > { %v481_v15 = vpop.trf.xlu0 }
 0x164   : > { %4246 = vmatmul.mubr.msk.f32.gmra.mxu1 %vm366_vm0, %v481_v15 }
 0x165   : > { %715 = vmatprep.mubr.f32.mxu1 %v7021_v0 }
 0x167   : > { %v482_v16 = vpop.trf.xlu0 }
 0x168   : > { %4247 = vmatmul.mubr.msk.f32.gmra.mxu1 %vm366_vm0, %v482_v16 }
 0x169   : > { %721 = vmatprep.mubr.f32.mxu1 %v7021_v0 }
 0x16b   : > { %v483_v17 = vpop.trf.xlu0 }
 0x16c   : > { %4248 = vmatmul.mubr.msk.f32.gmra.mxu1 %vm366_vm0, %v483_v17 }
 0x16d   : > { %727 = vmatprep.mubr.f32.mxu1 %v7021_v0 }
 0x16f   : > { %v484_v18 = vpop.trf.xlu0 }
 0x170   : > { %4249 = vmatmul.mubr.msk.f32.gmra.mxu1 %vm366_vm0, %v484_v18 }
 0x171   : > { %733 = vmatprep.mubr.f32.mxu1 %v7021_v0 }
 0x173   : > { %v485_v19 = vpop.trf.xlu0 }
 0x174   : > { %4250 = vmatmul.mubr.msk.f32.gmra.mxu1 %vm366_vm0, %v485_v19 }
 0x175   : > { %739 = vmatprep.mubr.f32.mxu1 %v7021_v0 }
 0x177   : > { %v486_v20 = vpop.trf.xlu0 }
 0x178   : > { %4251 = vmatmul.mubr.msk.f32.gmra.mxu1 %vm366_vm0, %v486_v20 }
 0x179   : > { %745 = vmatprep.mubr.f32.mxu1 %v7021_v0 }
 0x17b   : > { %v487_v21 = vpop.trf.xlu0 }
 0x17c   : > { %4252 = vmatmul.mubr.msk.f32.gmra.mxu1 %vm366_vm0, %v487_v21 }
 0x17d   : > { %751 = vmatprep.mubr.f32.mxu1 %v7021_v0 }
 0x17f   : > { %v488_v22 = vpop.trf.xlu0 }
 0x180   : > { %4253 = vmatmul.mubr.msk.f32.gmra.mxu1 %vm366_vm0, %v488_v22 }
 0x181   : > { %757 = vmatprep.mubr.f32.mxu1 %v7021_v0 }
 0x183   : > { %v489_v23 = vpop.trf.xlu0 }
 0x184   : > { %4254 = vmatmul.mubr.msk.f32.gmra.mxu1 %vm366_vm0, %v489_v23 }
 0x185   : > { %763 = vmatprep.mubr.f32.mxu1 %v7021_v0 }
 0x187   : > { %v490_v24 = vpop.trf.xlu0 }
 0x188   : > { %4255 = vmatmul.mubr.msk.f32.gmra.mxu1 %vm366_vm0, %v490_v24 }
 0x189   : > { %769 = vmatprep.mubr.f32.mxu1 %v7021_v0 }
 0x18b   : > { %v491_v25 = vpop.trf.xlu0 }
 0x18c   : > { %4256 = vmatmul.mubr.msk.f32.gmra.mxu1 %vm366_vm0, %v491_v25 }
 0x18d   : > { %775 = vmatprep.mubr.f32.mxu1 %v7021_v0 }
 0x18f   : > { %v492_v26 = vpop.trf.xlu0 }
 0x190   : > { %4257 = vmatmul.mubr.msk.f32.gmra.mxu1 %vm366_vm0, %v492_v26 }
 0x191   : > { %781 = vmatprep.mubr.f32.mxu1 %v7021_v0 }
 0x193   : > { %v509_v27 = vpop.trf.xlu0 }
 0x194   : > { %4258 = vmatmul.mubr.msk.f32.gmra.mxu1 %vm366_vm0, %v509_v27 }
 0x195   : > { %787 = vmatprep.mubr.f32.mxu1 %v7021_v0 }
 0x197   : > { %v510_v28 = vpop.trf.xlu0 }
 0x198   : > { %4259 = vmatmul.mubr.msk.f32.gmra.mxu1 %vm366_vm0, %v510_v28 }
 0x199   : > { %793 = vmatprep.mubr.f32.mxu1 %v7021_v0 }
 0x19b   : > { %v511_v29 = vpop.trf.xlu0 }
 0x19c   : > { %4260 = vmatmul.mubr.msk.f32.gmra.mxu1 %vm366_vm0, %v511_v29 }
 0x19d   : > { %799 = vmatprep.mubr.f32.mxu1 %v7021_v0 }
 0x19f   : > { %v512_v30 = vpop.trf.xlu0 }
 0x1a0   : > { %4261 = vmatmul.mubr.msk.f32.gmra.mxu1 %vm366_vm0, %v512_v30 }
 0x1a1   : > { %805 = vmatprep.mubr.f32.mxu1 %v7021_v0 }
 0x1a3   : > { %v513_v31 = vpop.trf.xlu0 }
 0x1a4   : > { %4262 = vmatmul.mubr.msk.f32.gmra.mxu1 %vm366_vm0, %v513_v31 }
 0x1a5   : > { %811 = vmatprep.mubr.f32.mxu1 %v7021_v0 }
 0x1a7   : > { %v514_v32 = vpop.trf.xlu0 }
 0x1a8   : > { %4263 = vmatmul.mubr.msk.f32.gmra.mxu1 %vm366_vm0, %v514_v32 }
 0x1a9   : > { %817 = vmatprep.mubr.f32.mxu1 %v7021_v0 }
 0x1ab   : > { %v515_v33 = vpop.trf.xlu0 }
 0x1ac   : > { %4264 = vmatmul.mubr.msk.f32.gmra.mxu1 %vm366_vm0, %v515_v33 }
 0x1ad   : > { %823 = vmatprep.mubr.f32.mxu1 %v7021_v0 }
 0x1af   : > { %v516_v34 = vpop.trf.xlu0 }
 0x1b0   : > { %4265 = vmatmul.mubr.msk.f32.gmra.mxu1 %vm366_vm0, %v516_v34 }
 0x1b1   : > { %829 = vmatprep.mubr.f32.mxu1 %v7021_v0 }
 0x1b3   : > { %v517_v35 = vpop.trf.xlu0 }
 0x1b4   : > { %4266 = vmatmul.mubr.msk.f32.gmra.mxu1 %vm366_vm0, %v517_v35 }
 0x1b5   : > { %835 = vmatprep.mubr.f32.mxu1 %v7021_v0 }
 0x1b7   : > { %v518_v36 = vpop.trf.xlu0 }
 0x1b8   : > { %4267 = vmatmul.mubr.msk.f32.gmra.mxu1 %vm366_vm0, %v518_v36 }
 0x1b9   : > { %841 = vmatprep.mubr.f32.mxu1 %v7021_v0 }
 0x1bb   : > { %v519_v37 = vpop.trf.xlu0 }
 0x1bc   : > { %4268 = vmatmul.mubr.msk.f32.gmra.mxu1 %vm366_vm0, %v519_v37 }
 0x1bd   : > { %847 = vmatprep.mubr.f32.mxu1 %v7021_v0 }
 0x1bf   : > { %v520_v38 = vpop.trf.xlu0 }
 0x1c0   : > { %4269 = vmatmul.mubr.msk.f32.gmra.mxu1 %vm366_vm0, %v520_v38 }
 0x1c1   : > { %853 = vmatprep.mubr.f32.mxu1 %v7021_v0 }
 0x1c3   : > { %v521_v39 = vpop.trf.xlu0 }
 0x1c4   : > { %4270 = vmatmul.mubr.msk.f32.gmra.mxu1 %vm366_vm0, %v521_v39 }
 0x1c5   : > { %859 = vmatprep.mubr.f32.mxu1 %v7021_v0 }
 0x1c7   : > { %v522_v40 = vpop.trf.xlu0 }
 0x1c8   : > { %4271 = vmatmul.mubr.msk.f32.gmra.mxu1 %vm366_vm0, %v522_v40 }
 0x1c9   : > { %865 = vmatprep.mubr.f32.mxu1 %v7021_v0 }
 0x1cb   : > { %v523_v41 = vpop.trf.xlu0 }
 0x1cc   : > { %4272 = vmatmul.mubr.msk.f32.gmra.mxu1 %vm366_vm0, %v523_v41 }
 0x1cd   : > { %871 = vmatprep.mubr.f32.mxu1 %v7021_v0 }
 0x1cf   : > { %v524_v42 = vpop.trf.xlu0 }
 0x1d0   : > { %4273 = vmatmul.mubr.msk.f32.gmra.mxu1 %vm366_vm0, %v524_v42 }
 0x214   : > { %v5037_v43 = vpop.f32.mrf.mxu1 }
 0x216   : > { %v5039_v44 = vpop.f32.mrf.mxu1 }
 0x217   : > { %v878_v41 = vmax.f32 %v5037_v43, %v5039_v44 }
 0x218   : > { %v5041_v45 = vpop.f32.mrf.mxu1 }
 0x21a   : > { %v5043_v46 = vpop.f32.mrf.mxu1 }
 0x21b   : > { %v881_v38 = vmax.f32 %v5041_v45, %v5043_v46 }
 0x21c   : > { %v5045_v47 = vpop.f32.mrf.mxu1 }
 0x21e   : > { %v5047_v48 = vpop.f32.mrf.mxu1 }
 0x21f   : > { %v884_v35 = vmax.f32 %v5045_v47, %v5047_v48 }
 0x220   : > { %v5049_v49 = vpop.f32.mrf.mxu1 }
 0x222   : > { %v5051_v50 = vpop.f32.mrf.mxu1 }
 0x223   : > { %v887_v32 = vmax.f32 %v5049_v49, %v5051_v50 }
 0x224   : > { %v5053_v51 = vpop.f32.mrf.mxu1 }
 0x226   : > { %v5055_v52 = vpop.f32.mrf.mxu1 }
 0x227   : > { %v890_v29 = vmax.f32 %v5053_v51, %v5055_v52 }
 0x228   : > { %v5057_v53 = vpop.f32.mrf.mxu1 }
 0x22a   : > { %v5059_v54 = vpop.f32.mrf.mxu1 }
 0x22b   : > { %v893_v26 = vmax.f32 %v5057_v53, %v5059_v54 }
 0x22c   : > { %v5061_v55 = vpop.f32.mrf.mxu1 }
 0x22e   : > { %v5063_v56 = vpop.f32.mrf.mxu1 }
 0x22f   : > { %v896_v23 = vmax.f32 %v5061_v55, %v5063_v56 }
 0x230   : > { %v5065_v57 = vpop.f32.mrf.mxu1 }
 0x232   : > { %v5067_v58 = vpop.f32.mrf.mxu1 }
 0x233   : > { %v899_v59 = vmax.f32 %v5065_v57, %v5067_v58 }
 0x234   : > { %v5071_v60 = vpop.f32.mrf.mxu1 }
 0x235   : > { %900 = vmax.xlane.f32.xlu1 %v899_v59 }
 0x236   : > { %v5073_v61 = vpop.f32.mrf.mxu1 }
 0x237   : > { %v902_v62 = vmax.f32 %v5071_v60, %v5073_v61 }
 0x238   : > { %v5077_v63 = vpop.f32.mrf.mxu1 }
 0x239   : > { %903 = vmax.xlane.f32.xlu1 %v902_v62 }
 0x23a   : > { %v5079_v1 = vpop.f32.mrf.mxu1 }
 0x23b   : > { %v905_v2 = vmax.f32 %v5077_v63, %v5079_v1 }
 0x23c   : > { %v5083_v3 = vpop.f32.mrf.mxu1 }
 0x23d   : > { %906 = vmax.xlane.f32.xlu1 %v905_v2 }
 0x23e   : > { %v5085_v4 = vpop.f32.mrf.mxu1 }
 0x23f   : > { %v908_v5 = vmax.f32 %v5083_v3, %v5085_v4 }
 0x240   : > { %v5089_v6 = vpop.f32.mrf.mxu1 }
 0x241   : > { %909 = vmax.xlane.f32.xlu1 %v908_v5 }
 0x242   : > { %v5091_v7 = vpop.f32.mrf.mxu1 }
 0x243   : > { %v911_v8 = vmax.f32 %v5089_v6, %v5091_v7 }
 0x244   : > { %v5095_v9 = vpop.f32.mrf.mxu1 }
 0x245   : > { %912 = vmax.xlane.f32.xlu1 %v911_v8 }
 0x246   : > { %v5097_v10 = vpop.f32.mrf.mxu1 }
 0x247   : > { %v914_v11 = vmax.f32 %v5095_v9, %v5097_v10 }
 0x248   : > { %v5101_v12 = vpop.f32.mrf.mxu1 }
 0x249   : > { %915 = vmax.xlane.f32.xlu1 %v914_v11 }
 0x24a   : > { %v5103_v13 = vpop.f32.mrf.mxu1 }
 0x24b   : > { %v917_v14 = vmax.f32 %v5101_v12, %v5103_v13 }
 0x24c   : > { %v5107_v15 = vpop.f32.mrf.mxu1 }
 0x24d   : > { %918 = vmax.xlane.f32.xlu1 %v917_v14 }
 0x24e   : > { %v5109_v16 = vpop.f32.mrf.mxu1 }
 0x24f   : > { %v920_v17 = vmax.f32 %v5107_v15, %v5109_v16 }
 0x250   : > { %v5113_v18 = vpop.f32.mrf.mxu1 }
 0x251   : > { %921 = vmax.xlane.f32.xlu1 %v920_v17 }
 0x252   : > { %v5115_v19 = vpop.f32.mrf.mxu1 }
 0x253   : > { %v923_v20 = vmax.f32 %v5113_v18, %v5115_v19 }
 0x254   : > { %v5119_v21 = vpop.f32.mrf.mxu1 }
 0x255   : > { %7083 = vst [vmem:[#allocation3_spill] sm:$0xff] %v5119_v21  ;;  %924 = vmax.xlane.f32.xlu1 %v923_v20 }
 0x256   : > { %v5121_v22 = vpop.f32.mrf.mxu1 }
 0x257   : > { %7084 = vst [vmem:[#allocation4_spill] sm:$0xff] %v5121_v22 }
 0x258   : > { %v5125_v24 = vpop.f32.mrf.mxu1 }
 0x259   : > { %897 = vmax.xlane.f32.xlu1 %v896_v23 }
 0x25a   : > { %v5127_v25 = vpop.f32.mrf.mxu1 }
 0x25c   : > { %v5131_v27 = vpop.f32.mrf.mxu1 }
 0x25d   : > { %894 = vmax.xlane.f32.xlu1 %v893_v26 }
 0x25e   : > { %v5133_v28 = vpop.f32.mrf.mxu1 }
 0x260   : > { %v5137_v30 = vpop.f32.mrf.mxu1 }
 0x261   : > { %891 = vmax.xlane.f32.xlu1 %v890_v29 }
 0x262   : > { %v5139_v31 = vpop.f32.mrf.mxu1 }
 0x264   : > { %v5143_v33 = vpop.f32.mrf.mxu1 }
 0x265   : > { %7085 = vst [vmem:[#allocation5_spill] sm:$0xff] %v5143_v33  ;;  %888 = vmax.xlane.f32.xlu1 %v887_v32 }
 0x266   : > { %v5145_v34 = vpop.f32.mrf.mxu1 }
 0x267   : > { %7086 = vst [vmem:[#allocation6_spill] sm:$0xff] %v5145_v34 }
 0x268   : > { %v5149_v36 = vpop.f32.mrf.mxu1 }
 0x269   : > { %7087 = vst [vmem:[#allocation7_spill] sm:$0xff] %v5149_v36  ;;  %885 = vmax.xlane.f32.xlu1 %v884_v35 }
 0x26a   : > { %v5151_v37 = vpop.f32.mrf.mxu1 }
 0x26b   : > { %7088 = vst [vmem:[#allocation8_spill] sm:$0xff] %v5151_v37 }
 0x26c   : > { %v5155_v39 = vpop.f32.mrf.mxu1 }
 0x26d   : > { %882 = vmax.xlane.f32.xlu1 %v881_v38 }
 0x26e   : > { %v5157_v40 = vpop.f32.mrf.mxu1 }
 0x270   : > { %v5161_v42 = vpop.f32.mrf.mxu1 }
 0x271   : > { %7089 = vst [vmem:[#allocation9_spill] sm:$0xff] %v5161_v42  ;;  %879 = vmax.xlane.f32.xlu1 %v878_v41 }
 0x272   : > { %v5163_v59 = vpop.f32.mrf.mxu1 }
 0x273   : > { %7090 = vst [vmem:[#allocation10_spill] sm:$0xff] %v5163_v59 }
 0x274   : > { %v5165_v62 = vpop.f32.mrf.mxu1 }
 0x276   : > { %v5167_v2 = vpop.f32.mrf.mxu1 }
 0x278   : > { %v5169_v5 = vpop.f32.mrf.mxu1 }
 0x279   : > { %7091 = vst [vmem:[#allocation11_spill] sm:$0xff] %v5169_v5 }
 0x27a   : > { %v5171_v8 = vpop.f32.mrf.mxu1 }
 0x27b   : > { %7092 = vst [vmem:[#allocation12_spill] sm:$0xff] %v5171_v8 }
 0x27c   : > { %v5173_v11 = vpop.f32.mrf.mxu1 }
 0x27e   : > { %v5175_v14 = vpop.f32.mrf.mxu1 }
 0x280   : > { %v5177_v17 = vpop.f32.mrf.mxu1 }
 0x281   : > { %7093 = vst [vmem:[#allocation13_spill] sm:$0xff] %v5177_v17 }
 0x282   : > { %v5179_v20 = vpop.f32.mrf.mxu1 }
 0x283   : > { %7094 = vst [vmem:[#allocation14_spill] sm:$0xff] %v5179_v20  ;;  %v959_v22 = vmax.f32 %v5177_v17, %v5179_v20 }
 0x284   : > { %v5181_v23 = vpop.f32.mrf.mxu1 }
 0x286   : > { %v5183_v26 = vpop.f32.mrf.mxu1 }
 0x287   : > { %7095 = vst [vmem:[#allocation15_spill] sm:$0xff] %v5183_v26  ;;  %v962_v41 = vmax.f32 %v5181_v23, %v5183_v26 }
 0x288   : > { %v5185_v29 = vpop.f32.mrf.mxu1 }
 0x289   : > { %7096 = vst [vmem:[#allocation16_spill] sm:$0xff] %v5185_v29 }
 0x28a   : > { %v5187_v32 = vpop.f32.mrf.mxu1 }
 0x28b   : > { %7097 = vst [vmem:[#allocation17_spill] sm:$0xff] %v5187_v32  ;;  %v965_v35 = vmax.f32 %v5185_v29, %v5187_v32  ;;  %v956_v32 = vmax.f32 %v5173_v11, %v5175_v14  ;;  %v950_v29 = vmax.f32 %v5165_v62, %v5167_v2 }
 0x28c   : > { %v5191_v38 = vpop.f32.mrf.mxu1 }
 0x28d   : > { %966 = vmax.xlane.f32.xlu1 %v965_v35  ;;  %v953_v35 = vmax.f32 %v5169_v5, %v5171_v8 }
 0x28e   : > { %v5195_v0 = vpop.f32.mrf.mxu1 }
 0x28f   : > { %v968_v21 = vmax.f32 %v5191_v38, %v5195_v0 }
 0x290   : > { %v5207_v26 = vpop.f32.mrf.mxu1 }
 0x291   : > { %963 = vmax.xlane.f32.xlu1 %v962_v41  ;;  %969 = vmax.xlane.f32.xlu0 %v968_v21  ;;  %7098 = vst [vmem:[#allocation18_spill] sm:$0xff] %v5207_v26  ;;  %v947_v21 = vmax.f32 %v5161_v42, %v5163_v59 }
 0x292   : > { %v5211_v41 = vpop.f32.mrf.mxu1 }
 0x293   : > { %7099 = vst [vmem:[#allocation19_spill] sm:$0xff] %v5211_v41 }
 0x295   : > { %960 = vmax.xlane.f32.xlu1 %v959_v22  ;;  %v944_v22 = vmax.f32 %v5155_v39, %v5157_v40 }
 0x299   : > { %957 = vmax.xlane.f32.xlu1 %v956_v32  ;;  %v971_v32 = vmax.f32 %v5207_v26, %v5211_v41 }
 0x29d   : > { %954 = vmax.xlane.f32.xlu1 %v953_v35  ;;  %v941_v35 = vmax.f32 %v5149_v36, %v5151_v37 }
 0x2a1   : > { %951 = vmax.xlane.f32.xlu1 %v950_v29  ;;  %v938_v29 = vmax.f32 %v5143_v33, %v5145_v34 }
 0x2a5   : > { %948 = vmax.xlane.f32.xlu1 %v947_v21 }
 0x2a9   : > { %945 = vmax.xlane.f32.xlu1 %v944_v22 }
 0x2ad   : > { %972 = vmax.xlane.f32.xlu1 %v971_v32 }
 0x2b1   : > { %942 = vmax.xlane.f32.xlu1 %v941_v35 }
 0x2b5   : > { %939 = vmax.xlane.f32.xlu1 %v938_v29 }
 0x2be   : > { %v5221_v59 = vpop.xlane.xlu1 %900 }
 0x2c2   : > { %v5223_v21 = vpop.xlane.xlu1 %903 }
 0x2c6   : > { %v907_v42 = vpop.xlane.xlu1 %906 }
 0x2ca   : > { %v910_v8 = vpop.xlane.xlu1 %909 }
 0x2ce   : > { %v913_v5 = vpop.xlane.xlu1 %912 }
 0x2cf   : > { %v996_v22 = vsub.f32 %v5089_v6, %v913_v5  ;;  %v997_v20 = vsub.f32 %v5091_v7, %v913_v5 }
 0x2d1   : > { %v1082_v32 = vmul.f32 1.442695, %v996_v22  ;;  %v1084_v17 = vmul.f32 1.442695, %v997_v20 }
 0x2d2   : > { %v916_v41 = vpop.xlane.xlu1 %915 }
 0x2d3   : > { %4432 = vpow2.f32 %v1082_v32  ;;  %v998_v35 = vsub.f32 %v5095_v9, %v916_v41  ;;  %v999_v37 = vsub.f32 %v5097_v10, %v916_v41  ;;  %v994_v10 = vsub.f32 %v5083_v3, %v910_v8 }
 0x2d4   : > { %4434 = vpow2.f32 %v1084_v17  ;;  %v995_v41 = vsub.f32 %v5085_v4, %v910_v8  ;;  %v993_v32 = vsub.f32 %v5079_v1, %v907_v42 }
 0x2d5   : > { %v1086_v29 = vmul.f32 1.442695, %v998_v35  ;;  %v1088_v36 = vmul.f32 1.442695, %v999_v37 }
 0x2d6   : > { %v919_v34 = vpop.xlane.xlu1 %918 }
 0x2d7   : > { %4436 = vpow2.f32 %v1086_v29  ;;  %v1000_v33 = vsub.f32 %v5101_v12, %v919_v34  ;;  %v1001_v26 = vsub.f32 %v5103_v13, %v919_v34 }
 0x2d8   : > { %4438 = vpow2.f32 %v1088_v36 }
 0x2d9   : > { %v1090_v6 = vmul.f32 1.442695, %v1000_v33  ;;  %v1092_v7 = vmul.f32 1.442695, %v1001_v26  ;;  %v1080_v26 = vmul.f32 1.442695, %v995_v41 }
 0x2da   : > { %v922_v5 = vpop.xlane.xlu1 %921 }
 0x2db   : > { %4440 = vpow2.f32 %v1090_v6  ;;  %v1002_v20 = vsub.f32 %v5107_v15, %v922_v5  ;;  %v1003_v9 = vsub.f32 %v5109_v16, %v922_v5  ;;  %v1078_v15 = vmul.f32 1.442695, %v994_v10 }
 0x2dc   : > { %4442 = vpow2.f32 %v1092_v7 }
 0x2dd   : > { %v1094_v17 = vmul.f32 1.442695, %v1002_v20  ;;  %v1096_v37 = vmul.f32 1.442695, %v1003_v9  ;;  %v1076_v20 = vmul.f32 1.442695, %v993_v32 }
 0x2de   : > { %v925_v22 = vpop.xlane.xlu1 %924 }
 0x2df   : > { %4444 = vpow2.f32 %v1094_v17  ;;  %v1004_v12 = vsub.f32 %v5113_v18, %v925_v22  ;;  %v1005_v13 = vsub.f32 %v5115_v19, %v925_v22  ;;  %v992_v19 = vsub.f32 %v5077_v63, %v907_v42 }
 0x2e0   : > { %v5237_v33 = vpop.eup %4432  ;;  %4446 = vpow2.f32 %v1096_v37  ;;  %v990_v42 = vsub.f32 %v5071_v60, %v5223_v21  ;;  %v991_v17 = vsub.f32 %v5073_v61, %v5223_v21 }
 0x2e1   : > { %v5239_v34 = vpop.eup %4434  ;;  %v1098_v16 = vmul.f32 1.442695, %v1004_v12  ;;  %v1100_v36 = vmul.f32 1.442695, %v1005_v13  ;;  %v1074_v5 = vmul.f32 1.442695, %v992_v19 }
 0x2e2   : > { %v5241_v3 = vpop.xlane.xlu1 %897  ;;  %v1199_v4 = vadd.f32 %v5239_v34, %v5237_v33  ;;  %v1072_v61 = vmul.f32 1.442695, %v991_v17 }
 0x2e3   : > { %4448 = vpow2.f32 %v1098_v16  ;;  %v1070_v16 = vmul.f32 1.442695, %v990_v42 }
 0x2e4   : > { %v5245_v8 = vpop.eup %4436  ;;  %4450 = vpow2.f32 %v1100_v36  ;;  %1200 = vadd.xlane.f32.xlu1 %v1199_v4 }
 0x2e5   : > { %v5247_v18 = vpop.eup %4438  ;;  %4452 = vpow2.f32 %v1078_v15 }
 0x2e6   : > { %4454 = vpow2.f32 %v1080_v26  ;;  %v5251_v35 = vpop.xlane.xlu1 %894  ;;  %v1202_v29 = vadd.f32 %v5247_v18, %v5245_v8 }
 0x2e7   : > { %4456 = vpow2.f32 %v1074_v5 }
 0x2e8   : > { %v5255_v6 = vpop.eup %4440  ;;  %1203 = vadd.xlane.f32.xlu1 %v1202_v29  ;;  %4458 = vpow2.f32 %v1076_v20 }
 0x2e9   : > { %v5257_v7 = vpop.eup %4442 }
 0x2ea   : > { %v5259_v9 = vpop.xlane.xlu1 %891  ;;  %v1205_v63 = vadd.f32 %v5257_v7, %v5255_v6 }
 0x2ec   : > { %v5263_v10 = vpop.eup %4444  ;;  %1206 = vadd.xlane.f32.xlu1 %v1205_v63 }
 0x2ed   : > { %v5265_v1 = vpop.eup %4446 }
 0x2ee   : > { %v889_v37 = vpop.xlane.xlu1 %888  ;;  %v1208_v41 = vadd.f32 %v5265_v1, %v5263_v10 }
 0x2ef   : > { %v980_v22 = vsub.f32 %v5049_v49, %v889_v37  ;;  %v981_v12 = vsub.f32 %v5051_v50, %v889_v37  ;;  %v988_v49 = vsub.f32 %v5065_v57, %v5221_v59  ;;  %v989_v50 = vsub.f32 %v5067_v58, %v5221_v59 }
 0x2f0   : > { %v5275_v13 = vpop.eup %4448  ;;  %1209 = vadd.xlane.f32.xlu1 %v1208_v41  ;;  %v935_v41 = vmax.f32 %v5137_v30, %v5139_v31 }
 0x2f1   : > { %v5277_v15 = vpop.eup %4450  ;;  %v1050_v60 = vmul.f32 1.442695, %v980_v22  ;;  %v1052_v36 = vmul.f32 1.442695, %v981_v12  ;;  %v1066_v63 = vmul.f32 1.442695, %v988_v49 }
 0x2f2   : > { %v5279_v26 = vpop.eup %4452  ;;  %v5281_v21 = vpop.xlane.xlu1 %885  ;;  %v1211_v4 = vadd.f32 %v5277_v15, %v5275_v13  ;;  %v1068_v57 = vmul.f32 1.442695, %v989_v50 }
 0x2f3   : > { %v5285_v19 = vpop.eup %4454  ;;  %4460 = vpow2.f32 %v1050_v60  ;;  %v984_v60 = vsub.f32 %v5057_v53, %v5251_v35  ;;  %v982_v53 = vsub.f32 %v5053_v51, %v5259_v9  ;;  %v929_v51 = vmax.f32 %v5125_v24, %v5127_v25 }
 0x2f4   : > { %4462 = vpow2.f32 %v1052_v36  ;;  %1212 = vadd.xlane.f32.xlu1 %v1211_v4  ;;  %v1196_v29 = vadd.f32 %v5285_v19, %v5279_v26  ;;  %v5295_v37 = vpop.eup %4456 }
 0x2f5   : > { %4464 = vpow2.f32 %v1070_v16  ;;  %v5299_v58 = vpop.eup %4458  ;;  %v1058_v49 = vmul.f32 1.442695, %v984_v60 }
 0x2f6   : > { %4466 = vpow2.f32 %v1072_v61  ;;  %v883_v32 = vpop.xlane.xlu1 %882  ;;  %v1193_v59 = vadd.f32 %v5299_v58, %v5295_v37 }
 0x2f7   : > { %v976_v5 = vsub.f32 %v5041_v45, %v883_v32  ;;  %v977_v20 = vsub.f32 %v5043_v46, %v883_v32  ;;  %v986_v45 = vsub.f32 %v5061_v55, %v5241_v3  ;;  %v987_v46 = vsub.f32 %v5063_v56, %v5241_v3 }
 0x2f8   : > { %1197 = vadd.xlane.f32.xlu1 %v1196_v29  ;;  %v985_v55 = vsub.f32 %v5059_v54, %v5251_v35  ;;  %v932_v3 = vmax.f32 %v5131_v27, %v5133_v28  ;;  %v983_v54 = vsub.f32 %v5055_v52, %v5259_v9  ;;  %v979_v9 = vsub.f32 %v5047_v48, %v5281_v21 }
 0x2f9   : > { %v1042_v42 = vmul.f32 1.442695, %v976_v5  ;;  %v1044_v17 = vmul.f32 1.442695, %v977_v20  ;;  %v1062_v16 = vmul.f32 1.442695, %v986_v45  ;;  %v978_v20 = vsub.f32 %v5045_v47, %v5281_v21 }
 0x2fa   : > { %v1064_v61 = vmul.f32 1.442695, %v987_v46  ;;  %v1060_v50 = vmul.f32 1.442695, %v985_v55  ;;  %v1054_v5 = vmul.f32 1.442695, %v982_v53 }
 0x2fb   : > { %4468 = vpow2.f32 %v1042_v42  ;;  %v1056_v52 = vmul.f32 1.442695, %v983_v54  ;;  %v880_v42 = vpop.xlane.xlu1 %879  ;;  %v365_v47 = vld [vmem:[%s7011_s1 + $0x10] sm:$0xff]  ;;  %v1048_v48 = vmul.f32 1.442695, %v979_v9  ;;  %v7101_v55 = vld [vmem:[#allocation4_spill] sm:$0xff] }
 0x2fc   : > { %4470 = vpow2.f32 %v1044_v17  ;;  %936 = vmax.xlane.f32.xlu1 %v935_v41  ;;  %v1046_v41 = vmul.f32 1.442695, %v978_v20  ;;  %v974_v45 = vsub.f32 %v5037_v43, %v880_v42  ;;  %4241 = vmatmul.mubr.msk.f32.gmra.mxu0 %vm366_vm0, %v365_v47  ;;  %v975_v21 = vsub.f32 %v5039_v44, %v880_v42  ;;  %v7102_v43 = vld [vmem:[#allocation3_spill] sm:$0xff] }
 0x2fd   : > { %4472 = vpow2.f32 %v1066_v63  ;;  %v7103_v42 = vld [vmem:[#allocation15_spill] sm:$0xff] }
 0x2fe   : > { %4474 = vpow2.f32 %v1068_v57 }
 0x2ff   : > { %4476 = vpow2.f32 %v1062_v16  ;;  %v1038_v16 = vmul.f32 1.442695, %v974_v45 }
 0x300   : > { %v5307_v22 = vpop.eup %4460  ;;  %1194 = vadd.xlane.f32.xlu1 %v1193_v59  ;;  %4478 = vpow2.f32 %v1064_v61  ;;  %v7100_v59 = vmov 0.0   ;;  %v1040_v61 = vmul.f32 1.442695, %v975_v21 }
 0x301   : > { %v5309_v12 = vpop.eup %4462  ;;  %4480 = vpow2.f32 %v1058_v49  ;;  %1596 = vmatprep.mubr.f32.mxu0 %v7100_v59  ;;  %v7112_v59 = vld [vmem:[#allocation19_spill] sm:$0xff] }
 0x302   : > { %v5313_v36 = vpop.eup %4464  ;;  %v1175_v56 = vadd.f32 %v5309_v12, %v5307_v22  ;;  %4482 = vpow2.f32 %v1060_v50 }
 0x303   : > { %v5321_v4 = vpop.eup %4466  ;;  %4484 = vpow2.f32 %v1054_v5 }
 0x304   : > { %1176 = vadd.xlane.f32.xlu0 %v1175_v56  ;;  %933 = vmax.xlane.f32.xlu1 %v932_v3  ;;  %v1190_v35 = vadd.f32 %v5321_v4, %v5313_v36  ;;  %4486 = vpow2.f32 %v1056_v52  ;;  %v926_v56 = vmax.f32 %v7102_v43, %v7101_v55 }
 0x305   : > { %4488 = vpow2.f32 %v1046_v41 }
 0x306   : > { %4490 = vpow2.f32 %v1048_v48 }
 0x307   : > { %4492 = vpow2.f32 %v1038_v16 }
 0x308   : > { %v5329_v32 = vpop.eup %4468  ;;  %1191 = vadd.xlane.f32.xlu1 %v1190_v35  ;;  %4494 = vpow2.f32 %v1040_v61 }
 0x309   : > { %v5331_v29 = vpop.eup %4470 }
 0x30a   : > { %v5337_v63 = vpop.eup %4472  ;;  %v1169_v17 = vadd.f32 %v5331_v29, %v5329_v32 }
 0x30b   : > { %v5343_v57 = vpop.eup %4474 }
 0x30c   : > { %1170 = vadd.xlane.f32.xlu0 %v1169_v17  ;;  %930 = vmax.xlane.f32.xlu1 %v929_v51  ;;  %v1187_v46 = vadd.f32 %v5343_v57, %v5337_v63  ;;  %v5354_v60 = vpop.eup %4476 }
 0x30d   : > { %v5358_v3 = vpop.eup %4478 }
 0x30e   : > { %v5360_v44 = vpop.eup %4480  ;;  %v1184_v53 = vadd.f32 %v5358_v3, %v5354_v60 }
 0x30f   : > { %v5366_v50 = vpop.eup %4482 }
 0x310   : > { %1188 = vadd.xlane.f32.xlu1 %v1187_v46  ;;  %v5368_v54 = vpop.eup %4484  ;;  %v1181_v20 = vadd.f32 %v5366_v50, %v5360_v44 }
 0x311   : > { %v5372_v51 = vpop.eup %4486 }
 0x312   : > { %v5378_v45 = vpop.eup %4488  ;;  %v1178_v46 = vadd.f32 %v5372_v51, %v5368_v54 }
 0x313   : > { %v5384_v16 = vpop.eup %4490 }
 0x314   : > { %927 = vmax.xlane.f32.xlu1 %v926_v56  ;;  %v1172_v56 = vadd.f32 %v5384_v16, %v5378_v45 }
 0x316   : > { %v5362_v49 = vpop.xlane.xlu1 %966 }
 0x318   : > { %1185 = vadd.xlane.f32.xlu1 %v1184_v53 }
 0x31a   : > { %v964_v35 = vpop.xlane.xlu1 %963  ;;  %v970_v5 = vpop.xlane.xlu0 %969 }
 0x31b   : > { %v1030_v52 = vsub.f32 %v5181_v23, %v964_v35  ;;  %v1034_v9 = vsub.f32 %v5191_v38, %v970_v5  ;;  %v1031_v17 = vsub.f32 %v7103_v42, %v964_v35  ;;  %v1035_v47 = vsub.f32 %v5195_v0, %v970_v5  ;;  %v5386_v38 = vpop.eup %4492 }
 0x31c   : > { %1182 = vadd.xlane.f32.xlu1 %v1181_v20  ;;  %v5390_v53 = vpop.eup %4494 }
 0x31d   : > { %v1158_v41 = vmul.f32 1.442695, %v1034_v9  ;;  %v1160_v48 = vmul.f32 1.442695, %v1035_v47  ;;  %v1150_v61 = vmul.f32 1.442695, %v1030_v52  ;;  %v1166_v42 = vadd.f32 %v5390_v53, %v5386_v38 }
 0x31e   : > { %v5380_v21 = vpop.xlane.xlu1 %960  ;;  %v1152_v23 = vmul.f32 1.442695, %v1031_v17 }
 0x31f   : > { %4496 = vpow2.f32 %v1158_v41 }
 0x320   : > { %1179 = vadd.xlane.f32.xlu1 %v1178_v46  ;;  %4498 = vpow2.f32 %v1160_v48 }
 0x321   : > { %4500 = vpow2.f32 %v1150_v61 }
 0x322   : > { %v958_v0 = vpop.xlane.xlu1 %957  ;;  %4502 = vpow2.f32 %v1152_v23 }
 0x323   : > { %v1026_v35 = vsub.f32 %v5173_v11, %v958_v0  ;;  %v1027_v5 = vsub.f32 %v5175_v14, %v958_v0 }
 0x324   : > { %1173 = vadd.xlane.f32.xlu1 %v1172_v56 }
 0x325   : > { %v1142_v20 = vmul.f32 1.442695, %v1026_v35  ;;  %v1144_v52 = vmul.f32 1.442695, %v1027_v5 }
 0x326   : > { %v5394_v9 = vpop.xlane.xlu1 %954 }
 0x327   : > { %4504 = vpow2.f32 %v1142_v20 }
 0x328   : > { %4506 = vpow2.f32 %v1144_v52  ;;  %1167 = vadd.xlane.f32.xlu1 %v1166_v42  ;;  %v7109_v42 = vld [vmem:[#allocation16_spill] sm:$0xff] }
 0x32a   : > { %v952_v17 = vpop.xlane.xlu1 %951 }
 0x32b   : > { %v1022_v47 = vsub.f32 %v5165_v62, %v952_v17  ;;  %v1023_v41 = vsub.f32 %v5167_v2, %v952_v17  ;;  %v1032_v17 = vsub.f32 %v7109_v42, %v5362_v49 }
 0x32c   : > { %v5400_v14 = vpop.eup %4496 }
 0x32d   : > { %v1134_v11 = vmul.f32 1.442695, %v1022_v47  ;;  %v1136_v48 = vmul.f32 1.442695, %v1023_v41  ;;  %7104 = vst [vmem:[#allocation4_spill] sm:$0xff] %v5400_v14  ;;  %v5404_v61 = vpop.eup %4498 }
 0x32e   : > { %v5402_v46 = vpop.xlane.xlu1 %948  ;;  %7105 = vst [vmem:[#allocation3_spill] sm:$0xff] %v5404_v61  ;;  %v5406_v23 = vpop.eup %4500  ;;  %v1256_v0 = vadd.f32 %v5404_v61, %v5400_v14  ;;  %v1154_v42 = vmul.f32 1.442695, %v1032_v17 }
 0x32f   : > { %4508 = vpow2.f32 %v1134_v11  ;;  %7106 = vst [vmem:[#allocation15_spill] sm:$0xff] %v5406_v23  ;;  %v5410_v56 = vpop.eup %4502  ;;  %v7110_v11 = vld [vmem:[#allocation17_spill] sm:$0xff] }
 0x330   : > { %4510 = vpow2.f32 %v1136_v48  ;;  %7107 = vst [vmem:[#allocation20_spill] sm:$0xff] %v5410_v56  ;;  %1257 = vadd.xlane.f32.xlu1 %v1256_v0  ;;  %v1250_v20 = vadd.f32 %v5410_v56, %v5406_v23  ;;  %v1033_v48 = vsub.f32 %v7110_v11, %v5362_v49  ;;  %v7113_v56 = vld [vmem:[#allocation13_spill] sm:$0xff]  ;;  %v7114_v49 = vld [vmem:[#allocation14_spill] sm:$0xff] }
 0x331   : > { %v1028_v14 = vsub.f32 %v7113_v56, %v5380_v21 }
 0x332   : > { %v946_v62 = vpop.xlane.xlu1 %945  ;;  %v1156_v61 = vmul.f32 1.442695, %v1033_v48 }
 0x333   : > { %v1018_v2 = vsub.f32 %v5155_v39, %v946_v62  ;;  %v1019_v35 = vsub.f32 %v5157_v40, %v946_v62  ;;  %v7111_v40 = vld [vmem:[#allocation18_spill] sm:$0xff] }
 0x334   : > { %v5414_v5 = vpop.eup %4504  ;;  %1251 = vadd.xlane.f32.xlu1 %v1250_v20  ;;  %v1029_v20 = vsub.f32 %v7114_v49, %v5380_v21 }
 0x335   : > { %7108 = vst [vmem:[#allocation21_spill] sm:$0xff] %v5414_v5  ;;  %v5418_v52 = vpop.eup %4506  ;;  %v1126_v47 = vmul.f32 1.442695, %v1018_v2  ;;  %v1128_v41 = vmul.f32 1.442695, %v1019_v35 }
 0x336   : > { %v973_v0 = vpop.xlane.xlu1 %972  ;;  %v1244_v39 = vadd.f32 %v5418_v52, %v5414_v5  ;;  %v1148_v17 = vmul.f32 1.442695, %v1029_v20 }
 0x337   : > { %4512 = vpow2.f32 %v1126_v47  ;;  %v1036_v62 = vsub.f32 %v7111_v40, %v973_v0  ;;  %v1037_v23 = vsub.f32 %v7112_v59, %v973_v0  ;;  %v1146_v47 = vmul.f32 1.442695, %v1028_v14  ;;  %v7117_v59 = vld [vmem:[#allocation11_spill] sm:$0xff]  ;;  %v7119_v0 = vld [vmem:[#allocation5_spill] sm:$0xff] }
 0x338   : > { %4514 = vpow2.f32 %v1128_v41  ;;  %1245 = vadd.xlane.f32.xlu1 %v1244_v39  ;;  %v1024_v56 = vsub.f32 %v7117_v59, %v5394_v9 }
 0x339   : > { %v1162_v2 = vmul.f32 1.442695, %v1036_v62  ;;  %v1164_v35 = vmul.f32 1.442695, %v1037_v23  ;;  %v7118_v23 = vld [vmem:[#allocation12_spill] sm:$0xff]  ;;  %v7120_v62 = vld [vmem:[#allocation6_spill] sm:$0xff] }
 0x33a   : > { %v943_v11 = vpop.xlane.xlu1 %942  ;;  %v1025_v41 = vsub.f32 %v7118_v23, %v5394_v9  ;;  %v7122_v9 = vld [vmem:[#allocation10_spill] sm:$0xff] }
 0x33b   : > { %4516 = vpow2.f32 %v1162_v2  ;;  %v1138_v2 = vmul.f32 1.442695, %v1024_v56  ;;  %v1021_v59 = vsub.f32 %v7122_v9, %v5402_v46 }
 0x33c   : > { %v5432_v5 = vpop.eup %4508  ;;  %4518 = vpow2.f32 %v1164_v35  ;;  %v1140_v20 = vmul.f32 1.442695, %v1025_v41 }
 0x33d   : > { %7115 = vst [vmem:[#allocation16_spill] sm:$0xff] %v5432_v5  ;;  %v5434_v40 = vpop.eup %4510  ;;  %4520 = vpow2.f32 %v1154_v42  ;;  %v7121_v42 = vld [vmem:[#allocation9_spill] sm:$0xff] }
 0x33e   : > { %7116 = vst [vmem:[#allocation17_spill] sm:$0xff] %v5434_v40  ;;  %4522 = vpow2.f32 %v1156_v61  ;;  %v940_v48 = vpop.xlane.xlu1 %939  ;;  %v1238_v21 = vadd.f32 %v5434_v40, %v5432_v5  ;;  %v1020_v35 = vsub.f32 %v7121_v42, %v5402_v46 }
 0x33f   : > { %v1014_v39 = vsub.f32 %v7119_v0, %v940_v48  ;;  %v1015_v14 = vsub.f32 %v7120_v62, %v940_v48  ;;  %4524 = vpow2.f32 %v1146_v47  ;;  %v7125_v48 = vld [vmem:[#allocation7_spill] sm:$0xff]  ;;  %v7126_v62 = vld [vmem:[#allocation8_spill] sm:$0xff] }
 0x340   : > { %1239 = vadd.xlane.f32.xlu1 %v1238_v21  ;;  %4526 = vpow2.f32 %v1148_v17  ;;  %v1130_v47 = vmul.f32 1.442695, %v1020_v35  ;;  %v1016_v56 = vsub.f32 %v7125_v48, %v943_v11  ;;  %v1132_v21 = vmul.f32 1.442695, %v1021_v59 }
 0x341   : > { %v1118_v49 = vmul.f32 1.442695, %v1014_v39  ;;  %v1120_v61 = vmul.f32 1.442695, %v1015_v14  ;;  %v1017_v39 = vsub.f32 %v7126_v62, %v943_v11 }
 0x342   : > { %v1122_v14 = vmul.f32 1.442695, %v1016_v56 }
 0x343   : > { %4528 = vpow2.f32 %v1118_v49 }
 0x344   : > { %v5448_v23 = vpop.eup %4512  ;;  %4530 = vpow2.f32 %v1120_v61 }
 0x345   : > { %7123 = vst [vmem:[#allocation18_spill] sm:$0xff] %v5448_v23  ;;  %v5450_v0 = vpop.eup %4514  ;;  %4532 = vpow2.f32 %v1138_v2  ;;  %v1124_v2 = vmul.f32 1.442695, %v1017_v39 }
 0x346   : > { %7124 = vst [vmem:[#allocation19_spill] sm:$0xff] %v5450_v0  ;;  %4534 = vpow2.f32 %v1140_v20  ;;  %v1232_v17 = vadd.f32 %v5450_v0, %v5448_v23 }
 0x347   : > { %4536 = vpow2.f32 %v1130_v47 }
 0x348   : > { %v5456_v41 = vpop.eup %4516  ;;  %1233 = vadd.xlane.f32.xlu1 %v1232_v17  ;;  %4538 = vpow2.f32 %v1132_v21 }
 0x349   : > { %v5458_v46 = vpop.eup %4518  ;;  %4540 = vpow2.f32 %v1122_v14 }
 0x34a   : > { %v5460_v42 = vpop.eup %4520  ;;  %v1259_v35 = vadd.f32 %v5458_v46, %v5456_v41  ;;  %4542 = vpow2.f32 %v1124_v2 }
 0x34b   : > { %v5464_v49 = vpop.eup %4522 }
 0x34c   : > { %1260 = vadd.xlane.f32.xlu0 %v1259_v35  ;;  %v5466_v11 = vpop.eup %4524  ;;  %v1253_v61 = vadd.f32 %v5464_v49, %v5460_v42 }
 0x34d   : > { %v5470_v20 = vpop.eup %4526 }
 0x34e   : > { %v1247_v48 = vadd.f32 %v5470_v20, %v5466_v11 }
 0x350   : > { %v5472_v9 = vpop.eup %4528  ;;  %1254 = vadd.xlane.f32.xlu0 %v1253_v61 }
 0x351   : > { %7127 = vst [vmem:[#allocation13_spill] sm:$0xff] %v5472_v9  ;;  %v5474_v59 = vpop.eup %4530 }
 0x352   : > { %7128 = vst [vmem:[#allocation14_spill] sm:$0xff] %v5474_v59  ;;  %v5476_v47 = vpop.eup %4532  ;;  %v1226_v56 = vadd.f32 %v5474_v59, %v5472_v9 }
 0x353   : > { %v5482_v21 = vpop.eup %4534 }
 0x354   : > { %1248 = vadd.xlane.f32.xlu0 %v1247_v48  ;;  %1227 = vadd.xlane.f32.xlu1 %v1226_v56  ;;  %v5484_v62 = vpop.eup %4536  ;;  %v1241_v39 = vadd.f32 %v5482_v21, %v5476_v47 }
 0x355   : > { %7129 = vst [vmem:[#allocation11_spill] sm:$0xff] %v5484_v62  ;;  %v5488_v17 = vpop.eup %4538 }
 0x356   : > { %7130 = vst [vmem:[#allocation12_spill] sm:$0xff] %v5488_v17  ;;  %v5490_v14 = vpop.eup %4540  ;;  %v1235_v2 = vadd.f32 %v5488_v17, %v5484_v62 }
 0x357   : > { %7131 = vst [vmem:[#allocation5_spill] sm:$0xff] %v5490_v14  ;;  %v5494_v35 = vpop.eup %4542 }
 0x358   : > { %1242 = vadd.xlane.f32.xlu0 %v1241_v39  ;;  %7132 = vst [vmem:[#allocation6_spill] sm:$0xff] %v5494_v35  ;;  %v1229_v61 = vadd.f32 %v5494_v35, %v5490_v14 }
 0x35c   : > { %1236 = vadd.xlane.f32.xlu0 %v1235_v2 }
 0x360   : > { %1230 = vadd.xlane.f32.xlu0 %v1229_v61 }
 0x36d   : > { %v1201_v48 = vpop.xlane.xlu1 %1200 }
 0x371   : > { %v1204_v56 = vpop.xlane.xlu1 %1203 }
 0x375   : > { %v1207_v9 = vpop.xlane.xlu1 %1206 }
 0x379   : > { %v1210_v59 = vpop.xlane.xlu1 %1209 }
 0x37a   : > { %4544 = vrcp.f32 %v1210_v59 }
 0x37d   : > { %v1213_v23 = vpop.xlane.xlu1 %1212 }
 0x37e   : > { %4546 = vrcp.f32 %v1213_v23 }
 0x37f   : > { %4548 = vrcp.f32 %v1207_v9 }
 0x380   : > { %4550 = vrcp.f32 %v1204_v56 }
 0x381   : > { %v1198_v39 = vpop.xlane.xlu1 %1197  ;;  %4552 = vrcp.f32 %v1201_v48 }
 0x385   : > { %v937_v0 = vpop.xlane.xlu1 %936 }
 0x386   : > { %v1012_v62 = vsub.f32 %v5137_v30, %v937_v0  ;;  %v1013_v17 = vsub.f32 %v5139_v31, %v937_v0 }
 0x387   : > { %v4545_v61 = vpop.eup %4544 }
 0x388   : > { %v1114_v2 = vmul.f32 1.442695, %v1012_v62  ;;  %v1116_v5 = vmul.f32 1.442695, %v1013_v17  ;;  %v1323_v31 = vmul.f32 %v4545_v61, %v5265_v1 }
 0x389   : > { %v1195_v14 = vpop.xlane.xlu1 %1194 }
 0x38a   : > { %4554 = vpow2.f32 %v1114_v2 }
 0x38b   : > { %v4547_v35 = vpop.eup %4546  ;;  %4556 = vpow2.f32 %v1116_v5 }
 0x38c   : > { %v1325_v59 = vmul.f32 %v4547_v35, %v5277_v15  ;;  %v1324_v23 = vmul.f32 %v4547_v35, %v5275_v13  ;;  %4558 = vrcp.f32 %v1198_v39  ;;  %v4549_v0 = vpop.eup %4548  ;;  %v1322_v15 = vmul.f32 %v4545_v61, %v5263_v10 }
 0x38d   : > { %v934_v40 = vpop.xlane.xlu1 %933  ;;  %4560 = vrcp.f32 %v1195_v14  ;;  %v1321_v13 = vmul.f32 %v4549_v0, %v5257_v7  ;;  %v4551_v35 = vpop.eup %4550 }
 0x38e   : > { %v1010_v9 = vsub.f32 %v5131_v27, %v934_v40  ;;  %v1011_v30 = vsub.f32 %v5133_v28, %v934_v40  ;;  %1358 = vmatprep.subr.mxu1 %v1325_v59  ;;  %v1320_v28 = vmul.f32 %v4549_v0, %v5255_v6  ;;  %v4553_v1 = vpop.eup %4552  ;;  %v1319_v14 = vmul.f32 %v4551_v35, %v5247_v18 }
 0x38f   : > { %1359 = vmatpush1.xpose.msra.mxu1 %v1324_v23  ;;  %v1318_v61 = vmul.f32 %v4551_v35, %v5245_v8  ;;  %v1316_v59 = vmul.f32 %v4553_v1, %v5237_v33 }
 0x390   : > { %v1110_v62 = vmul.f32 1.442695, %v1010_v9  ;;  %v1112_v17 = vmul.f32 1.442695, %v1011_v30  ;;  %1360 = vmatprep.subr.mxu1 %v1323_v31 }
 0x391   : > { %v1192_v5 = vpop.xlane.xlu1 %1191 }
 0x392   : > { %4562 = vpow2.f32 %v1110_v62 }
 0x393   : > { %4564 = vpow2.f32 %v1112_v17  ;;  %1361 = vmatpush1.xpose.msra.mxu1 %v1322_v15 }
 0x394   : > { %1362 = vmatprep.subr.mxu1 %v1321_v13  ;;  %4566 = vrcp.f32 %v1192_v5 }
 0x395   : > { %v931_v27 = vpop.xlane.xlu1 %930 }
 0x396   : > { %v1008_v40 = vsub.f32 %v5125_v24, %v931_v27  ;;  %v1009_v48 = vsub.f32 %v5127_v25, %v931_v27  ;;  %v1317_v24 = vmul.f32 %v4553_v1, %v5239_v34 }
 0x397   : > { %v5511_v56 = vpop.eup %4554  ;;  %1363 = vmatpush1.xpose.msra.mxu1 %v1320_v28 }
 0x398   : > { %v5513_v10 = vpop.eup %4556  ;;  %v1106_v7 = vmul.f32 1.442695, %v1008_v40  ;;  %v1108_v39 = vmul.f32 1.442695, %v1009_v48  ;;  %1364 = vmatprep.subr.mxu1 %v1319_v14 }
 0x399   : > { %v1189_v2 = vpop.xlane.xlu1 %1188  ;;  %v1223_v6 = vadd.f32 %v5513_v10, %v5511_v56  ;;  %v4559_v25 = vpop.eup %4558 }
 0x39a   : > { %4568 = vpow2.f32 %v1106_v7  ;;  %v4561_v23 = vpop.eup %4560  ;;  %v1315_v31 = vmul.f32 %v4559_v25, %v5285_v19  ;;  %v1314_v33 = vmul.f32 %v4559_v25, %v5279_v26 }
 0x39b   : > { %4570 = vpow2.f32 %v1108_v39  ;;  %1224 = vadd.xlane.f32.xlu0 %v1223_v6  ;;  %1365 = vmatpush1.xpose.msra.mxu1 %v1318_v61  ;;  %v1312_v15 = vmul.f32 %v4561_v23, %v5295_v37 }
 0x39c   : > { %4572 = vrcp.f32 %v1189_v2  ;;  %1366 = vmatprep.subr.mxu1 %v1317_v24 }
 0x39d   : > { %v928_v18 = vpop.xlane.xlu1 %927 }
 0x39e   : > { %v1006_v9 = vsub.f32 %v7102_v43, %v928_v18  ;;  %v1007_v30 = vsub.f32 %v7101_v55, %v928_v18  ;;  %v1313_v43 = vmul.f32 %v4561_v23, %v5299_v58  ;;  %v1177_v58 = vpop.xlane.xlu0 %1176 }
 0x39f   : > { %v5523_v8 = vpop.eup %4562  ;;  %1367 = vmatpush1.xpose.msra.mxu1 %v1316_v59 }
 0x3a0   : > { %v5525_v34 = vpop.eup %4564  ;;  %v1102_v0 = vmul.f32 1.442695, %v1006_v9  ;;  %v1104_v62 = vmul.f32 1.442695, %v1007_v30  ;;  %1368 = vmatprep.subr.mxu1 %v1315_v31 }
 0x3a1   : > { %v1186_v17 = vpop.xlane.xlu1 %1185  ;;  %v1220_v5 = vadd.f32 %v5525_v34, %v5523_v8  ;;  %v4567_v55 = vpop.eup %4566 }
 0x3a2   : > { %4574 = vpow2.f32 %v1102_v0  ;;  %v1311_v13 = vmul.f32 %v4567_v55, %v5321_v4  ;;  %v1310_v40 = vmul.f32 %v4567_v55, %v5313_v36  ;;  %v1171_v2 = vpop.xlane.xlu0 %1170 }
 0x3a3   : > { %4576 = vpow2.f32 %v1104_v62  ;;  %1221 = vadd.xlane.f32.xlu1 %v1220_v5  ;;  %1369 = vmatpush1.xpose.msra.mxu1 %v1314_v33 }
 0x3a4   : > { %4578 = vrcp.f32 %v1186_v17  ;;  %1370 = vmatprep.subr.mxu1 %v1313_v43 }
 0x3a5   : > { %v1183_v19 = vpop.xlane.xlu1 %1182 }
 0x3a6   : > { %4580 = vrcp.f32 %v1183_v19  ;;  %v7133_v19 = vld [vmem:[#allocation3_spill] sm:$0xff] }
 0x3a7   : > { %v5533_v35 = vpop.eup %4568  ;;  %1371 = vmatpush1.xpose.msra.mxu1 %v1312_v15 }
 0x3a8   : > { %v5535_v27 = vpop.eup %4570  ;;  %1372 = vmatprep.subr.mxu1 %v1311_v13 }
 0x3a9   : > { %v4573_v26 = vpop.eup %4572  ;;  %v1180_v28 = vpop.xlane.xlu1 %1179  ;;  %v1217_v1 = vadd.f32 %v5535_v27, %v5533_v35 }
 0x3aa   : > { %4582 = vrcp.f32 %v1180_v28  ;;  %v1309_v37 = vmul.f32 %v4573_v26, %v5343_v57  ;;  %v1308_v48 = vmul.f32 %v4573_v26, %v5337_v63 }
 0x3ab   : > { %1218 = vadd.xlane.f32.xlu0 %v1217_v1  ;;  %1373 = vmatpush1.xpose.msra.mxu1 %v1310_v40  ;;  %4584 = vrcp.f32 %v1177_v58  ;;  %v7134_v58 = vld [vmem:[#allocation4_spill] sm:$0xff] }
 0x3ac   : > { %1374 = vmatprep.subr.mxu1 %v1309_v37 }
 0x3ad   : > { %v1174_v4 = vpop.xlane.xlu1 %1173 }
 0x3ae   : > { %4586 = vrcp.f32 %v1174_v4 }
 0x3af   : > { %v5542_v14 = vpop.eup %4574  ;;  %1375 = vmatpush1.xpose.msra.mxu1 %v1308_v48  ;;  %4588 = vrcp.f32 %v1171_v2  ;;  %v7136_v2 = vld [vmem:[#allocation15_spill] sm:$0xff] }
 0x3b0   : > { %v5544_v7 = vpop.eup %4576 }
 0x3b1   : > { %v4579_v39 = vpop.eup %4578  ;;  %v1214_v36 = vadd.f32 %v5544_v7, %v5542_v14  ;;  %v1168_v24 = vpop.xlane.xlu1 %1167 }
 0x3b2   : > { %v1307_v57 = vmul.f32 %v4579_v39, %v5358_v3  ;;  %v1306_v6 = vmul.f32 %v4579_v39, %v5354_v60  ;;  %4590 = vrcp.f32 %v1168_v24 }
 0x3b3   : > { %v4581_v61 = vpop.eup %4580  ;;  %1215 = vadd.xlane.f32.xlu1 %v1214_v36 }
 0x3b4   : > { %1376 = vmatprep.subr.mxu1 %v1307_v57  ;;  %v1305_v63 = vmul.f32 %v4581_v61, %v5366_v50  ;;  %v1304_v25 = vmul.f32 %v4581_v61, %v5360_v44 }
 0x3b5   : > { %1377 = vmatpush1.xpose.msra.mxu1 %v1306_v6 }
 0x3b6   : > { %1378 = vmatprep.subr.mxu1 %v1305_v63 }
 0x3b7   : > { %v4583_v18 = vpop.eup %4582 }
 0x3b8   : > { %v1303_v59 = vmul.f32 %v4583_v18, %v5372_v51  ;;  %v4585_v23 = vpop.eup %4584  ;;  %v1302_v3 = vmul.f32 %v4583_v18, %v5368_v54 }
 0x3b9   : > { %1379 = vmatpush1.xpose.msra.mxu1 %v1304_v25  ;;  %v1301_v60 = vmul.f32 %v4585_v23, %v5309_v12  ;;  %v1300_v50 = vmul.f32 %v4585_v23, %v5307_v22  ;;  %v1258_v17 = vpop.xlane.xlu1 %1257  ;;  %v7137_v25 = vld [vmem:[#allocation21_spill] sm:$0xff] }
 0x3ba   : > { %1380 = vmatprep.subr.mxu1 %v1303_v59  ;;  %4592 = vrcp.f32 %v1258_v17 }
 0x3bb   : > { %v4587_v9 = vpop.eup %4586 }
 0x3bc   : > { %v1299_v30 = vmul.f32 %v4587_v9, %v5384_v16  ;;  %v4589_v44 = vpop.eup %4588  ;;  %v1298_v31 = vmul.f32 %v4587_v9, %v5378_v45  ;;  %v5562_v16 = vpop.f32.mrf.mxu0 }
 0x3bd   : > { %1381 = vmatpush1.xpose.msra.mxu1 %v1302_v3  ;;  %v1297_v51 = vmul.f32 %v4589_v44, %v5331_v29  ;;  %v1296_v54 = vmul.f32 %v4589_v44, %v5329_v32  ;;  %v1252_v5 = vpop.xlane.xlu1 %1251 }
 0x3be   : > { %1382 = vmatprep.subr.mxu1 %v1301_v60  ;;  %v456_v62 = vpop.f32.mrf.mxu0 }
 0x3bf   : > { %v4591_v0 = vpop.eup %4590  ;;  %1422 = vmatprep.mubr.f32.mxu1 %v456_v62  ;;  %v7144_v62 = vld [vmem:[#allocation6_spill] sm:$0xff] }
 0x3c0   : > { %v1295_v12 = vmul.f32 %v4591_v0, %v5390_v53  ;;  %v1294_v22 = vmul.f32 %v4591_v0, %v5386_v38  ;;  %v7142_v0 = vld [vmem:[#allocation19_spill] sm:$0xff] }
 0x3c1   : > { %1383 = vmatpush1.xpose.msra.mxu1 %v1300_v50  ;;  %v1246_v43 = vpop.xlane.xlu1 %1245 }
 0x3c2   : > { %1384 = vmatprep.subr.mxu1 %v1299_v30  ;;  %v7140_v30 = vld [vmem:[#allocation12_spill] sm:$0xff] }
 0x3c5   : > { %1385 = vmatpush1.xpose.msra.mxu1 %v1298_v31 }
 0x3c6   : > { %1386 = vmatprep.subr.mxu1 %v1297_v51 }
 0x3c7   : > { %v4593_v33 = vpop.eup %4592 }
 0x3c8   : > { %v1355_v15 = vmul.f32 %v4593_v33, %v7133_v19  ;;  %v1354_v28 = vmul.f32 %v4593_v33, %v7134_v58 }
 0x3c9   : > { %1387 = vmatpush1.xpose.msra.mxu1 %v1296_v54  ;;  %v1240_v37 = vpop.xlane.xlu1 %1239 }
 0x3ca   : > { %1388 = vmatprep.subr.mxu1 %v1295_v12 }
 0x3cd   : > { %1389 = vmatpush1.xpose.msra.mxu1 %v1294_v22 }
 0x3d5   : > { %v1261_v45 = vpop.xlane.xlu0 %1260 }
 0x3d6   : > { %4594 = vrcp.f32 %v1261_v45 }
 0x3d9   : > { %v1255_v29 = vpop.xlane.xlu0 %1254 }
 0x3da   : > { %4596 = vrcp.f32 %v1255_v29  ;;  %v7145_v29 = vld [vmem:[#allocation5_spill] sm:$0xff] }
 0x3db   : > { %4598 = vrcp.f32 %v1252_v5 }
 0x3dd   : > { %v1249_v32 = vpop.xlane.xlu0 %1248 }
 0x3de   : > { %4600 = vrcp.f32 %v1249_v32  ;;  %v7146_v32 = vld [vmem:[#allocation14_spill] sm:$0xff] }
 0x3df   : > { %4602 = vrcp.f32 %v1246_v43 }
 0x3e1   : > { %v1243_v26 = vpop.xlane.xlu0 %1242 }
 0x3e2   : > { %4604 = vrcp.f32 %v1243_v26 }
 0x3e3   : > { %v4595_v53 = vpop.eup %4594  ;;  %4606 = vrcp.f32 %v1240_v37 }
 0x3e4   : > { %v1357_v38 = vmul.f32 %v4595_v53, %v5458_v46  ;;  %v1356_v55 = vmul.f32 %v4595_v53, %v5456_v41  ;;  %v7135_v41 = vld [vmem:[#allocation20_spill] sm:$0xff]  ;;  %v7147_v53 = vld [vmem:[#allocation13_spill] sm:$0xff] }
 0x3e5   : > { %v1237_v39 = vpop.xlane.xlu0 %1236 }
 0x3e6   : > { %1390 = vmatprep.subr.mxu1 %v1357_v38  ;;  %4608 = vrcp.f32 %v1237_v39 }
 0x3e7   : > { %v4597_v13 = vpop.eup %4596  ;;  %1391 = vmatpush2.xpose.msra.mxu1 %v1356_v55 }
 0x3e8   : > { %1392 = vmatprep.subr.mxu1 %v1355_v15  ;;  %v1353_v1 = vmul.f32 %v4597_v13, %v5464_v49  ;;  %v4599_v40 = vpop.eup %4598  ;;  %v1352_v46 = vmul.f32 %v4597_v13, %v5460_v42  ;;  %v1234_v49 = vpop.xlane.xlu1 %1233 }
 0x3e9   : > { %v1351_v4 = vmul.f32 %v4599_v40, %v7135_v41  ;;  %v1350_v36 = vmul.f32 %v4599_v40, %v7136_v2  ;;  %4610 = vrcp.f32 %v1234_v49  ;;  %v1231_v24 = vpop.xlane.xlu0 %1230 }
 0x3ea   : > { %4612 = vrcp.f32 %v1231_v24 }
 0x3eb   : > { %1393 = vmatpush2.xpose.msra.mxu1 %v1354_v28  ;;  %v4601_v48 = vpop.eup %4600 }
 0x3ec   : > { %1394 = vmatprep.subr.mxu1 %v1353_v1  ;;  %v1349_v57 = vmul.f32 %v4601_v48, %v5470_v20  ;;  %v4603_v6 = vpop.eup %4602  ;;  %v1348_v61 = vmul.f32 %v4601_v48, %v5466_v11  ;;  %v1228_v20 = vpop.xlane.xlu1 %1227  ;;  %v7138_v11 = vld [vmem:[#allocation17_spill] sm:$0xff] }
 0x3ed   : > { %v1347_v42 = vmul.f32 %v4603_v6, %v5418_v52  ;;  %v1346_v18 = vmul.f32 %v4603_v6, %v7137_v25  ;;  %4614 = vrcp.f32 %v1228_v20  ;;  %v7139_v52 = vld [vmem:[#allocation16_spill] sm:$0xff] }
 0x3ef   : > { %1395 = vmatpush2.xpose.msra.mxu1 %v1352_v46  ;;  %v4605_v63 = vpop.eup %4604 }
 0x3f0   : > { %1396 = vmatprep.subr.mxu1 %v1351_v4  ;;  %v1345_v59 = vmul.f32 %v4605_v63, %v5482_v21  ;;  %v4607_v23 = vpop.eup %4606  ;;  %v1344_v3 = vmul.f32 %v4605_v63, %v5476_v47  ;;  %v7141_v21 = vld [vmem:[#allocation11_spill] sm:$0xff]  ;;  %v7143_v47 = vld [vmem:[#allocation18_spill] sm:$0xff] }
 0x3f1   : > { %v1343_v60 = vmul.f32 %v4607_v23, %v7138_v11  ;;  %v1342_v50 = vmul.f32 %v4607_v23, %v7139_v52  ;;  %v4825_v23 = vld [vmem:[%s4960_s19] sm:$0xff]  ;;  %v1521_v11 = vld [vmem:[%s7014_s4 + $0x8] sm:$0xff] }
 0x3f3   : > { %1397 = vmatpush2.xpose.msra.mxu1 %v1350_v36  ;;  %v4609_v9 = vpop.eup %4608 }
 0x3f4   : > { %1398 = vmatprep.subr.mxu1 %v1349_v57  ;;  %v1341_v44 = vmul.f32 %v4609_v9, %v7140_v30  ;;  %v1340_v51 = vmul.f32 %v4609_v9, %v7141_v21 }
 0x3f6   : > { %v4611_v31 = vpop.eup %4610 }
 0x3f7   : > { %1399 = vmatpush2.xpose.msra.mxu1 %v1348_v61  ;;  %v1339_v54 = vmul.f32 %v4611_v31, %v7142_v0  ;;  %v4613_v12 = vpop.eup %4612  ;;  %v1338_v22 = vmul.f32 %v4611_v31, %v7143_v47 }
 0x3f8   : > { %1400 = vmatprep.subr.mxu1 %v1347_v42  ;;  %v1337_v17 = vmul.f32 %v4613_v12, %v7144_v62  ;;  %v1336_v5 = vmul.f32 %v4613_v12, %v7145_v29 }
 0x3fa   : > { %v4615_v45 = vpop.eup %4614 }
 0x3fb   : > { %1401 = vmatpush2.xpose.msra.mxu1 %v1346_v18  ;;  %v1335_v33 = vmul.f32 %v4615_v45, %v7146_v32  ;;  %v1334_v43 = vmul.f32 %v4615_v45, %v7147_v53  ;;  %v4824_v18 = vld [vmem:[%s4960_s19 + $0x8] sm:$0xff]  ;;  %s4837_s19 = smov 51  }
 0x3fc   : > { %1402 = vmatprep.subr.mxu1 %v1345_v59 }
 0x3ff   : > { %1403 = vmatpush2.xpose.msra.mxu1 %v1344_v3  ;;  %v1520_v3 = vld [vmem:[%s7014_s4] sm:$0xff] }
 0x400   : > { %1404 = vmatprep.subr.mxu1 %v1343_v60  ;;  %v1522_v60 = vld [vmem:[%s7014_s4 + $0x10] sm:$0xff] }
 0x403   : > { %1405 = vmatpush2.xpose.msra.mxu1 %v1342_v50 }
 0x404   : > { %1406 = vmatprep.subr.mxu1 %v1341_v44 }
 0x407   : > { %1407 = vmatpush2.xpose.msra.mxu1 %v1340_v51 }
 0x408   : > { %1408 = vmatprep.subr.mxu1 %v1339_v54 }
 0x40b   : > { %1409 = vmatpush2.xpose.msra.mxu1 %v1338_v22 }
 0x40c   : > { %1410 = vmatprep.subr.mxu1 %v1337_v17 }
 0x40f   : > { %1411 = vmatpush2.xpose.msra.mxu1 %v1336_v5 }
 0x410   : > { %1412 = vmatprep.subr.mxu1 %v1335_v33 }
 0x413   : > { %1413 = vmatpush2.xpose.msra.mxu1 %v1334_v43 }
 0x424   : > { %v1225_v38 = vpop.xlane.xlu0 %1224 }
 0x425   : > { %4616 = vrcp.f32 %v1225_v38 }
 0x42c   : > { %v1222_v55 = vpop.xlane.xlu1 %1221 }
 0x42d   : > { %4618 = vrcp.f32 %v1222_v55 }
 0x432   : > { %v4617_v19 = vpop.eup %4616 }
 0x433   : > { %v1333_v15 = vmul.f32 %v4617_v19, %v5513_v10  ;;  %v1332_v13 = vmul.f32 %v4617_v19, %v5511_v56 }
 0x434   : > { %v1219_v26 = vpop.xlane.xlu0 %1218 }
 0x435   : > { %4620 = vrcp.f32 %v1219_v26  ;;  %1414 = vmatprep.subr.mxu1 %v1333_v15 }
 0x436   : > { %1415 = vmatpush2.xpose.msra.mxu1 %v1332_v13 }
 0x43a   : > { %v4619_v58 = vpop.eup %4618 }
 0x43b   : > { %v1331_v28 = vmul.f32 %v4619_v58, %v5525_v34  ;;  %v1330_v1 = vmul.f32 %v4619_v58, %v5523_v8  ;;  %v7148_v8 = vmov 0.0   ;;  %v1430_v34 = vld [vmem:[%s7013_s3] sm:$0xff] }
 0x43c   : > { %v1216_v40 = vpop.xlane.xlu1 %1215 }
 0x43d   : > { %4622 = vrcp.f32 %v1216_v40  ;;  %1416 = vmatprep.subr.mxu1 %v1331_v28 }
 0x43e   : > { %1417 = vmatpush2.xpose.msra.mxu1 %v1330_v1 }
 0x442   : > { %v4621_v37 = vpop.eup %4620 }
 0x443   : > { %v1329_v46 = vmul.f32 %v4621_v37, %v5535_v27  ;;  %v1328_v10 = vmul.f32 %v4621_v37, %v5533_v35  ;;  %v4835_v27 = vmov 0  }
 0x444   : > { %4430 = vset.pattern.permute.xlu0 %v4835_v27 }
 0x445   : > { %1418 = vmatprep.subr.mxu1 %v1329_v46  ;;  %1433 = vperm.xlu0 %4430, %v1430_v34  }
 0x446   : > { %1419 = vmatpush2.xpose.msra.mxu1 %v1328_v10 }
 0x44a   : > { %v4623_v56 = vpop.eup %4622 }
 0x44b   : > { %v1327_v41 = vmul.f32 %v4623_v56, %v5544_v7  ;;  %v1326_v4 = vmul.f32 %v4623_v56, %v5542_v14  ;;  %v1429_v7 = vld [vmem:[%s7012_s2] sm:$0xff] }
 0x44d   : > { %1420 = vmatprep.subr.mxu1 %v1327_v41 }
 0x44e   : > { %1421 = vmatpush2.xpose.msra.mxu1 %v1326_v4 }
 0x451   : > { %1423 = vmatmul.mubr.f32.vlgmr.msra.gmra.mxu1 %v5562_v16 }
 0x452   : > { %1503 = vmatprep.mubr.f32.mxu1 %v7148_v8 }
 0x4c0   : > { %v1434_v14 = vpop.permute.xlu0 %1433 }
 0x511   : > { %v1424_v35 = vpop.f32.mrf.mxu1 }
 0x513   : > { %v1426_v48 = vpop.f32.mrf.mxu1 }
 0x514   : > { %1469 = vmatprep.subr.mxu1 %v1426_v48 }
 0x515   : > { %1470 = vmatpush1.msra.mxu1 %v1424_v35 }
 0x516   : > { %4274 = vmatmul.mubr.msk.f32.vlgmr.msra.gmra.mxu1 %vm366_vm0, %v1429_v7 }
 0x517   : > { %2659 = vmatprep.mubr.f32.mxu1 %v7148_v8 }
 0x5d6   : > { %v1505_v16 = vpop.f32.mrf.mxu1 }
 0x5d7   : > { %v1506_v39 = vadd.f32 %v1505_v16, %v1434_v14 }
 0x5d8   : > { %v1507_v2 = vpop.f32.mrf.mxu1 }
 0x5d9   : > { %v1510_v36 = vmul.f32 0.5, %v1506_v39  ;;  %v1508_v57 = vadd.f32 %v1507_v2, %v1434_v14 }
 0x5db   : > { %4624 = vtanh.f32 %v1510_v36  ;;  %v1511_v6 = vmul.f32 0.5, %v1508_v57 }
 0x5dd   : > { %4626 = vtanh.f32 %v1511_v6 }
 0x5e8   : > { %v4625_v49 = vpop.eup %4624 }
 0x5e9   : > { %v1514_v61 = vadd.f32 1.0, %v4625_v49 }
 0x5ea   : > { %v4627_v42 = vpop.eup %4626 }
 0x5eb   : > { %v1515_v63 = vadd.f32 1.0, %v4627_v42  ;;  %v1516_v24 = vmul.f32 0.5, %v1514_v61 }
 0x5ed   : > { %v1517_v25 = vmul.f32 0.5, %v1515_v63  ;;  %v5610_v20 = vmul.f32 %v4825_v23, %v1516_v24 }
 0x5ef   : > { %v5607_v59 = vmul.f32 %v4824_v18, %v1517_v25  ;;  %7150 = vst [vmem:[#allocation10_spill] sm:$0xff] %v5610_v20 }
 0x5f1   : > { %7149 = vst [vmem:[#allocation9_spill] sm:$0xff] %v5607_v59  ;;  %1562 = vmatprep.subr.mxu0 %v5607_v59 }
 0x5f2   : > { %1563 = vmatpush1.msra.mxu0 %v5610_v20 }
 0x5f3   : > { %4275 = vmatmul.mubr.msk.f32.vlgmr.msra.gmra.mxu0 %vm366_vm0, %v1520_v3 }
 0x5f4   : > { %1602 = vmatprep.mubr.f32.mxu0 %v7148_v8 }
 0x5f7   : > { %4276 = vmatmul.mubr.msk.f32.gmra.mxu0 %vm366_vm0, %v1521_v11 }
 0x5f8   : > { %1608 = vmatprep.mubr.f32.mxu0 %v7148_v8 }
 0x5fb   : > { %4277 = vmatmul.mubr.msk.f32.gmra.mxu0 %vm366_vm0, %v1522_v60 }
 0x5fc   : > { %1841 = vmatprep.mubr.f32.mxu0 %v7148_v8 }
 0x6b3   : > { %v1598_v9 = vpop.f32.mrf.mxu0 }
 0x6b4   : > { %v1615_v52 = vmul.f32 0.70710677, %v1598_v9 }
 0x6b5   : > { %v1600_v50 = vpop.f32.mrf.mxu0 }
 0x6b6   : > { %1617 = vxpose.xlu1.b32.start.end [1/1] (short) %v1615_v52, 128  ;;  %v1616_v30 = vmul.f32 0.70710677, %v1600_v50 }
 0x6b7   : > { %v1604_v44 = vpop.f32.mrf.mxu0 }
 0x6b8   : > { %1649 = vxpose.xlu0.b32.start.end [1/1] (short) %v1616_v30, 128 }
 0x6b9   : > { %v1606_v31 = vpop.f32.mrf.mxu0 }
 0x6ba   : > { %1807 = vmatprep.subr.mxu0 %v1606_v31 }
 0x6bb   : > { %1808 = vmatpush1.msra.mxu0 %v1604_v44  ;;  %v5689_v4 = vpop.f32.mrf.mxu0 }
 0x6bc   : > { %7151 = vst [vmem:[#allocation7_spill] sm:$0xff] %v5689_v4 }
 0x6d4   : > { %4431 = vset.pattern.permute.xlu1 %v4835_v27  ;;  %v1612_v27 = vpop.f32.mrf.mxu0 }
 0x732   : > { %v1633_v21 = vpop.trf.xlu1 }
 0x733   : > { %4278 = vmatmul.mubr.msk.f32.vlgmr.msra.gmra.mxu0 %vm366_vm0, %v1633_v21 }
 0x734   : > { %1847 = vmatprep.mubr.f32.mxu0 %v7148_v8  ;;  %v1665_v45 = vpop.trf.xlu0 }
 0x736   : > { %v1634_v51 = vpop.trf.xlu1 }
 0x737   : > { %4279 = vmatmul.mubr.msk.f32.gmra.mxu0 %vm366_vm0, %v1634_v51 }
 0x738   : > { %1853 = vmatprep.mubr.f32.mxu0 %v7148_v8  ;;  %v1666_v5 = vpop.trf.xlu0 }
 0x73a   : > { %v1635_v0 = vpop.trf.xlu1 }
 0x73b   : > { %4280 = vmatmul.mubr.msk.f32.gmra.mxu0 %vm366_vm0, %v1635_v0 }
 0x73c   : > { %1859 = vmatprep.mubr.f32.mxu0 %v7148_v8  ;;  %v1667_v53 = vpop.trf.xlu0 }
 0x73e   : > { %v1636_v54 = vpop.trf.xlu1 }
 0x73f   : > { %4281 = vmatmul.mubr.msk.f32.gmra.mxu0 %vm366_vm0, %v1636_v54 }
 0x740   : > { %1865 = vmatprep.mubr.f32.mxu0 %v7148_v8  ;;  %v1668_v38 = vpop.trf.xlu0 }
 0x742   : > { %v1637_v12 = vpop.trf.xlu1 }
 0x743   : > { %4282 = vmatmul.mubr.msk.f32.gmra.mxu0 %vm366_vm0, %v1637_v12 }
 0x744   : > { %1871 = vmatprep.mubr.f32.mxu0 %v7148_v8  ;;  %v1669_v15 = vpop.trf.xlu0 }
 0x746   : > { %v1638_v47 = vpop.trf.xlu1 }
 0x747   : > { %4283 = vmatmul.mubr.msk.f32.gmra.mxu0 %vm366_vm0, %v1638_v47 }
 0x748   : > { %1877 = vmatprep.mubr.f32.mxu0 %v7148_v8  ;;  %v1670_v26 = vpop.trf.xlu0 }
 0x74a   : > { %v1639_v22 = vpop.trf.xlu1 }
 0x74b   : > { %4284 = vmatmul.mubr.msk.f32.gmra.mxu0 %vm366_vm0, %v1639_v22 }
 0x74c   : > { %1883 = vmatprep.mubr.f32.mxu0 %v7148_v8  ;;  %v1671_v58 = vpop.trf.xlu0 }
 0x74e   : > { %v1640_v62 = vpop.trf.xlu1 }
 0x74f   : > { %4285 = vmatmul.mubr.msk.f32.gmra.mxu0 %vm366_vm0, %v1640_v62 }
 0x750   : > { %1889 = vmatprep.mubr.f32.mxu0 %v7148_v8  ;;  %v1672_v28 = vpop.trf.xlu0 }
 0x752   : > { %v1641_v17 = vpop.trf.xlu1 }
 0x753   : > { %4286 = vmatmul.mubr.msk.f32.gmra.mxu0 %vm366_vm0, %v1641_v17 }
 0x754   : > { %1895 = vmatprep.mubr.f32.mxu0 %v7148_v8  ;;  %v1673_v1 = vpop.trf.xlu0 }
 0x756   : > { %v1642_v29 = vpop.trf.xlu1 }
 0x757   : > { %4287 = vmatmul.mubr.msk.f32.gmra.mxu0 %vm366_vm0, %v1642_v29 }
 0x758   : > { %1901 = vmatprep.mubr.f32.mxu0 %v7148_v8  ;;  %v1674_v40 = vpop.trf.xlu0 }
 0x75a   : > { %v1643_v32 = vpop.trf.xlu1 }
 0x75b   : > { %4288 = vmatmul.mubr.msk.f32.gmra.mxu0 %vm366_vm0, %v1643_v32 }
 0x75c   : > { %1907 = vmatprep.mubr.f32.mxu0 %v7148_v8  ;;  %v1675_v37 = vpop.trf.xlu0 }
 0x75e   : > { %v1644_v33 = vpop.trf.xlu1 }
 0x75f   : > { %4289 = vmatmul.mubr.msk.f32.gmra.mxu0 %vm366_vm0, %v1644_v33 }
 0x760   : > { %1913 = vmatprep.mubr.f32.mxu0 %v7148_v8  ;;  %v1676_v46 = vpop.trf.xlu0 }
 0x762   : > { %v1645_v43 = vpop.trf.xlu1 }
 0x763   : > { %4290 = vmatmul.mubr.msk.f32.gmra.mxu0 %vm366_vm0, %v1645_v43 }
 0x764   : > { %1919 = vmatprep.mubr.f32.mxu0 %v7148_v8  ;;  %v1677_v10 = vpop.trf.xlu0 }
 0x766   : > { %v1646_v55 = vpop.trf.xlu1 }
 0x767   : > { %4291 = vmatmul.mubr.msk.f32.gmra.mxu0 %vm366_vm0, %v1646_v55 }
 0x768   : > { %1925 = vmatprep.mubr.f32.mxu0 %v7148_v8  ;;  %v1678_v56 = vpop.trf.xlu0 }
 0x76a   : > { %v1647_v19 = vpop.trf.xlu1 }
 0x76b   : > { %4292 = vmatmul.mubr.msk.f32.gmra.mxu0 %vm366_vm0, %v1647_v19 }
 0x76c   : > { %1931 = vmatprep.mubr.f32.mxu0 %v7148_v8  ;;  %v1679_v41 = vpop.trf.xlu0 }
 0x76e   : > { %v1648_v13 = vpop.trf.xlu1 }
 0x76f   : > { %4293 = vmatmul.mubr.msk.f32.gmra.mxu0 %vm366_vm0, %v1648_v13 }
 0x770   : > { %1937 = vmatprep.mubr.f32.mxu0 %v7148_v8  ;;  %v1680_v34 = vpop.trf.xlu0 }
 0x773   : > { %4294 = vmatmul.mubr.msk.f32.gmra.mxu0 %vm366_vm0, %v1665_v45 }
 0x774   : > { %1943 = vmatprep.mubr.f32.mxu0 %v7148_v8 }
 0x777   : > { %4295 = vmatmul.mubr.msk.f32.gmra.mxu0 %vm366_vm0, %v1666_v5 }
 0x778   : > { %1949 = vmatprep.mubr.f32.mxu0 %v7148_v8 }
 0x77b   : > { %4296 = vmatmul.mubr.msk.f32.gmra.mxu0 %vm366_vm0, %v1667_v53 }
 0x77c   : > { %1955 = vmatprep.mubr.f32.mxu0 %v7148_v8 }
 0x77f   : > { %4297 = vmatmul.mubr.msk.f32.gmra.mxu0 %vm366_vm0, %v1668_v38 }
 0x780   : > { %1961 = vmatprep.mubr.f32.mxu0 %v7148_v8 }
 0x783   : > { %4298 = vmatmul.mubr.msk.f32.gmra.mxu0 %vm366_vm0, %v1669_v15 }
 0x784   : > { %1967 = vmatprep.mubr.f32.mxu0 %v7148_v8 }
 0x787   : > { %4299 = vmatmul.mubr.msk.f32.gmra.mxu0 %vm366_vm0, %v1670_v26 }
 0x788   : > { %1973 = vmatprep.mubr.f32.mxu0 %v7148_v8 }
 0x78b   : > { %4300 = vmatmul.mubr.msk.f32.gmra.mxu0 %vm366_vm0, %v1671_v58 }
 0x78c   : > { %1979 = vmatprep.mubr.f32.mxu0 %v7148_v8 }
 0x78f   : > { %4301 = vmatmul.mubr.msk.f32.gmra.mxu0 %vm366_vm0, %v1672_v28 }
 0x790   : > { %1985 = vmatprep.mubr.f32.mxu0 %v7148_v8 }
 0x793   : > { %4302 = vmatmul.mubr.msk.f32.gmra.mxu0 %vm366_vm0, %v1673_v1 }
 0x794   : > { %1991 = vmatprep.mubr.f32.mxu0 %v7148_v8 }
 0x797   : > { %4303 = vmatmul.mubr.msk.f32.gmra.mxu0 %vm366_vm0, %v1674_v40 }
 0x798   : > { %1997 = vmatprep.mubr.f32.mxu0 %v7148_v8 }
 0x79b   : > { %4304 = vmatmul.mubr.msk.f32.gmra.mxu0 %vm366_vm0, %v1675_v37 }
 0x79c   : > { %2003 = vmatprep.mubr.f32.mxu0 %v7148_v8 }
 0x79f   : > { %4305 = vmatmul.mubr.msk.f32.gmra.mxu0 %vm366_vm0, %v1676_v46 }
 0x7a0   : > { %2009 = vmatprep.mubr.f32.mxu0 %v7148_v8 }
 0x7a3   : > { %4306 = vmatmul.mubr.msk.f32.gmra.mxu0 %vm366_vm0, %v1677_v10 }
 0x7a4   : > { %2015 = vmatprep.mubr.f32.mxu0 %v7148_v8 }
 0x7a7   : > { %4307 = vmatmul.mubr.msk.f32.gmra.mxu0 %vm366_vm0, %v1678_v56 }
 0x7a8   : > { %2021 = vmatprep.mubr.f32.mxu0 %v7148_v8 }
 0x7ab   : > { %4308 = vmatmul.mubr.msk.f32.gmra.mxu0 %vm366_vm0, %v1679_v41 }
 0x7ac   : > { %2027 = vmatprep.mubr.f32.mxu0 %v7148_v8 }
 0x7af   : > { %4309 = vmatmul.mubr.msk.f32.gmra.mxu0 %vm366_vm0, %v1680_v34 }
 0x7b0   : > { %2578 = vmatprep.mubr.f32.mxu0 %v1612_v27 }
 0x7f3   : > { %v5694_v35 = vpop.f32.mrf.mxu0 }
 0x7f4   : > { %7152 = vst [vmem:[#allocation8_spill] sm:$0xff] %v5694_v35 }
 0x7f5   : > { %v5696_v48 = vpop.f32.mrf.mxu0 }
 0x7f6   : > { %7153 = vst [vmem:[#allocation3_spill] sm:$0xff] %v5696_v48  ;;  %v2034_v19 = vmax.f32 %v5694_v35, %v5696_v48 }
 0x7f7   : > { %v5698_v7 = vpop.f32.mrf.mxu0 }
 0x7f8   : > { %7154 = vst [vmem:[#allocation4_spill] sm:$0xff] %v5698_v7 }
 0x7f9   : > { %v5700_v14 = vpop.f32.mrf.mxu0 }
 0x7fa   : > { %7155 = vst [vmem:[#allocation20_spill] sm:$0xff] %v5700_v14 }
 0x7fb   : > { %v5702_v16 = vpop.f32.mrf.mxu0 }
 0x7fd   : > { %v5704_v39 = vpop.f32.mrf.mxu0 }
 0x7fe   : > { %7156 = vst [vmem:[#allocation15_spill] sm:$0xff] %v5704_v39  ;;  %v2040_v53 = vmax.f32 %v5702_v16, %v5704_v39 }
 0x7ff   : > { %v5706_v2 = vpop.f32.mrf.mxu0 }
 0x801   : > { %v5708_v36 = vpop.f32.mrf.mxu0 }
 0x803   : > { %v5710_v57 = vpop.f32.mrf.mxu0 }
 0x805   : > { %v5712_v6 = vpop.f32.mrf.mxu0 }
 0x806   : > { %v2046_v29 = vmax.f32 %v5710_v57, %v5712_v6 }
 0x807   : > { %v5714_v49 = vpop.f32.mrf.mxu0 }
 0x809   : > { %v5716_v61 = vpop.f32.mrf.mxu0 }
 0x80b   : > { %v5718_v42 = vpop.f32.mrf.mxu0 }
 0x80d   : > { %v5720_v63 = vpop.f32.mrf.mxu0 }
 0x80e   : > { %v2052_v22 = vmax.f32 %v5718_v42, %v5720_v63 }
 0x80f   : > { %v5722_v24 = vpop.f32.mrf.mxu0 }
 0x811   : > { %v5724_v25 = vpop.f32.mrf.mxu0 }
 0x812   : > { %v2055_v34 = vmax.f32 %v5722_v24, %v5724_v25 }
 0x813   : > { %v5726_v18 = vpop.f32.mrf.mxu0 }
 0x815   : > { %v5728_v23 = vpop.f32.mrf.mxu0 }
 0x816   : > { %v2058_v10 = vmax.f32 %v5726_v18, %v5728_v23 }
 0x817   : > { %v5730_v3 = vpop.f32.mrf.mxu0 }
 0x819   : > { %v5732_v11 = vpop.f32.mrf.mxu0 }
 0x81a   : > { %v2061_v40 = vmax.f32 %v5730_v3, %v5732_v11 }
 0x81b   : > { %v5734_v60 = vpop.f32.mrf.mxu0 }
 0x81d   : > { %v5736_v9 = vpop.f32.mrf.mxu0 }
 0x81e   : > { %v2064_v58 = vmax.f32 %v5734_v60, %v5736_v9 }
 0x81f   : > { %v5738_v52 = vpop.f32.mrf.mxu0 }
 0x821   : > { %v5740_v50 = vpop.f32.mrf.mxu0 }
 0x822   : > { %v2067_v15 = vmax.f32 %v5738_v52, %v5740_v50 }
 0x823   : > { %v5742_v30 = vpop.f32.mrf.mxu0 }
 0x825   : > { %v5744_v44 = vpop.f32.mrf.mxu0 }
 0x826   : > { %v2070_v43 = vmax.f32 %v5742_v30, %v5744_v44 }
 0x827   : > { %v5746_v31 = vpop.f32.mrf.mxu0 }
 0x829   : > { %v5748_v21 = vpop.f32.mrf.mxu0 }
 0x82a   : > { %v2073_v5 = vmax.f32 %v5746_v31, %v5748_v21 }
 0x82b   : > { %v5750_v51 = vpop.f32.mrf.mxu0 }
 0x82d   : > { %v5752_v0 = vpop.f32.mrf.mxu0 }
 0x82e   : > { %v2076_v54 = vmax.f32 %v5750_v51, %v5752_v0 }
 0x82f   : > { %v5756_v12 = vpop.f32.mrf.mxu0 }
 0x830   : > { %2077 = vmax.xlane.f32.xlu0 %v2076_v54 }
 0x831   : > { %v5758_v47 = vpop.f32.mrf.mxu0 }
 0x832   : > { %v2079_v62 = vmax.f32 %v5756_v12, %v5758_v47 }
 0x833   : > { %v5764_v17 = vpop.f32.mrf.mxu0 }
 0x834   : > { %2053 = vmax.xlane.f32.xlu0 %v2052_v22  ;;  %2080 = vmax.xlane.f32.xlu1 %v2079_v62  ;;  %v2049_v22 = vmax.f32 %v5714_v49, %v5716_v61 }
 0x835   : > { %v5766_v45 = vpop.f32.mrf.mxu0 }
 0x836   : > { %7157 = vst [vmem:[#allocation21_spill] sm:$0xff] %v5766_v45 }
 0x837   : > { %v5772_v32 = vpop.f32.mrf.mxu0 }
 0x838   : > { %2047 = vmax.xlane.f32.xlu0 %v2046_v29  ;;  %2074 = vmax.xlane.f32.xlu1 %v2073_v5  ;;  %v2043_v5 = vmax.f32 %v5706_v2, %v5708_v36 }
 0x839   : > { %v5774_v33 = vpop.f32.mrf.mxu0 }
 0x83a   : > { %7158 = vst [vmem:[#allocation17_spill] sm:$0xff] %v5774_v33 }
 0x83b   : > { %v5780_v38 = vpop.f32.mrf.mxu0 }
 0x83c   : > { %7159 = vst [vmem:[#allocation16_spill] sm:$0xff] %v5780_v38  ;;  %2041 = vmax.xlane.f32.xlu0 %v2040_v53  ;;  %2071 = vmax.xlane.f32.xlu1 %v2070_v43 }
 0x83d   : > { %v5782_v55 = vpop.f32.mrf.mxu0 }
 0x83e   : > { %7160 = vst [vmem:[#allocation12_spill] sm:$0xff] %v5782_v55 }
 0x83f   : > { %v5788_v13 = vpop.f32.mrf.mxu0 }
 0x840   : > { %7161 = vst [vmem:[#allocation11_spill] sm:$0xff] %v5788_v13  ;;  %2035 = vmax.xlane.f32.xlu0 %v2034_v19  ;;  %2068 = vmax.xlane.f32.xlu1 %v2067_v15  ;;  %v2037_v19 = vmax.f32 %v5698_v7, %v5700_v14 }
 0x841   : > { %v5790_v26 = vpop.f32.mrf.mxu0 }
 0x842   : > { %7162 = vst [vmem:[#allocation19_spill] sm:$0xff] %v5790_v26 }
 0x843   : > { %v5794_v28 = vpop.f32.mrf.mxu0 }
 0x844   : > { %2065 = vmax.xlane.f32.xlu1 %v2064_v58 }
 0x845   : > { %v5796_v1 = vpop.f32.mrf.mxu0 }
 0x846   : > { %7163 = vst [vmem:[#allocation18_spill] sm:$0xff] %v5796_v1 }
 0x847   : > { %v5800_v37 = vpop.f32.mrf.mxu0 }
 0x848   : > { %2062 = vmax.xlane.f32.xlu1 %v2061_v40 }
 0x849   : > { %v5802_v46 = vpop.f32.mrf.mxu0 }
 0x84a   : > { %7164 = vst [vmem:[#allocation6_spill] sm:$0xff] %v5802_v46 }
 0x84b   : > { %v5806_v56 = vpop.f32.mrf.mxu0 }
 0x84c   : > { %2059 = vmax.xlane.f32.xlu1 %v2058_v10 }
 0x84d   : > { %v5808_v41 = vpop.f32.mrf.mxu0 }
 0x84f   : > { %v5812_v27 = vpop.f32.mrf.mxu0 }
 0x850   : > { %2056 = vmax.xlane.f32.xlu1 %v2055_v34 }
 0x851   : > { %v5814_v54 = vpop.f32.mrf.mxu0 }
 0x853   : > { %v5818_v62 = vpop.f32.mrf.mxu0 }
 0x854   : > { %2050 = vmax.xlane.f32.xlu1 %v2049_v22 }
 0x855   : > { %v5820_v29 = vpop.f32.mrf.mxu0 }
 0x857   : > { %v5824_v53 = vpop.f32.mrf.mxu0 }
 0x858   : > { %2044 = vmax.xlane.f32.xlu1 %v2043_v5 }
 0x859   : > { %v5826_v43 = vpop.f32.mrf.mxu0 }
 0x85b   : > { %v5830_v15 = vpop.f32.mrf.mxu0 }
 0x85c   : > { %2038 = vmax.xlane.f32.xlu1 %v2037_v19 }
 0x85d   : > { %v5832_v58 = vpop.f32.mrf.mxu0 }
 0x85e   : > { %v2112_v14 = vmax.f32 %v5830_v15, %v5832_v58 }
 0x85f   : > { %v5834_v40 = vpop.f32.mrf.mxu0 }
 0x861   : > { %v5836_v10 = vpop.f32.mrf.mxu0 }
 0x863   : > { %v5838_v34 = vpop.f32.mrf.mxu0 }
 0x865   : > { %v5840_v22 = vpop.f32.mrf.mxu0 }
 0x866   : > { %7165 = vst [vmem:[#allocation5_spill] sm:$0xff] %v5840_v22  ;;  %v2118_v35 = vmax.f32 %v5838_v34, %v5840_v22  ;;  %v2109_v22 = vmax.f32 %v5824_v53, %v5826_v43 }
 0x867   : > { %v5842_v59 = vpop.f32.mrf.mxu0 }
 0x869   : > { %v5844_v5 = vpop.f32.mrf.mxu0 }
 0x86a   : > { %v2121_v7 = vmax.f32 %v5842_v59, %v5844_v5 }
 0x86b   : > { %v5846_v20 = vpop.f32.mrf.mxu0 }
 0x86d   : > { %v5848_v8 = vpop.f32.mrf.mxu0 }
 0x86e   : > { %v2124_v19 = vmax.f32 %v5846_v20, %v5848_v8 }
 0x86f   : > { %v5852_v4 = vpop.f32.mrf.mxu0 }
 0x870   : > { %2125 = vmax.xlane.f32.xlu0 %v2124_v19  ;;  %v2115_v19 = vmax.f32 %v5834_v40, %v5836_v10 }
 0x871   : > { %v5854_v48 = vpop.f32.mrf.mxu0 }
 0x872   : > { %v2127_v39 = vmax.f32 %v5852_v4, %v5854_v48 }
 0x874   : > { %2119 = vmax.xlane.f32.xlu0 %v2118_v35  ;;  %2128 = vmax.xlane.f32.xlu1 %v2127_v39  ;;  %v2106_v35 = vmax.f32 %v5818_v62, %v5820_v29  ;;  %v2103_v39 = vmax.f32 %v5812_v27, %v5814_v54 }
 0x878   : > { %2113 = vmax.xlane.f32.xlu0 %v2112_v14  ;;  %2122 = vmax.xlane.f32.xlu1 %v2121_v7  ;;  %v2100_v14 = vmax.f32 %v5806_v56, %v5808_v41  ;;  %v2097_v7 = vmax.f32 %v5800_v37, %v5802_v46 }
 0x87c   : > { %2116 = vmax.xlane.f32.xlu1 %v2115_v19  ;;  %v2094_v19 = vmax.f32 %v5794_v28, %v5796_v1 }
 0x880   : > { %2110 = vmax.xlane.f32.xlu1 %v2109_v22  ;;  %v2091_v22 = vmax.f32 %v5788_v13, %v5790_v26 }
 0x884   : > { %2107 = vmax.xlane.f32.xlu1 %v2106_v35  ;;  %v2088_v35 = vmax.f32 %v5780_v38, %v5782_v55 }
 0x888   : > { %2104 = vmax.xlane.f32.xlu1 %v2103_v39  ;;  %v2085_v39 = vmax.f32 %v5772_v32, %v5774_v33 }
 0x88c   : > { %2101 = vmax.xlane.f32.xlu1 %v2100_v14  ;;  %v2082_v14 = vmax.f32 %v5764_v17, %v5766_v45 }
 0x890   : > { %2098 = vmax.xlane.f32.xlu1 %v2097_v7 }
 0x894   : > { %2095 = vmax.xlane.f32.xlu1 %v2094_v19 }
 0x898   : > { %2092 = vmax.xlane.f32.xlu1 %v2091_v22 }
 0x89c   : > { %2089 = vmax.xlane.f32.xlu1 %v2088_v35 }
 0x8a0   : > { %2086 = vmax.xlane.f32.xlu1 %v2085_v39 }
 0x8a4   : > { %2083 = vmax.xlane.f32.xlu1 %v2082_v14 }
 0x8b9   : > { %v2078_v7 = vpop.xlane.xlu0 %2077 }
 0x8ba   : > { %v2158_v19 = vsub.f32 %v5750_v51, %v2078_v7  ;;  %v2159_v22 = vsub.f32 %v5752_v0, %v2078_v7 }
 0x8bc   : > { %v2250_v13 = vmul.f32 1.442695, %v2158_v19  ;;  %v2252_v33 = vmul.f32 1.442695, %v2159_v22 }
 0x8bd   : > { %v2081_v46 = vpop.xlane.xlu1 %2080 }
 0x8be   : > { %v2160_v1 = vsub.f32 %v5756_v12, %v2081_v46  ;;  %v2161_v26 = vsub.f32 %v5758_v47, %v2081_v46 }
 0x8c0   : > { %v2254_v55 = vmul.f32 1.442695, %v2160_v1  ;;  %v2256_v35 = vmul.f32 1.442695, %v2161_v26 }
 0x8c1   : > { %v2075_v38 = vpop.xlane.xlu1 %2074 }
 0x8c2   : > { %v2156_v39 = vsub.f32 %v5746_v31, %v2075_v38  ;;  %v2157_v45 = vsub.f32 %v5748_v21, %v2075_v38  ;;  %4628 = vpow2.f32 %v2254_v55 }
 0x8c3   : > { %4630 = vpow2.f32 %v2256_v35 }
 0x8c4   : > { %4632 = vpow2.f32 %v2250_v13  ;;  %v2246_v51 = vmul.f32 1.442695, %v2156_v39  ;;  %v2248_v0 = vmul.f32 1.442695, %v2157_v45 }
 0x8c5   : > { %v2072_v14 = vpop.xlane.xlu1 %2071  ;;  %4634 = vpow2.f32 %v2252_v33 }
 0x8c6   : > { %v2154_v12 = vsub.f32 %v5742_v30, %v2072_v14  ;;  %v2155_v47 = vsub.f32 %v5744_v44, %v2072_v14  ;;  %4636 = vpow2.f32 %v2246_v51 }
 0x8c7   : > { %4638 = vpow2.f32 %v2248_v0 }
 0x8c8   : > { %v2242_v26 = vmul.f32 1.442695, %v2154_v12  ;;  %v2244_v31 = vmul.f32 1.442695, %v2155_v47 }
 0x8c9   : > { %v2069_v1 = vpop.xlane.xlu1 %2068 }
 0x8ca   : > { %v2152_v46 = vsub.f32 %v5738_v52, %v2069_v1  ;;  %v2153_v21 = vsub.f32 %v5740_v50, %v2069_v1  ;;  %4640 = vpow2.f32 %v2242_v26 }
 0x8cb   : > { %4642 = vpow2.f32 %v2244_v31 }
 0x8cc   : > { %v2238_v55 = vmul.f32 1.442695, %v2152_v46  ;;  %v2240_v30 = vmul.f32 1.442695, %v2153_v21 }
 0x8cd   : > { %v2066_v38 = vpop.xlane.xlu1 %2065 }
 0x8ce   : > { %v2150_v13 = vsub.f32 %v5734_v60, %v2066_v38  ;;  %v2151_v45 = vsub.f32 %v5736_v9, %v2066_v38  ;;  %4644 = vpow2.f32 %v2238_v55  ;;  %v2054_v9 = vpop.xlane.xlu0 %2053 }
 0x8cf   : > { %v5898_v33 = vpop.eup %4628  ;;  %4646 = vpow2.f32 %v2240_v30  ;;  %v2142_v38 = vsub.f32 %v5718_v42, %v2054_v9 }
 0x8d0   : > { %v5900_v7 = vpop.eup %4630  ;;  %v2234_v52 = vmul.f32 1.442695, %v2150_v13  ;;  %v2236_v50 = vmul.f32 1.442695, %v2151_v45 }
 0x8d1   : > { %v2063_v44 = vpop.xlane.xlu1 %2062  ;;  %v5903_v22 = vpop.eup %4632  ;;  %v2367_v60 = vadd.f32 %v5900_v7, %v5898_v33 }
 0x8d2   : > { %v2148_v19 = vsub.f32 %v5730_v3, %v2063_v44  ;;  %v2149_v35 = vsub.f32 %v5732_v11, %v2063_v44  ;;  %v5908_v39 = vpop.eup %4634  ;;  %4648 = vpow2.f32 %v2234_v52  ;;  %v2048_v55 = vpop.xlane.xlu0 %2047  ;;  %v2143_v44 = vsub.f32 %v5720_v63, %v2054_v9 }
 0x8d3   : > { %2368 = vadd.xlane.f32.xlu0 %v2367_v60  ;;  %v5911_v0 = vpop.eup %4636  ;;  %4650 = vpow2.f32 %v2236_v50  ;;  %v2364_v11 = vadd.f32 %v5908_v39, %v5903_v22  ;;  %v2218_v50 = vmul.f32 1.442695, %v2142_v38 }
 0x8d4   : > { %v2230_v51 = vmul.f32 1.442695, %v2148_v19  ;;  %v2232_v3 = vmul.f32 1.442695, %v2149_v35  ;;  %v5916_v1 = vpop.eup %4638 }
 0x8d5   : > { %v2060_v14 = vpop.xlane.xlu1 %2059  ;;  %v2361_v13 = vadd.f32 %v5916_v1, %v5911_v0 }
 0x8d6   : > { %v2146_v12 = vsub.f32 %v5726_v18, %v2060_v14  ;;  %v2147_v47 = vsub.f32 %v5728_v23, %v2060_v14  ;;  %4652 = vpow2.f32 %v2230_v51  ;;  %v2138_v14 = vsub.f32 %v5710_v57, %v2048_v55 }
 0x8d7   : > { %2365 = vadd.xlane.f32.xlu0 %v2364_v11  ;;  %v5920_v18 = vpop.eup %4640  ;;  %4654 = vpow2.f32 %v2232_v3  ;;  %v2220_v51 = vmul.f32 1.442695, %v2143_v44  ;;  %v7168_v44 = vld [vmem:[#allocation15_spill] sm:$0xff] }
 0x8d8   : > { %v2226_v46 = vmul.f32 1.442695, %v2146_v12  ;;  %v2228_v23 = vmul.f32 1.442695, %v2147_v47  ;;  %v5925_v30 = vpop.eup %4642  ;;  %v2139_v12 = vsub.f32 %v5712_v6, %v2048_v55 }
 0x8d9   : > { %v2057_v26 = vpop.xlane.xlu1 %2056  ;;  %v2358_v35 = vadd.f32 %v5925_v30, %v5920_v18 }
 0x8da   : > { %v2144_v31 = vsub.f32 %v5722_v24, %v2057_v26  ;;  %v2145_v21 = vsub.f32 %v5724_v25, %v2057_v26  ;;  %4656 = vpow2.f32 %v2226_v46  ;;  %v2210_v46 = vmul.f32 1.442695, %v2138_v14  ;;  %v7169_v14 = vld [vmem:[#allocation8_spill] sm:$0xff] }
 0x8db   : > { %2362 = vadd.xlane.f32.xlu0 %v2361_v13  ;;  %v5930_v42 = vpop.eup %4644  ;;  %4658 = vpow2.f32 %v2228_v23  ;;  %v7167_v23 = vld [vmem:[#allocation20_spill] sm:$0xff] }
 0x8dc   : > { %v2222_v45 = vmul.f32 1.442695, %v2144_v31  ;;  %v2224_v52 = vmul.f32 1.442695, %v2145_v21  ;;  %v5934_v60 = vpop.eup %4646  ;;  %v2212_v21 = vmul.f32 1.442695, %v2139_v12 }
 0x8dd   : > { %v2051_v24 = vpop.xlane.xlu1 %2050  ;;  %v2355_v57 = vadd.f32 %v5934_v60, %v5930_v42  ;;  %v7170_v12 = vld [vmem:[#allocation3_spill] sm:$0xff] }
 0x8de   : > { %v2140_v25 = vsub.f32 %v5714_v49, %v2051_v24  ;;  %v2141_v19 = vsub.f32 %v5716_v61, %v2051_v24  ;;  %4660 = vpow2.f32 %v2222_v45  ;;  %v2042_v49 = vpop.xlane.xlu0 %2041 }
 0x8df   : > { %4662 = vpow2.f32 %v2224_v52  ;;  %2359 = vadd.xlane.f32.xlu0 %v2358_v35  ;;  %v5940_v11 = vpop.eup %4648  ;;  %v2135_v52 = vsub.f32 %v7168_v44, %v2042_v49 }
 0x8e0   : > { %v2214_v63 = vmul.f32 1.442695, %v2140_v25  ;;  %v2216_v9 = vmul.f32 1.442695, %v2141_v19  ;;  %v5944_v26 = vpop.eup %4650 }
 0x8e1   : > { %v2045_v61 = vpop.xlane.xlu1 %2044  ;;  %v2352_v25 = vadd.f32 %v5944_v26, %v5940_v11 }
 0x8e2   : > { %4664 = vpow2.f32 %v2214_v63  ;;  %v2136_v3 = vsub.f32 %v5706_v2, %v2045_v61  ;;  %v2137_v47 = vsub.f32 %v5708_v36, %v2045_v61  ;;  %v2134_v2 = vsub.f32 %v5702_v16, %v2042_v49  ;;  %v7166_v36 = vld [vmem:[#allocation4_spill] sm:$0xff]  ;;  %v2036_v24 = vpop.xlane.xlu0 %2035 }
 0x8e3   : > { %4666 = vpow2.f32 %v2216_v9  ;;  %2356 = vadd.xlane.f32.xlu0 %v2355_v57  ;;  %v5949_v45 = vpop.eup %4652  ;;  %v2130_v63 = vsub.f32 %v7169_v14, %v2036_v24  ;;  %v2131_v49 = vsub.f32 %v7170_v12, %v2036_v24 }
 0x8e4   : > { %4668 = vpow2.f32 %v2218_v50  ;;  %v2206_v6 = vmul.f32 1.442695, %v2136_v3  ;;  %v2208_v31 = vmul.f32 1.442695, %v2137_v47  ;;  %v5954_v19 = vpop.eup %4654  ;;  %v2202_v16 = vmul.f32 1.442695, %v2134_v2 }
 0x8e5   : > { %4670 = vpow2.f32 %v2220_v51  ;;  %v2039_v38 = vpop.xlane.xlu1 %2038  ;;  %v2204_v51 = vmul.f32 1.442695, %v2135_v52  ;;  %v2349_v61 = vadd.f32 %v5954_v19, %v5949_v45 }
 0x8e6   : > { %4672 = vpow2.f32 %v2206_v6  ;;  %v2132_v55 = vsub.f32 %v7166_v36, %v2039_v38  ;;  %v2133_v13 = vsub.f32 %v7167_v23, %v2039_v38 }
 0x8e7   : > { %4674 = vpow2.f32 %v2208_v31  ;;  %2353 = vadd.xlane.f32.xlu0 %v2352_v25  ;;  %v5957_v9 = vpop.eup %4656  ;;  %v2196_v31 = vmul.f32 1.442695, %v2131_v49 }
 0x8e8   : > { %4676 = vpow2.f32 %v2210_v46  ;;  %v2198_v50 = vmul.f32 1.442695, %v2132_v55  ;;  %v2200_v35 = vmul.f32 1.442695, %v2133_v13  ;;  %v5962_v3 = vpop.eup %4658  ;;  %v2194_v46 = vmul.f32 1.442695, %v2130_v63 }
 0x8e9   : > { %4678 = vpow2.f32 %v2212_v21  ;;  %v2346_v21 = vadd.f32 %v5962_v3, %v5957_v9 }
 0x8ea   : > { %4680 = vpow2.f32 %v2198_v50 }
 0x8eb   : > { %4682 = vpow2.f32 %v2200_v35  ;;  %v5964_v47 = vpop.eup %4660  ;;  %2350 = vadd.xlane.f32.xlu0 %v2349_v61 }
 0x8ec   : > { %v5966_v57 = vpop.eup %4662  ;;  %4684 = vpow2.f32 %v2202_v16 }
 0x8ed   : > { %4686 = vpow2.f32 %v2204_v51  ;;  %v2343_v13 = vadd.f32 %v5966_v57, %v5964_v47 }
 0x8ee   : > { %4688 = vpow2.f32 %v2194_v46 }
 0x8ef   : > { %v5968_v6 = vpop.eup %4664  ;;  %2347 = vadd.xlane.f32.xlu0 %v2346_v21  ;;  %4690 = vpow2.f32 %v2196_v31 }
 0x8f0   : > { %v5972_v38 = vpop.eup %4666 }
 0x8f1   : > { %v5974_v2 = vpop.eup %4668  ;;  %v2337_v36 = vadd.f32 %v5972_v38, %v5968_v6 }
 0x8f2   : > { %v5978_v55 = vpop.eup %4670 }
 0x8f3   : > { %v5980_v23 = vpop.eup %4672  ;;  %2338 = vadd.xlane.f32.xlu1 %v2337_v36  ;;  %2344 = vadd.xlane.f32.xlu0 %v2343_v13  ;;  %v2340_v35 = vadd.f32 %v5978_v55, %v5974_v2 }
 0x8f4   : > { %7171 = vst [vmem:[#allocation14_spill] sm:$0xff] %v5980_v23  ;;  %v5984_v44 = vpop.eup %4674 }
 0x8f5   : > { %v5986_v52 = vpop.eup %4676  ;;  %v2331_v24 = vadd.f32 %v5984_v44, %v5980_v23 }
 0x8f6   : > { %v5990_v25 = vpop.eup %4678 }
 0x8f7   : > { %v5992_v50 = vpop.eup %4680  ;;  %2332 = vadd.xlane.f32.xlu1 %v2331_v24  ;;  %2341 = vadd.xlane.f32.xlu0 %v2340_v35  ;;  %v2334_v61 = vadd.f32 %v5990_v25, %v5986_v52  ;;  %v7174_v35 = vld [vmem:[#allocation5_spill] sm:$0xff] }
 0x8f8   : > { %7172 = vst [vmem:[#allocation13_spill] sm:$0xff] %v5992_v50  ;;  %v5996_v16 = vpop.eup %4682 }
 0x8f9   : > { %7173 = vst [vmem:[#allocation4_spill] sm:$0xff] %v5996_v16  ;;  %v2126_v14 = vpop.xlane.xlu0 %2125  ;;  %v2325_v63 = vadd.f32 %v5996_v16, %v5992_v50  ;;  %v6002_v49 = vpop.eup %4684 }
 0x8fa   : > { %v2190_v51 = vsub.f32 %v5846_v20, %v2126_v14  ;;  %v2191_v12 = vsub.f32 %v5848_v8, %v2126_v14  ;;  %v6006_v46 = vpop.eup %4686 }
 0x8fb   : > { %2326 = vadd.xlane.f32.xlu1 %v2325_v63  ;;  %2335 = vadd.xlane.f32.xlu0 %v2334_v61  ;;  %v6011_v14 = vpop.eup %4688  ;;  %v2328_v63 = vadd.f32 %v6006_v46, %v6002_v49 }
 0x8fc   : > { %v2314_v31 = vmul.f32 1.442695, %v2190_v51  ;;  %v2316_v21 = vmul.f32 1.442695, %v2191_v12  ;;  %v6016_v51 = vpop.eup %4690 }
 0x8fd   : > { %v2120_v36 = vpop.xlane.xlu0 %2119  ;;  %v2129_v13 = vpop.xlane.xlu1 %2128 }
 0x8fe   : > { %4692 = vpow2.f32 %v2314_v31  ;;  %v2186_v24 = vsub.f32 %v5838_v34, %v2120_v36  ;;  %v2187_v20 = vsub.f32 %v7174_v35, %v2120_v36  ;;  %v2192_v8 = vsub.f32 %v5852_v4, %v2129_v13 }
 0x8ff   : > { %4694 = vpow2.f32 %v2316_v21  ;;  %v2193_v50 = vsub.f32 %v5854_v48, %v2129_v13  ;;  %2329 = vadd.xlane.f32.xlu0 %v2328_v63  ;;  %v2322_v13 = vadd.f32 %v6016_v51, %v6011_v14 }
 0x900   : > { %v2306_v12 = vmul.f32 1.442695, %v2186_v24  ;;  %v2308_v61 = vmul.f32 1.442695, %v2187_v20  ;;  %v2318_v16 = vmul.f32 1.442695, %v2192_v8 }
 0x901   : > { %v2320_v31 = vmul.f32 1.442695, %v2193_v50  ;;  %v2114_v34 = vpop.xlane.xlu0 %2113  ;;  %v2123_v23 = vpop.xlane.xlu1 %2122 }
 0x902   : > { %4696 = vpow2.f32 %v2306_v12  ;;  %v2182_v4 = vsub.f32 %v5830_v15, %v2114_v34  ;;  %v2183_v36 = vsub.f32 %v5832_v58, %v2114_v34  ;;  %v2188_v21 = vsub.f32 %v5842_v59, %v2123_v23 }
 0x903   : > { %4698 = vpow2.f32 %v2308_v61  ;;  %v2189_v48 = vsub.f32 %v5844_v5, %v2123_v23  ;;  %2323 = vadd.xlane.f32.xlu0 %v2322_v13 }
 0x904   : > { %4700 = vpow2.f32 %v2318_v16  ;;  %v2298_v24 = vmul.f32 1.442695, %v2182_v4  ;;  %v2300_v35 = vmul.f32 1.442695, %v2183_v36  ;;  %v2310_v50 = vmul.f32 1.442695, %v2188_v21 }
 0x905   : > { %4702 = vpow2.f32 %v2320_v31  ;;  %v2312_v20 = vmul.f32 1.442695, %v2189_v48  ;;  %v2117_v8 = vpop.xlane.xlu1 %2116 }
 0x906   : > { %4704 = vpow2.f32 %v2298_v24  ;;  %v2184_v15 = vsub.f32 %v5834_v40, %v2117_v8  ;;  %v2185_v58 = vsub.f32 %v5836_v10, %v2117_v8 }
 0x907   : > { %4706 = vpow2.f32 %v2300_v35 }
 0x908   : > { %4708 = vpow2.f32 %v2310_v50  ;;  %v2302_v59 = vmul.f32 1.442695, %v2184_v15  ;;  %v2304_v5 = vmul.f32 1.442695, %v2185_v58 }
 0x909   : > { %4710 = vpow2.f32 %v2312_v20  ;;  %v2111_v23 = vpop.xlane.xlu1 %2110 }
 0x90a   : > { %4712 = vpow2.f32 %v2302_v59  ;;  %v2180_v16 = vsub.f32 %v5824_v53, %v2111_v23  ;;  %v2181_v63 = vsub.f32 %v5826_v43, %v2111_v23 }
 0x90b   : > { %v6028_v12 = vpop.eup %4692  ;;  %4714 = vpow2.f32 %v2304_v5 }
 0x90c   : > { %v6030_v61 = vpop.eup %4694  ;;  %v2294_v31 = vmul.f32 1.442695, %v2180_v16  ;;  %v2296_v40 = vmul.f32 1.442695, %v2181_v63 }
 0x90d   : > { %v2108_v34 = vpop.xlane.xlu1 %2107  ;;  %v2412_v10 = vadd.f32 %v6030_v61, %v6028_v12 }
 0x90e   : > { %4716 = vpow2.f32 %v2294_v31  ;;  %v2178_v4 = vsub.f32 %v5818_v62, %v2108_v34  ;;  %v2179_v36 = vsub.f32 %v5820_v29, %v2108_v34 }
 0x90f   : > { %v6036_v21 = vpop.eup %4696  ;;  %4718 = vpow2.f32 %v2296_v40  ;;  %2413 = vadd.xlane.f32.xlu0 %v2412_v10 }
 0x910   : > { %v6038_v53 = vpop.eup %4698  ;;  %v2290_v43 = vmul.f32 1.442695, %v2178_v4  ;;  %v2292_v48 = vmul.f32 1.442695, %v2179_v36 }
 0x911   : > { %v6040_v13 = vpop.eup %4700  ;;  %v2105_v24 = vpop.xlane.xlu1 %2104  ;;  %v2406_v35 = vadd.f32 %v6038_v53, %v6036_v21 }
 0x912   : > { %v6044_v50 = vpop.eup %4702  ;;  %4720 = vpow2.f32 %v2290_v43  ;;  %v2176_v62 = vsub.f32 %v5812_v27, %v2105_v24  ;;  %v2177_v29 = vsub.f32 %v5814_v54, %v2105_v24 }
 0x913   : > { %v6048_v20 = vpop.eup %4704  ;;  %4722 = vpow2.f32 %v2292_v48  ;;  %2407 = vadd.xlane.f32.xlu0 %v2406_v35  ;;  %v2415_v8 = vadd.f32 %v6044_v50, %v6040_v13 }
 0x914   : > { %v6052_v15 = vpop.eup %4706  ;;  %v2286_v58 = vmul.f32 1.442695, %v2176_v62  ;;  %v2288_v59 = vmul.f32 1.442695, %v2177_v29 }
 0x915   : > { %v6054_v5 = vpop.eup %4708  ;;  %2416 = vadd.xlane.f32.xlu1 %v2415_v8  ;;  %v2102_v23 = vpop.xlane.xlu1 %2101  ;;  %v2400_v27 = vadd.f32 %v6052_v15, %v6048_v20 }
 0x916   : > { %v6058_v16 = vpop.eup %4710  ;;  %4724 = vpow2.f32 %v2286_v58  ;;  %v2174_v54 = vsub.f32 %v5806_v56, %v2102_v23  ;;  %v2175_v63 = vsub.f32 %v5808_v41, %v2102_v23  ;;  %v7175_v41 = vld [vmem:[#allocation6_spill] sm:$0xff] }
 0x917   : > { %v6062_v31 = vpop.eup %4712  ;;  %4726 = vpow2.f32 %v2288_v59  ;;  %2401 = vadd.xlane.f32.xlu0 %v2400_v27  ;;  %v2409_v40 = vadd.f32 %v6058_v16, %v6054_v5  ;;  %v7176_v23 = vld [vmem:[#allocation18_spill] sm:$0xff] }
 0x918   : > { %v6066_v34 = vpop.eup %4714  ;;  %v2282_v10 = vmul.f32 1.442695, %v2174_v54  ;;  %v2284_v4 = vmul.f32 1.442695, %v2175_v63 }
 0x919   : > { %2410 = vadd.xlane.f32.xlu1 %v2409_v40  ;;  %v2099_v36 = vpop.xlane.xlu1 %2098  ;;  %v2403_v43 = vadd.f32 %v6066_v34, %v6062_v31 }
 0x91a   : > { %4728 = vpow2.f32 %v2282_v10  ;;  %v2172_v56 = vsub.f32 %v5800_v37, %v2099_v36  ;;  %v2173_v48 = vsub.f32 %v7175_v41, %v2099_v36  ;;  %v7177_v36 = vld [vmem:[#allocation11_spill] sm:$0xff] }
 0x91b   : > { %v6072_v24 = vpop.eup %4716  ;;  %4730 = vpow2.f32 %v2284_v4 }
 0x91c   : > { %v6074_v35 = vpop.eup %4718  ;;  %v2278_v62 = vmul.f32 1.442695, %v2172_v56  ;;  %v2280_v29 = vmul.f32 1.442695, %v2173_v48  ;;  %v7178_v56 = vld [vmem:[#allocation19_spill] sm:$0xff] }
 0x91d   : > { %2404 = vadd.xlane.f32.xlu1 %v2403_v43  ;;  %v2096_v8 = vpop.xlane.xlu1 %2095  ;;  %v2397_v58 = vadd.f32 %v6074_v35, %v6072_v24 }
 0x91e   : > { %4732 = vpow2.f32 %v2278_v62  ;;  %v2170_v59 = vsub.f32 %v5794_v28, %v2096_v8  ;;  %v2171_v27 = vsub.f32 %v7176_v23, %v2096_v8 }
 0x91f   : > { %v6080_v37 = vpop.eup %4720  ;;  %4734 = vpow2.f32 %v2280_v29 }
 0x920   : > { %v6082_v54 = vpop.eup %4722  ;;  %v2274_v63 = vmul.f32 1.442695, %v2170_v59  ;;  %v2276_v40 = vmul.f32 1.442695, %v2171_v27  ;;  %v7180_v59 = vld [vmem:[#allocation16_spill] sm:$0xff] }
 0x921   : > { %2398 = vadd.xlane.f32.xlu1 %v2397_v58  ;;  %v2093_v10 = vpop.xlane.xlu1 %2092  ;;  %v2394_v4 = vadd.f32 %v6082_v54, %v6080_v37  ;;  %v7181_v27 = vld [vmem:[#allocation12_spill] sm:$0xff] }
 0x922   : > { %4736 = vpow2.f32 %v2274_v63  ;;  %v2168_v43 = vsub.f32 %v7177_v36, %v2093_v10  ;;  %v2169_v41 = vsub.f32 %v7178_v56, %v2093_v10 }
 0x923   : > { %v6088_v28 = vpop.eup %4724  ;;  %4738 = vpow2.f32 %v2276_v40  ;;  %2395 = vadd.xlane.f32.xlu0 %v2394_v4 }
 0x924   : > { %7179 = vst [vmem:[#allocation20_spill] sm:$0xff] %v6088_v28  ;;  %v6090_v48 = vpop.eup %4726  ;;  %v2270_v62 = vmul.f32 1.442695, %v2168_v43  ;;  %v2272_v29 = vmul.f32 1.442695, %v2169_v41 }
 0x925   : > { %v2090_v8 = vpop.xlane.xlu1 %2089  ;;  %v2391_v58 = vadd.f32 %v6090_v48, %v6088_v28 }
 0x926   : > { %4740 = vpow2.f32 %v2270_v62  ;;  %v2166_v23 = vsub.f32 %v7180_v59, %v2090_v8  ;;  %v2167_v63 = vsub.f32 %v7181_v27, %v2090_v8  ;;  %v7183_v62 = vld [vmem:[#allocation17_spill] sm:$0xff] }
 0x927   : > { %v6096_v36 = vpop.eup %4728  ;;  %4742 = vpow2.f32 %v2272_v29  ;;  %2392 = vadd.xlane.f32.xlu1 %v2391_v58 }
 0x928   : > { %7182 = vst [vmem:[#allocation15_spill] sm:$0xff] %v6096_v36  ;;  %v6098_v10 = vpop.eup %4730  ;;  %v2266_v40 = vmul.f32 1.442695, %v2166_v23  ;;  %v2268_v4 = vmul.f32 1.442695, %v2167_v63 }
 0x929   : > { %v2087_v56 = vpop.xlane.xlu1 %2086  ;;  %v2388_v43 = vadd.f32 %v6098_v10, %v6096_v36 }
 0x92a   : > { %4744 = vpow2.f32 %v2266_v40  ;;  %v2164_v41 = vsub.f32 %v5772_v32, %v2087_v56  ;;  %v2165_v28 = vsub.f32 %v7183_v62, %v2087_v56  ;;  %v7184_v40 = vld [vmem:[#allocation21_spill] sm:$0xff] }
 0x92b   : > { %v6104_v59 = vpop.eup %4732  ;;  %4746 = vpow2.f32 %v2268_v4  ;;  %2389 = vadd.xlane.f32.xlu0 %v2388_v43 }
 0x92c   : > { %v6106_v8 = vpop.eup %4734  ;;  %v2262_v29 = vmul.f32 1.442695, %v2164_v41  ;;  %v2264_v58 = vmul.f32 1.442695, %v2165_v28 }
 0x92d   : > { %v2084_v27 = vpop.xlane.xlu1 %2083  ;;  %v2385_v23 = vadd.f32 %v6106_v8, %v6104_v59 }
 0x92e   : > { %4748 = vpow2.f32 %v2262_v29  ;;  %v2162_v63 = vsub.f32 %v5764_v17, %v2084_v27  ;;  %v2163_v36 = vsub.f32 %v7184_v40, %v2084_v27 }
 0x92f   : > { %v6112_v32 = vpop.eup %4736  ;;  %4750 = vpow2.f32 %v2264_v58  ;;  %2386 = vadd.xlane.f32.xlu1 %v2385_v23 }
 0x930   : > { %v6114_v56 = vpop.eup %4738  ;;  %v2258_v4 = vmul.f32 1.442695, %v2162_v63  ;;  %v2260_v43 = vmul.f32 1.442695, %v2163_v36 }
 0x931   : > { %v2382_v28 = vadd.f32 %v6114_v56, %v6112_v32 }
 0x932   : > { %4752 = vpow2.f32 %v2258_v4 }
 0x933   : > { %v6118_v41 = vpop.eup %4740  ;;  %4754 = vpow2.f32 %v2260_v43  ;;  %2383 = vadd.xlane.f32.xlu0 %v2382_v28 }
 0x934   : > { %7185 = vst [vmem:[#allocation8_spill] sm:$0xff] %v6118_v41  ;;  %v6120_v62 = vpop.eup %4742 }
 0x935   : > { %v2379_v17 = vadd.f32 %v6120_v62, %v6118_v41 }
 0x937   : > { %v6124_v29 = vpop.eup %4744  ;;  %2380 = vadd.xlane.f32.xlu1 %v2379_v17 }
 0x938   : > { %7186 = vst [vmem:[#allocation3_spill] sm:$0xff] %v6124_v29  ;;  %v6126_v58 = vpop.eup %4746 }
 0x939   : > { %7187 = vst [vmem:[#allocation5_spill] sm:$0xff] %v6126_v58  ;;  %v2376_v36 = vadd.f32 %v6126_v58, %v6124_v29 }
 0x93b   : > { %v6130_v27 = vpop.eup %4748  ;;  %2377 = vadd.xlane.f32.xlu0 %v2376_v36 }
 0x93c   : > { %7188 = vst [vmem:[#allocation6_spill] sm:$0xff] %v6130_v27  ;;  %v6132_v23 = vpop.eup %4750 }
 0x93d   : > { %7189 = vst [vmem:[#allocation18_spill] sm:$0xff] %v6132_v23  ;;  %v2373_v63 = vadd.f32 %v6132_v23, %v6130_v27 }
 0x93f   : > { %v6136_v40 = vpop.eup %4752  ;;  %2374 = vadd.xlane.f32.xlu1 %v2373_v63 }
 0x940   : > { %7190 = vst [vmem:[#allocation11_spill] sm:$0xff] %v6136_v40  ;;  %v6138_v4 = vpop.eup %4754 }
 0x941   : > { %v2370_v43 = vadd.f32 %v6138_v4, %v6136_v40 }
 0x943   : > { %2371 = vadd.xlane.f32.xlu0 %v2370_v43 }
 0x95c   : > { %v2369_v28 = vpop.xlane.xlu0 %2368 }
 0x95d   : > { %4756 = vrcp.f32 %v2369_v28 }
 0x960   : > { %v2366_v17 = vpop.xlane.xlu0 %2365 }
 0x961   : > { %4758 = vrcp.f32 %v2366_v17 }
 0x964   : > { %v2363_v29 = vpop.xlane.xlu0 %2362 }
 0x965   : > { %4760 = vrcp.f32 %v2363_v29 }
 0x968   : > { %v2360_v36 = vpop.xlane.xlu0 %2359 }
 0x969   : > { %4762 = vrcp.f32 %v2360_v36 }
 0x96a   : > { %v4757_v58 = vpop.eup %4756 }
 0x96b   : > { %v2481_v27 = vmul.f32 %v4757_v58, %v5900_v7  ;;  %v2480_v23 = vmul.f32 %v4757_v58, %v5898_v33 }
 0x96c   : > { %v2357_v63 = vpop.xlane.xlu0 %2356 }
 0x96d   : > { %4764 = vrcp.f32 %v2357_v63  ;;  %2514 = vmatprep.subr.mxu0 %v2481_v27 }
 0x96e   : > { %v4759_v41 = vpop.eup %4758  ;;  %2515 = vmatpush1.xpose.msra.mxu0 %v2480_v23 }
 0x96f   : > { %v2479_v43 = vmul.f32 %v4759_v41, %v5908_v39  ;;  %v2478_v28 = vmul.f32 %v4759_v41, %v5903_v22 }
 0x970   : > { %v2354_v40 = vpop.xlane.xlu0 %2353 }
 0x971   : > { %4766 = vrcp.f32 %v2354_v40  ;;  %2516 = vmatprep.subr.mxu0 %v2479_v43 }
 0x972   : > { %v4761_v29 = vpop.eup %4760  ;;  %2517 = vmatpush1.xpose.msra.mxu0 %v2478_v28 }
 0x973   : > { %v2477_v17 = vmul.f32 %v4761_v29, %v5916_v1  ;;  %v2476_v7 = vmul.f32 %v4761_v29, %v5911_v0 }
 0x974   : > { %v2351_v36 = vpop.xlane.xlu0 %2350 }
 0x975   : > { %4768 = vrcp.f32 %v2351_v36  ;;  %2518 = vmatprep.subr.mxu0 %v2477_v17 }
 0x976   : > { %v4763_v33 = vpop.eup %4762  ;;  %2519 = vmatpush1.xpose.msra.mxu0 %v2476_v7 }
 0x977   : > { %v2475_v58 = vmul.f32 %v4763_v33, %v5925_v30  ;;  %v2474_v39 = vmul.f32 %v4763_v33, %v5920_v18 }
 0x978   : > { %v2348_v27 = vpop.xlane.xlu0 %2347 }
 0x979   : > { %4770 = vrcp.f32 %v2348_v27  ;;  %2520 = vmatprep.subr.mxu0 %v2475_v58 }
 0x97a   : > { %v4765_v22 = vpop.eup %4764  ;;  %2521 = vmatpush1.xpose.msra.mxu0 %v2474_v39 }
 0x97b   : > { %v2473_v41 = vmul.f32 %v4765_v22, %v5934_v60  ;;  %v2472_v1 = vmul.f32 %v4765_v22, %v5930_v42 }
 0x97c   : > { %v2345_v23 = vpop.xlane.xlu0 %2344  ;;  %v2339_v0 = vpop.xlane.xlu1 %2338 }
 0x97d   : > { %4772 = vrcp.f32 %v2345_v23  ;;  %2522 = vmatprep.subr.mxu0 %v2473_v41 }
 0x97e   : > { %v4767_v40 = vpop.eup %4766  ;;  %2523 = vmatpush1.xpose.msra.mxu0 %v2472_v1  ;;  %4774 = vrcp.f32 %v2339_v0 }
 0x97f   : > { %v2471_v63 = vmul.f32 %v4767_v40, %v5944_v26  ;;  %v2470_v30 = vmul.f32 %v4767_v40, %v5940_v11  ;;  %v7191_v40 = vld [vmem:[#allocation14_spill] sm:$0xff] }
 0x980   : > { %v2342_v18 = vpop.xlane.xlu0 %2341  ;;  %v2333_v17 = vpop.xlane.xlu1 %2332 }
 0x981   : > { %4776 = vrcp.f32 %v2342_v18  ;;  %2524 = vmatprep.subr.mxu0 %v2471_v63 }
 0x982   : > { %v4769_v43 = vpop.eup %4768  ;;  %2525 = vmatpush1.xpose.msra.mxu0 %v2470_v30 }
 0x983   : > { %v2469_v60 = vmul.f32 %v4769_v43, %v5954_v19  ;;  %v2468_v42 = vmul.f32 %v4769_v43, %v5949_v45 }
 0x984   : > { %v2336_v28 = vpop.xlane.xlu0 %2335  ;;  %v2327_v39 = vpop.xlane.xlu1 %2326 }
 0x985   : > { %4778 = vrcp.f32 %v2336_v28  ;;  %2526 = vmatprep.subr.mxu0 %v2469_v60 }
 0x986   : > { %v4771_v29 = vpop.eup %4770  ;;  %2527 = vmatpush1.xpose.msra.mxu0 %v2468_v42  ;;  %4780 = vrcp.f32 %v2333_v17  ;;  %v7193_v42 = vld [vmem:[#allocation13_spill] sm:$0xff] }
 0x987   : > { %v2467_v26 = vmul.f32 %v4771_v29, %v5962_v3  ;;  %v2466_v11 = vmul.f32 %v4771_v29, %v5957_v9 }
 0x988   : > { %v2330_v36 = vpop.xlane.xlu0 %2329 }
 0x989   : > { %2528 = vmatprep.subr.mxu0 %v2467_v26  ;;  %4782 = vrcp.f32 %v2330_v36 }
 0x98a   : > { %v4773_v7 = vpop.eup %4772  ;;  %2529 = vmatpush1.xpose.msra.mxu0 %v2466_v11  ;;  %4784 = vrcp.f32 %v2327_v39 }
 0x98b   : > { %v2465_v33 = vmul.f32 %v4773_v7, %v5966_v57  ;;  %v2464_v19 = vmul.f32 %v4773_v7, %v5964_v47  ;;  %v4775_v45 = vpop.eup %4774 }
 0x98c   : > { %v2461_v9 = vmul.f32 %v4775_v45, %v5972_v38  ;;  %v2324_v41 = vpop.xlane.xlu0 %2323  ;;  %v2460_v47 = vmul.f32 %v4775_v45, %v5968_v6 }
 0x98d   : > { %2530 = vmatprep.subr.mxu0 %v2465_v33  ;;  %4786 = vrcp.f32 %v2324_v41 }
 0x98e   : > { %v4777_v58 = vpop.eup %4776  ;;  %2531 = vmatpush1.xpose.msra.mxu0 %v2464_v19 }
 0x98f   : > { %v2463_v27 = vmul.f32 %v4777_v58, %v5978_v55  ;;  %v2462_v3 = vmul.f32 %v4777_v58, %v5974_v2 }
 0x991   : > { %2532 = vmatprep.subr.mxu0 %v2463_v27 }
 0x992   : > { %v4779_v22 = vpop.eup %4778  ;;  %2533 = vmatpush1.xpose.msra.mxu0 %v2462_v3 }
 0x993   : > { %2534 = vmatprep.subr.mxu0 %v2461_v9  ;;  %v2459_v57 = vmul.f32 %v4779_v22, %v5990_v25  ;;  %v4781_v1 = vpop.eup %4780  ;;  %v2458_v55 = vmul.f32 %v4779_v22, %v5986_v52  ;;  %v7192_v52 = vld [vmem:[#allocation4_spill] sm:$0xff] }
 0x994   : > { %v2457_v2 = vmul.f32 %v4781_v1, %v5984_v44  ;;  %v2456_v63 = vmul.f32 %v4781_v1, %v7191_v40 }
 0x996   : > { %2535 = vmatpush1.xpose.msra.mxu0 %v2460_v47  ;;  %v4783_v0 = vpop.eup %4782 }
 0x997   : > { %2536 = vmatprep.subr.mxu0 %v2459_v57  ;;  %v2455_v6 = vmul.f32 %v4783_v0, %v6006_v46  ;;  %v4785_v30 = vpop.eup %4784  ;;  %v2454_v18 = vmul.f32 %v4783_v0, %v6002_v49  ;;  %v7194_v0 = vld [vmem:[#allocation20_spill] sm:$0xff] }
 0x998   : > { %v2414_v23 = vpop.xlane.xlu0 %2413  ;;  %v2453_v43 = vmul.f32 %v4785_v30, %v7192_v52  ;;  %v2452_v28 = vmul.f32 %v4785_v30, %v7193_v42  ;;  %v7197_v42 = vld [vmem:[#allocation5_spill] sm:$0xff] }
 0x999   : > { %4788 = vrcp.f32 %v2414_v23 }
 0x99a   : > { %2537 = vmatpush1.xpose.msra.mxu0 %v2458_v55  ;;  %v4787_v44 = vpop.eup %4786 }
 0x99b   : > { %2538 = vmatprep.subr.mxu0 %v2457_v2  ;;  %v2451_v29 = vmul.f32 %v4787_v44, %v6016_v51  ;;  %v2450_v46 = vmul.f32 %v4787_v44, %v6011_v14 }
 0x99c   : > { %v2408_v60 = vpop.xlane.xlu0 %2407 }
 0x99e   : > { %v2417_v38 = vpop.xlane.xlu1 %2416  ;;  %2539 = vmatpush1.xpose.msra.mxu0 %v2456_v63  ;;  %v7195_v63 = vld [vmem:[#allocation15_spill] sm:$0xff] }
 0x99f   : > { %4790 = vrcp.f32 %v2417_v38  ;;  %2540 = vmatprep.subr.mxu0 %v2455_v6 }
 0x9a0   : > { %v2402_v11 = vpop.xlane.xlu0 %2401 }
 0x9a2   : > { %v2411_v25 = vpop.xlane.xlu1 %2410  ;;  %2541 = vmatpush1.xpose.msra.mxu0 %v2454_v18 }
 0x9a3   : > { %4792 = vrcp.f32 %v2411_v25  ;;  %2542 = vmatprep.subr.mxu0 %v2453_v43 }
 0x9a4   : > { %4794 = vrcp.f32 %v2408_v60 }
 0x9a6   : > { %v2405_v17 = vpop.xlane.xlu1 %2404  ;;  %2543 = vmatpush1.xpose.msra.mxu0 %v2452_v28  ;;  %v4789_v26 = vpop.eup %4788 }
 0x9a7   : > { %2544 = vmatprep.subr.mxu0 %v2451_v29  ;;  %4796 = vrcp.f32 %v2405_v17  ;;  %v2511_v33 = vmul.f32 %v4789_v26, %v6030_v61  ;;  %v2510_v45 = vmul.f32 %v4789_v26, %v6028_v12 }
 0x9a8   : > { %4798 = vrcp.f32 %v2402_v11  ;;  %v7201_v11 = vld [vmem:[#allocation11_spill] sm:$0xff] }
 0x9aa   : > { %2545 = vmatpush1.xpose.msra.mxu0 %v2450_v46  ;;  %v2399_v51 = vpop.xlane.xlu1 %2398 }
 0x9ab   : > { %4800 = vrcp.f32 %v2399_v51 }
 0x9ac   : > { %v4791_v49 = vpop.eup %4790  ;;  %v2396_v39 = vpop.xlane.xlu0 %2395 }
 0x9ad   : > { %v2513_v7 = vmul.f32 %v4791_v49, %v6044_v50  ;;  %v2512_v36 = vmul.f32 %v4791_v49, %v6040_v13  ;;  %4802 = vrcp.f32 %v2396_v39 }
 0x9af   : > { %2546 = vmatprep.subr.mxu0 %v2513_v7 }
 0x9b0   : > { %v4793_v19 = vpop.eup %4792  ;;  %2547 = vmatpush2.xpose.msra.mxu0 %v2512_v36  ;;  %v2393_v61 = vpop.xlane.xlu1 %2392  ;;  %v7202_v36 = vld [vmem:[#allocation7_spill] sm:$0xff] }
 0x9b1   : > { %2548 = vmatprep.subr.mxu0 %v2511_v33  ;;  %v2509_v14 = vmul.f32 %v4793_v19, %v6058_v16  ;;  %v4795_v58 = vpop.eup %4794  ;;  %v2508_v50 = vmul.f32 %v4793_v19, %v6054_v5  ;;  %4804 = vrcp.f32 %v2393_v61  ;;  %v7203_v33 = vmov 0.0   ;;  %v2586_v19 = vld [vmem:[%s7016_s6] sm:$0xff]  ;;  %v2667_v61 = vld [vmem:[%s7017_s7 + $0x8] sm:$0xff] }
 0x9b2   : > { %v2507_v13 = vmul.f32 %v4795_v58, %v6038_v53  ;;  %v2506_v3 = vmul.f32 %v4795_v58, %v6036_v21  ;;  %2589 = vperm.xlu1 %4431, %v2586_v19  }
 0x9b4   : > { %2549 = vmatpush2.xpose.msra.mxu0 %v2510_v45  ;;  %v4797_v27 = vpop.eup %4796  ;;  %v2390_v16 = vpop.xlane.xlu0 %2389 }
 0x9b5   : > { %2550 = vmatprep.subr.mxu0 %v2509_v14  ;;  %v2505_v12 = vmul.f32 %v4797_v27, %v6066_v34  ;;  %v4799_v9 = vpop.eup %4798  ;;  %v2504_v22 = vmul.f32 %v4797_v27, %v6062_v31  ;;  %4806 = vrcp.f32 %v2390_v16  ;;  %v2666_v27 = vld [vmem:[%s7017_s7] sm:$0xff]  ;;  %v2671_v16 = vld [vmem:[%s7017_s7 + $0x28] sm:$0xff] }
 0x9b6   : > { %v2503_v5 = vmul.f32 %v4799_v9, %v6052_v15  ;;  %v2502_v47 = vmul.f32 %v4799_v9, %v6048_v20  ;;  %v2670_v9 = vld [vmem:[%s7017_s7 + $0x20] sm:$0xff] }
 0x9b8   : > { %2551 = vmatpush2.xpose.msra.mxu0 %v2508_v50  ;;  %v4801_v41 = vpop.eup %4800  ;;  %v2387_v53 = vpop.xlane.xlu1 %2386 }
 0x9b9   : > { %2552 = vmatprep.subr.mxu0 %v2507_v13  ;;  %4808 = vrcp.f32 %v2387_v53  ;;  %v2501_v21 = vmul.f32 %v4801_v41, %v6074_v35  ;;  %v2500_v1 = vmul.f32 %v4801_v41, %v6072_v24 }
 0x9ba   : > { %v4803_v57 = vpop.eup %4802 }
 0x9bb   : > { %v2499_v31 = vmul.f32 %v4803_v57, %v6082_v54  ;;  %v2498_v23 = vmul.f32 %v4803_v57, %v6080_v37 }
 0x9bc   : > { %2553 = vmatpush2.xpose.msra.mxu0 %v2506_v3  ;;  %v2384_v34 = vpop.xlane.xlu0 %2383  ;;  %v2668_v3 = vld [vmem:[%s7017_s7 + $0x10] sm:$0xff] }
 0x9bd   : > { %2554 = vmatprep.subr.mxu0 %v2505_v12  ;;  %4810 = vrcp.f32 %v2384_v34  ;;  %v2669_v12 = vld [vmem:[%s7017_s7 + $0x18] sm:$0xff] }
 0x9be   : > { %v4805_v55 = vpop.eup %4804 }
 0x9bf   : > { %v2497_v20 = vmul.f32 %v4805_v55, %v6090_v48  ;;  %v2496_v38 = vmul.f32 %v4805_v55, %v7194_v0 }
 0x9c0   : > { %2555 = vmatpush2.xpose.msra.mxu0 %v2504_v22  ;;  %v2381_v15 = vpop.xlane.xlu1 %2380  ;;  %v2672_v22 = vld [vmem:[%s7017_s7 + $0x30] sm:$0xff] }
 0x9c1   : > { %2556 = vmatprep.subr.mxu0 %v2503_v5  ;;  %4812 = vrcp.f32 %v2381_v15 }
 0x9c2   : > { %v4807_v2 = vpop.eup %4806 }
 0x9c3   : > { %v2495_v24 = vmul.f32 %v4807_v2, %v6098_v10  ;;  %v2494_v6 = vmul.f32 %v4807_v2, %v7195_v63 }
 0x9c4   : > { %2557 = vmatpush2.xpose.msra.mxu0 %v2502_v47  ;;  %v2378_v35 = vpop.xlane.xlu0 %2377 }
 0x9c5   : > { %2558 = vmatprep.subr.mxu0 %v2501_v21  ;;  %4814 = vrcp.f32 %v2378_v35 }
 0x9c6   : > { %v4809_v40 = vpop.eup %4808 }
 0x9c7   : > { %v2493_v37 = vmul.f32 %v4809_v40, %v6106_v8  ;;  %v2492_v25 = vmul.f32 %v4809_v40, %v6104_v59  ;;  %v7196_v8 = vld [vmem:[#allocation8_spill] sm:$0xff]  ;;  %v7198_v59 = vld [vmem:[#allocation3_spill] sm:$0xff] }
 0x9c8   : > { %2559 = vmatpush2.xpose.msra.mxu0 %v2500_v1  ;;  %v2375_v54 = vpop.xlane.xlu1 %2374 }
 0x9c9   : > { %2560 = vmatprep.subr.mxu0 %v2499_v31  ;;  %4816 = vrcp.f32 %v2375_v54 }
 0x9ca   : > { %v4811_v30 = vpop.eup %4810 }
 0x9cb   : > { %v2491_v18 = vmul.f32 %v4811_v30, %v6114_v56  ;;  %v2490_v10 = vmul.f32 %v4811_v30, %v6112_v32  ;;  %v7199_v56 = vld [vmem:[#allocation18_spill] sm:$0xff] }
 0x9cc   : > { %2561 = vmatpush2.xpose.msra.mxu0 %v2498_v23  ;;  %v2372_v48 = vpop.xlane.xlu0 %2371  ;;  %v7200_v32 = vld [vmem:[#allocation6_spill] sm:$0xff] }
 0x9cd   : > { %2562 = vmatprep.subr.mxu0 %v2497_v20  ;;  %4818 = vrcp.f32 %v2372_v48 }
 0x9ce   : > { %v4813_v52 = vpop.eup %4812 }
 0x9cf   : > { %v2489_v43 = vmul.f32 %v4813_v52, %v6120_v62  ;;  %v2488_v60 = vmul.f32 %v4813_v52, %v7196_v8 }
 0x9d0   : > { %2563 = vmatpush2.xpose.msra.mxu0 %v2496_v38 }
 0x9d1   : > { %2564 = vmatprep.subr.mxu0 %v2495_v24 }
 0x9d2   : > { %v4815_v44 = vpop.eup %4814 }
 0x9d3   : > { %v2487_v28 = vmul.f32 %v4815_v44, %v7197_v42  ;;  %v2486_v17 = vmul.f32 %v4815_v44, %v7198_v59 }
 0x9d4   : > { %2565 = vmatpush2.xpose.msra.mxu0 %v2494_v6 }
 0x9d5   : > { %2566 = vmatprep.subr.mxu0 %v2493_v37 }
 0x9d6   : > { %v4817_v29 = vpop.eup %4816 }
 0x9d7   : > { %v2485_v46 = vmul.f32 %v4817_v29, %v7199_v56  ;;  %v2484_v49 = vmul.f32 %v4817_v29, %v7200_v32 }
 0x9d8   : > { %2567 = vmatpush2.xpose.msra.mxu0 %v2492_v25 }
 0x9d9   : > { %2568 = vmatprep.subr.mxu0 %v2491_v18 }
 0x9da   : > { %v4819_v26 = vpop.eup %4818 }
 0x9db   : > { %v2483_v62 = vmul.f32 %v4819_v26, %v6138_v4  ;;  %v2482_v7 = vmul.f32 %v4819_v26, %v7201_v11  ;;  %v2585_v4 = vld [vmem:[%s7015_s5] sm:$0xff] }
 0x9dc   : > { %2569 = vmatpush2.xpose.msra.mxu0 %v2490_v10 }
 0x9dd   : > { %2570 = vmatprep.subr.mxu0 %v2489_v43 }
 0x9e0   : > { %2571 = vmatpush2.xpose.msra.mxu0 %v2488_v60 }
 0x9e1   : > { %2572 = vmatprep.subr.mxu0 %v2487_v28 }
 0x9e4   : > { %2573 = vmatpush2.xpose.msra.mxu0 %v2486_v17 }
 0x9e5   : > { %2574 = vmatprep.subr.mxu0 %v2485_v46 }
 0x9e8   : > { %2575 = vmatpush2.xpose.msra.mxu0 %v2484_v49 }
 0x9e9   : > { %2576 = vmatprep.subr.mxu0 %v2483_v62 }
 0x9ec   : > { %2577 = vmatpush2.xpose.msra.mxu0 %v2482_v7 }
 0x9ef   : > { %2579 = vmatmul.mubr.f32.vlgmr.msra.gmra.mxu0 %v7202_v36 }
 0x9f0   : > { %2758 = vmatprep.mubr.f32.mxu0 %v7203_v33 }
 0xa2d   : > { %v2590_v58 = vpop.permute.xlu1 %2589 }
 0xaaf   : > { %v2580_v51 = vpop.f32.mrf.mxu0 }
 0xab1   : > { %v2582_v45 = vpop.f32.mrf.mxu0 }
 0xab2   : > { %2625 = vmatprep.subr.mxu1 %v2582_v45 }
 0xab3   : > { %2626 = vmatpush1.msra.mxu1 %v2580_v51 }
 0xab4   : > { %4310 = vmatmul.mubr.msk.f32.vlgmr.msra.gmra.mxu1 %vm366_vm0, %v2585_v4 }
 0xab5   : > { %2764 = vmatprep.mubr.f32.mxu1 %v7203_v33 }
 0xb74   : > { %v2661_v14 = vpop.f32.mrf.mxu1 }
 0xb75   : > { %v2662_v13 = vadd.f32 %v2661_v14, %v2590_v58 }
 0xb76   : > { %v2663_v39 = vpop.f32.mrf.mxu1 }
 0xb77   : > { %v2664_v50 = vadd.f32 %v2663_v39, %v2590_v58 }
 0xb79   : > { %2724 = vmatprep.subr.mxu0 %v2664_v50  ;;  %4370 = vmatprep.subr.mxu1 %v2664_v50 }
 0xb7a   : > { %2725 = vmatpush1.msra.mxu0 %v2662_v13  ;;  %4371 = vmatpush1.msra.mxu1 %v2662_v13 }
 0xb7b   : > { %4311 = vmatmul.mubr.msk.f32.vlgmr.msra.gmra.mxu0 %vm366_vm0, %v2666_v27  ;;  %4312 = vmatmul.mubr.msk.f32.vlgmr.msra.gmra.mxu1 %vm366_vm0, %v2667_v61  ;;  %v2805_v61 = vlaneseq }
 0xb7c   : > { %2770 = vmatprep.mubr.f32.mxu1 %v7203_v33 }
 0xb7f   : > { %4313 = vmatmul.mubr.msk.f32.gmra.mxu1 %vm366_vm0, %v2668_v3 }
 0xb80   : > { %2776 = vmatprep.mubr.f32.mxu1 %v7203_v33 }
 0xb83   : > { %4314 = vmatmul.mubr.msk.f32.gmra.mxu1 %vm366_vm0, %v2669_v12 }
 0xb84   : > { %2782 = vmatprep.mubr.f32.mxu1 %v7203_v33 }
 0xb87   : > { %4315 = vmatmul.mubr.msk.f32.gmra.mxu1 %vm366_vm0, %v2670_v9  ;;  %v6283_v9 = vand.u32 127, %v2805_v61 }
 0xb88   : > { %2788 = vmatprep.mubr.f32.mxu1 %v7203_v33 }
 0xb89   : > { %vm3028_vm1 = vcmp.lt.s32.totalorder %v6283_v9, 34  ;;  %vm2807_vm2 = vcmp.lt.s32.totalorder %v6283_v9, 51  ;;  %vm2836_vm3 = vcmp.lt.s32.totalorder %v6283_v9, 50  ;;  %vm2864_vm4 = vcmp.lt.s32.totalorder %v6283_v9, 49 }
 0xb8a   : > { %vm2892_vm5 = vcmp.lt.s32.totalorder %v6283_v9, 48  ;;  %vm2920_vm6 = vcmp.lt.s32.totalorder %v6283_v9, 47  ;;  %vm2948_vm7 = vcmp.lt.s32.totalorder %v6283_v9, 46  ;;  %vm2976_vm8 = vcmp.lt.s32.totalorder %v6283_v9, 45 }
 0xb8b   : > { %4316 = vmatmul.mubr.msk.f32.gmra.mxu1 %vm366_vm0, %v2671_v16  ;;  %v2813_v16 = vshrl.u32 %v2805_v61, 7  ;;  %vm3004_vm9 = vcmp.lt.s32.totalorder %v6283_v9, 35  ;;  %vm3058_vm10 = vcmp.lt.s32.totalorder %v6283_v9, 33  ;;  %vm3086_vm11 = vcmp.lt.s32.totalorder %v6283_v9, 32 }
 0xb8c   : > { %2794 = vmatprep.mubr.f32.mxu1 %v7203_v33  ;;  %vm3114_vm12 = vcmp.lt.s32.totalorder %v6283_v9, 31  ;;  %vm3142_vm13 = vcmp.lt.s32.totalorder %v6283_v9, 30  ;;  %vm3170_vm14 = vcmp.lt.s32.totalorder %v6283_v9, 29  ;;  %vm3198_vm15 = vcmp.lt.s32.totalorder %v6283_v9, 19 }
 0xb8f   : > { %4317 = vmatmul.mubr.msk.f32.gmra.mxu1 %vm366_vm0, %v2672_v22  ;;  %vm3226_vm0 = vcmp.lt.s32.totalorder %v6283_v9, 18 }
 0xc3b   : > { %v2760_v5 = vpop.f32.mrf.mxu0  ;;  %v6249_v41 = vpop.f32.mrf.mxu1 }
 0xc3c   : > { %3024 = vrot.lane.b32.xlu1 %v6249_v41, %s4836_s18  ;;  %2801 = vrot.lane.b32.xlu0 %v2760_v5, %s4837_s19  ;;  %v2828_v21 = vrot.slane %v2760_v5, 1  ;;  %v2856_v34 = vrot.slane %v2760_v5, 2  ;;  %v2884_v31 = vrot.slane %v2760_v5, 3  ;;  %v2912_v15 = vrot.slane %v2760_v5, 4 }
 0xc3d   : > { %v2762_v53 = vpop.f32.mrf.mxu0  ;;  %v6252_v47 = vpop.f32.mrf.mxu1  ;;  %v2940_v20 = vrot.slane %v2760_v5, 5  ;;  %v2968_v35 = vrot.slane %v2760_v5, 6  ;;  %v2996_v38 = vrot.slane %v2760_v5, 7  ;;  %v3050_v40 = vrot.slane %v6249_v41, 1 }
 0xc3e   : > { %v2829_v57 = vrot.slane %v2762_v53, 1  ;;  %v2857_v1 = vrot.slane %v2762_v53, 2  ;;  %v2885_v55 = vrot.slane %v2762_v53, 3  ;;  %v2913_v23 = vrot.slane %v2762_v53, 4 }
 0xc3f   : > { %v2941_v2 = vrot.slane %v2762_v53, 5  ;;  %v2969_v0 = vrot.slane %v2762_v53, 6  ;;  %v2997_v24 = vrot.slane %v2762_v53, 7  ;;  %v3051_v54 = vrot.slane %v6252_v47, 1  ;;  %v2772_v60 = vpop.f32.mrf.mxu1 }
 0xc40   : > { %3026 = vrot.lane.b32.xlu0 %v6252_v47, %s4836_s18  ;;  %2803 = vrot.lane.b32.xlu1 %v2762_v53, %s4837_s19  ;;  %v3078_v63 = vrot.slane %v6249_v41, 2  ;;  %v3079_v6 = vrot.slane %v6252_v47, 2  ;;  %v3106_v37 = vrot.slane %v6249_v41, 3  ;;  %v3107_v30 = vrot.slane %v6252_v47, 3  ;;  %s4854_s18 = smov 15   ;;  %s4855_s19 = smov 14  }
 0xc41   : > { %v3134_v48 = vrot.slane %v6249_v41, 4  ;;  %v3135_v25 = vrot.slane %v6252_v47, 4  ;;  %v3162_v18 = vrot.slane %v6249_v41, 5  ;;  %v3163_v52 = vrot.slane %v6252_v47, 5  ;;  %v2774_v42 = vpop.f32.mrf.mxu1 }
 0xc42   : > { %v3190_v10 = vrot.slane %v6249_v41, 6  ;;  %v3191_v43 = vrot.slane %v6252_v47, 6  ;;  %v3218_v44 = vrot.slane %v6249_v41, 7  ;;  %v3219_v8 = vrot.slane %v6252_v47, 7 }
 0xc43   : > { %v3272_v28 = vrot.slane %v2772_v60, 1  ;;  %v3273_v29 = vrot.slane %v2774_v42, 1  ;;  %v3300_v59 = vrot.slane %v2772_v60, 2  ;;  %v3301_v17 = vrot.slane %v2774_v42, 2  ;;  %v6269_v36 = vpop.f32.mrf.mxu1 }
 0xc44   : > { %2832 = vrot.lane.b32.xlu1 %v2828_v21, %s4838_s20  ;;  %2834 = vrot.lane.b32.xlu0 %v2829_v57, %s4838_s20  ;;  %v3328_v56 = vrot.slane %v2772_v60, 3  ;;  %v3329_v46 = vrot.slane %v2774_v42, 3  ;;  %v3356_v26 = vrot.slane %v2772_v60, 4  ;;  %v3357_v32 = vrot.slane %v2774_v42, 4  ;;  %s4856_s20 = smov 13  }
 0xc45   : > { %v3384_v49 = vrot.slane %v2772_v60, 5  ;;  %v3385_v62 = vrot.slane %v2774_v42, 5  ;;  %v3412_v11 = vrot.slane %v2772_v60, 6  ;;  %v3413_v7 = vrot.slane %v2774_v42, 6  ;;  %v6271_v51 = vpop.f32.mrf.mxu1 }
 0xc46   : > { %v3440_v33 = vrot.slane %v2772_v60, 7  ;;  %v3441_v19 = vrot.slane %v2774_v42, 7  ;;  %v3487_v45 = vrot.slane %v6269_v36, 1  ;;  %v3488_v4 = vrot.slane %v6271_v51, 1 }
 0xc47   : > { %v3515_v14 = vrot.slane %v6269_v36, 2  ;;  %v3516_v58 = vrot.slane %v6271_v51, 2  ;;  %v3543_v39 = vrot.slane %v6269_v36, 3  ;;  %v3544_v50 = vrot.slane %v6271_v51, 3 }
 0xc48   : > { %2860 = vrot.lane.b32.xlu1 %v2856_v34, %s4839_s21  ;;  %2862 = vrot.lane.b32.xlu0 %v2857_v1, %s4839_s21  ;;  %s4857_s21 = smov 3   ;;  %v3571_v13 = vrot.slane %v6269_v36, 4  ;;  %v3572_v27 = vrot.slane %v6271_v51, 4  ;;  %v3599_v3 = vrot.slane %v6269_v36, 5  ;;  %v3600_v12 = vrot.slane %v6271_v51, 5 }
 0xc49   : > { %v3627_v41 = vrot.slane %v6269_v36, 6  ;;  %v3628_v53 = vrot.slane %v6271_v51, 6  ;;  %v2810_v47 = vld [vmem:[%s7018_s8] ss:$8 sm:$0x3]  ;;  %v6290_v21 = vsub.s32 0, %v2813_v16 }
 0xc4a   : > { %v4318_v57 = vld [vmem:[%s7018_s8 + $0x1] ss:$8 sm:$0x3]  ;;  %v6297_v34 = vsub.s32 1, %v2813_v16 }
 0xc4c   : > { %2888 = vrot.lane.b32.xlu1 %v2884_v31, %s4840_s22  ;;  %2890 = vrot.lane.b32.xlu0 %v2885_v55, %s4840_s22  ;;  %s4858_s22 = smov 2   ;;  %v2815_v31 = vrot.slane %v2810_v47, %v6290_v21 }
 0xc50   : > { %2916 = vrot.lane.b32.xlu1 %v2912_v15, %s4841_s23  ;;  %2918 = vrot.lane.b32.xlu0 %v2913_v23, %s4841_s23  ;;  %s4859_s23 = smov 1   ;;  %v3655_v15 = vrot.slane %v6269_v36, 7  ;;  %v3656_v23 = vrot.slane %v6271_v51, 7 }
 0xc54   : > { %2944 = vrot.lane.b32.xlu1 %v2940_v20, %s4842_s24  ;;  %2946 = vrot.lane.b32.xlu0 %v2941_v2, %s4842_s24  ;;  %s4860_s24 = smov 127  }
 0xc58   : > { %2972 = vrot.lane.b32.xlu1 %v2968_v35, %s4843_s25  ;;  %2974 = vrot.lane.b32.xlu0 %v2969_v0, %s4843_s25  ;;  %s4861_s25 = smov 126  }
 0xc5c   : > { %3000 = vrot.lane.b32.xlu1 %v2996_v38, %s4844_s26  ;;  %3002 = vrot.lane.b32.xlu0 %v2997_v24, %s4844_s26  ;;  %s4862_s26 = smov 125   ;;  %v2819_v38 = vrot.slane %v2810_v47, %v6297_v34  ;;  %v6307_v24 = vpop.f32.mrf.mxu1 }
 0xc60   : > { %3054 = vrot.lane.b32.xlu1 %v3050_v40, %s4845_s27  ;;  %3056 = vrot.lane.b32.xlu0 %v3051_v54, %s4845_s27  ;;  %s4863_s27 = smov 115   ;;  %v2845_v40 = vrot.slane %v4318_v57, %v6290_v21  ;;  %v2849_v54 = vrot.slane %v4318_v57, %v6297_v34 }
 0xc64   : > { %3082 = vrot.lane.b32.xlu1 %v3078_v63, %s4846_s28  ;;  %3084 = vrot.lane.b32.xlu0 %v3079_v6, %s4846_s28  ;;  %s4864_s28 = smov 114   ;;  %v4319_v63 = vld [vmem:[%s7018_s8 + $0x2] ss:$8 sm:$0x3] }
 0xc68   : > { %3110 = vrot.lane.b32.xlu1 %v3106_v37, %s4847_s29  ;;  %3112 = vrot.lane.b32.xlu0 %v3107_v30, %s4847_s29 }
 0xc6c   : > { %3138 = vrot.lane.b32.xlu1 %v3134_v48, %s4848_s30  ;;  %3140 = vrot.lane.b32.xlu0 %v3135_v25, %s4848_s30  ;;  %v2873_v25 = vrot.slane %v4319_v63, %v6290_v21  ;;  %s4876_s30 = smov 93  }
 0xc70   : > { %3166 = vrot.lane.b32.xlu1 %v3162_v18, %s4849_s11  ;;  %3168 = vrot.lane.b32.xlu0 %v3163_v52, %s4849_s11  ;;  %s4865_s11 = smov 113   ;;  %v2877_v18 = vrot.slane %v4319_v63, %v6297_v34  ;;  %v3793_v63 = vrot.slane %v6307_v24, 4 }
 0xc74   : > { %3194 = vrot.lane.b32.xlu1 %v3190_v10, %s4850_s12  ;;  %3196 = vrot.lane.b32.xlu0 %v3191_v43, %s4850_s12 }
 0xc78   : > { %3222 = vrot.lane.b32.xlu1 %v3218_v44, %s4851_s13  ;;  %3224 = vrot.lane.b32.xlu0 %v3219_v8, %s4851_s13  ;;  %v6318_v8 = vpop.f32.mrf.mxu1  ;;  %s4877_s13 = smov 83  }
 0xc7c   : > { %3246 = vrot.lane.b32.xlu1 %v2772_v60, %s4852_s14  ;;  %3248 = vrot.lane.b32.xlu0 %v2774_v42, %s4852_s14  ;;  %s4866_s14 = smov 112   ;;  %v4320_v60 = vld [vmem:[%s7018_s8 + $0x3] ss:$8 sm:$0x3] }
 0xc80   : > { %3276 = vrot.lane.b32.xlu1 %v3272_v28, %s4853_s17  ;;  %3278 = vrot.lane.b32.xlu0 %v3273_v29, %s4853_s17 }
 0xc84   : > { %3304 = vrot.lane.b32.xlu1 %v3300_v59, %s4854_s18  ;;  %3306 = vrot.lane.b32.xlu0 %v3301_v17, %s4854_s18  ;;  %v3709_v17 = vrot.slane %v6307_v24, 1  ;;  %s4872_s18 = smov 97  }
 0xc88   : > { %3332 = vrot.lane.b32.xlu1 %v3328_v56, %s4855_s19  ;;  %3334 = vrot.lane.b32.xlu0 %v3329_v46, %s4855_s19  ;;  %s4867_s19 = smov 111  }
 0xc8c   : > { %3360 = vrot.lane.b32.xlu1 %v3356_v26, %s4856_s20  ;;  %3362 = vrot.lane.b32.xlu0 %v3357_v32, %s4856_s20  ;;  %v3710_v26 = vrot.slane %v6318_v8, 1  ;;  %s4880_s20 = smov 80  }
 0xc90   : > { %3388 = vrot.lane.b32.xlu1 %v3384_v49, %s4857_s21  ;;  %3390 = vrot.lane.b32.xlu0 %v3385_v62, %s4857_s21  ;;  %v2901_v62 = vrot.slane %v4320_v60, %v6290_v21  ;;  %s4873_s21 = smov 96  }
 0xc94   : > { %3416 = vrot.lane.b32.xlu1 %v3412_v11, %s4858_s22  ;;  %3418 = vrot.lane.b32.xlu0 %v3413_v7, %s4858_s22  ;;  %s4868_s22 = smov 110   ;;  %v2905_v11 = vrot.slane %v4320_v60, %v6297_v34  ;;  %v4321_v7 = vld [vmem:[%s7018_s8 + $0x4] ss:$8 sm:$0x3] }
 0xc95   : > { %v2929_v61 = vrot.slane %v4321_v7, %v6290_v21 }
 0xc98   : > { %3444 = vrot.lane.b32.xlu1 %v3440_v33, %s4859_s23  ;;  %3446 = vrot.lane.b32.xlu0 %v3441_v19, %s4859_s23  ;;  %s360_s23 = scalar_lea.vmem %s7020_s10, %s4368_s9 }
 0xc9c   : > { %3491 = vrot.lane.b32.xlu1 %v3487_v45, %s4860_s24  ;;  %3493 = vrot.lane.b32.xlu0 %v3488_v4, %s4860_s24  ;;  %s4874_s24 = smov 95  }
 0xca0   : > { %3519 = vrot.lane.b32.xlu1 %v3515_v14, %s4861_s25  ;;  %3521 = vrot.lane.b32.xlu0 %v3516_v58, %s4861_s25  ;;  %v3737_v14 = vrot.slane %v6307_v24, 2  ;;  %s4869_s25 = smov 109  }
 0xca4   : > { %3547 = vrot.lane.b32.xlu1 %v3543_v39, %s4862_s26  ;;  %3549 = vrot.lane.b32.xlu0 %v3544_v50, %s4862_s26  ;;  %v3738_v50 = vrot.slane %v6318_v8, 2  ;;  %s4882_s26 = smov 78  }
 0xca8   : > { %3575 = vrot.lane.b32.xlu1 %v3571_v13, %s4863_s27  ;;  %3577 = vrot.lane.b32.xlu0 %v3572_v27, %s4863_s27  ;;  %s4875_s27 = smov 94  }
 0xcac   : > { %3603 = vrot.lane.b32.xlu1 %v3599_v3, %s4864_s28  ;;  %3605 = vrot.lane.b32.xlu0 %v3600_v12, %s4864_s28  ;;  %v2933_v3 = vrot.slane %v4321_v7, %v6297_v34  ;;  %v4322_v12 = vld [vmem:[%s7018_s8 + $0x5] ss:$8 sm:$0x3]  ;;  %s4870_s28 = smov 99  }
 0xcae   : > { %v3025_v22 = vpop.permute.xlu1 %3024  ;;  %v2802_v5 = vpop.permute.xlu0 %2801 }
 0xcb0   : > { %3631 = vrot.lane.b32.xlu1 %v3627_v41, %s4865_s11  ;;  %3633 = vrot.lane.b32.xlu0 %v3628_v53, %s4865_s11  ;;  %v3765_v53 = vrot.slane %v6307_v24, 3  ;;  %s4871_s11 = smov 98  }
 0xcb2   : > { %v3027_v1 = vpop.permute.xlu0 %3026  ;;  %v2804_v55 = vpop.permute.xlu1 %2803 }
 0xcb3   : > { %v6302_v20 = vsel %vm3028_vm1, %v3025_v22, %v3027_v1  ;;  %v6304_v2 = vsel %vm3028_vm1, %v3027_v1, %v3025_v22  ;;  %v2808_v35 = vsel %vm2807_vm2, %v2802_v5, %v2804_v55  ;;  %v2809_v0 = vsel %vm2807_vm2, %v2804_v55, %v2802_v5 }
 0xcb4   : > { %3659 = vrot.lane.b32.xlu1 %v3655_v15, %s4866_s14  ;;  %3661 = vrot.lane.b32.xlu0 %v3656_v23, %s4866_s14  ;;  %v2822_v52 = vmul.f32 %v2815_v31, %v2809_v0  ;;  %v2823_v10 = vmul.f32 %v2819_v38, %v2808_v35  ;;  %v3766_v1 = vrot.slane %v6318_v8, 3  ;;  %v2957_v15 = vrot.slane %v4322_v12, %v6290_v21  ;;  %v4323_v35 = vld [vmem:[%s7018_s8 + $0x6] ss:$8 sm:$0x3] }
 0xcb5   : > { %v2961_v23 = vrot.slane %v4322_v12, %v6297_v34  ;;  %v4327_v12 = vld [vmem:[%s7018_s8 + $0x12] ss:$8 sm:$0x3]  ;;  %vm3250_vm1 = vcmp.lt.s32.totalorder %v6283_v9, 17  ;;  %vm3280_vm2 = vcmp.lt.s32.totalorder %v6283_v9, 16 }
 0xcb6   : > { %v2833_v6 = vpop.permute.xlu1 %2832  ;;  %v2835_v37 = vpop.permute.xlu0 %2834 }
 0xcb7   : > { %v2837_v30 = vsel %vm2836_vm3, %v2833_v6, %v2835_v37  ;;  %v2838_v48 = vsel %vm2836_vm3, %v2835_v37, %v2833_v6  ;;  %vm3308_vm3 = vcmp.lt.s32.totalorder %v6283_v9, 15 }
 0xcb8   : > { %v2852_v43 = vmul.f32 %v2845_v40, %v2838_v48  ;;  %v2853_v44 = vmul.f32 %v2849_v54, %v2837_v30  ;;  %3683 = vrot.lane.b32.xlu1 %v6307_v24, %s4867_s19  ;;  %3685 = vrot.lane.b32.xlu0 %v6318_v8, %s4867_s19  ;;  %v3794_v30 = vrot.slane %v6318_v8, 4  ;;  %s4879_s19 = smov 81  }
 0xcba   : > { %v2854_v42 = vadd.f32 %v2852_v43, %v2822_v52  ;;  %v2855_v28 = vadd.f32 %v2853_v44, %v2823_v10  ;;  %v2861_v29 = vpop.permute.xlu1 %2860  ;;  %v2863_v59 = vpop.permute.xlu0 %2862  ;;  %v2989_v52 = vrot.slane %v4323_v35, %v6297_v34  ;;  %v4324_v10 = vld [vmem:[%s7018_s8 + $0x7] ss:$8 sm:$0x3]  ;;  %v4325_v43 = vld [vmem:[%s7018_s8 + $0x10] ss:$8 sm:$0x3] }
 0xcbb   : > { %v2865_v56 = vsel %vm2864_vm4, %v2861_v29, %v2863_v59  ;;  %v2866_v46 = vsel %vm2864_vm4, %v2863_v59, %v2861_v29  ;;  %v3821_v29 = vrot.slane %v6307_v24, 5  ;;  %v3041_v7 = vrot.slane %v4325_v43, %v6297_v34 }
 0xcbc   : > { %v2880_v32 = vmul.f32 %v2873_v25, %v2866_v46  ;;  %v2881_v49 = vmul.f32 %v2877_v18, %v2865_v56  ;;  %3713 = vrot.lane.b32.xlu1 %v3709_v17, %s4868_s22  ;;  %3715 = vrot.lane.b32.xlu0 %v3710_v26, %s4868_s22  ;;  %v2985_v18 = vrot.slane %v4323_v35, %v6290_v21  ;;  %v3822_v56 = vrot.slane %v6318_v8, 5 }
 0xcbd   : > { %vm3336_vm4 = vcmp.lt.s32.totalorder %v6283_v9, 14 }
 0xcbe   : > { %v2882_v33 = vadd.f32 %v2880_v32, %v2854_v42  ;;  %v2883_v19 = vadd.f32 %v2881_v49, %v2855_v28  ;;  %v2889_v45 = vpop.permute.xlu1 %2888  ;;  %v2891_v4 = vpop.permute.xlu0 %2890  ;;  %v3013_v32 = vrot.slane %v4324_v10, %v6290_v21  ;;  %v3017_v49 = vrot.slane %v4324_v10, %v6297_v34  ;;  %v4329_v10 = vld [vmem:[%s7018_s8 + $0x14] ss:$8 sm:$0x3] }
 0xcbf   : > { %v2893_v58 = vsel %vm2892_vm5, %v2889_v45, %v2891_v4  ;;  %v2894_v39 = vsel %vm2892_vm5, %v2891_v4, %v2889_v45  ;;  %vm3364_vm5 = vcmp.lt.s32.totalorder %v6283_v9, 13 }
 0xcc0   : > { %v2908_v13 = vmul.f32 %v2901_v62, %v2894_v39  ;;  %v2909_v27 = vmul.f32 %v2905_v11, %v2893_v58  ;;  %3741 = vrot.lane.b32.xlu1 %v3737_v14, %s4869_s25  ;;  %3743 = vrot.lane.b32.xlu0 %v3738_v50, %s4869_s25  ;;  %v3037_v62 = vrot.slane %v4325_v43, %v6290_v21  ;;  %v4326_v11 = vld [vmem:[%s7018_s8 + $0x11] ss:$8 sm:$0x3]  ;;  %v3849_v14 = vrot.slane %v6307_v24, 6 }
 0xcc1   : > { %v3850_v50 = vrot.slane %v6318_v8, 6 }
 0xcc2   : > { %v2910_v16 = vadd.f32 %v2908_v13, %v2882_v33  ;;  %v2911_v22 = vadd.f32 %v2909_v27, %v2883_v19  ;;  %v2917_v5 = vpop.permute.xlu1 %2916  ;;  %v2919_v41 = vpop.permute.xlu0 %2918 }
 0xcc3   : > { %v2921_v47 = vsel %vm2920_vm6, %v2917_v5, %v2919_v41  ;;  %v2922_v57 = vsel %vm2920_vm6, %v2919_v41, %v2917_v5  ;;  %v3044_v5 = vmul.f32 %v3037_v62, %v6304_v2  ;;  %v3045_v41 = vmul.f32 %v3041_v7, %v6302_v20  ;;  %v6401_v20 = vpop.f32.mrf.mxu1 }
 0xcc4   : > { %v2936_v31 = vmul.f32 %v2929_v61, %v2922_v57  ;;  %v2937_v55 = vmul.f32 %v2933_v3, %v2921_v47  ;;  %3769 = vrot.lane.b32.xlu1 %v3765_v53, %s4870_s28  ;;  %3771 = vrot.lane.b32.xlu0 %v3766_v1, %s4870_s28  ;;  %v3067_v61 = vrot.slane %v4326_v11, %v6290_v21  ;;  %vm3392_vm6 = vcmp.lt.s32.totalorder %v6283_v9, 3 }
 0xcc5   : > { %v3071_v3 = vrot.slane %v4326_v11, %v6297_v34 }
 0xcc6   : > { %v2938_v0 = vadd.f32 %v2936_v31, %v2910_v16  ;;  %v2939_v38 = vadd.f32 %v2937_v55, %v2911_v22  ;;  %v2945_v40 = vpop.permute.xlu1 %2944  ;;  %v2947_v54 = vpop.permute.xlu0 %2946  ;;  %v3877_v16 = vrot.slane %v6307_v24, 7  ;;  %v3878_v22 = vrot.slane %v6318_v8, 7 }
 0xcc7   : > { %v2949_v6 = vsel %vm2948_vm7, %v2945_v40, %v2947_v54  ;;  %v2950_v37 = vsel %vm2948_vm7, %v2947_v54, %v2945_v40  ;;  %v3095_v24 = vrot.slane %v4327_v12, %v6290_v21  ;;  %v3099_v8 = vrot.slane %v4327_v12, %v6297_v34 }
 0xcc8   : > { %v2964_v48 = vmul.f32 %v2957_v15, %v2950_v37  ;;  %v2965_v25 = vmul.f32 %v2961_v23, %v2949_v6  ;;  %3797 = vrot.lane.b32.xlu1 %v3793_v63, %s4871_s11  ;;  %3799 = vrot.lane.b32.xlu0 %v3794_v30, %s4871_s11  ;;  %s4883_s11 = smov 77   ;;  %vm3420_vm7 = vcmp.lt.s32.totalorder %v6283_v9, 2 }
 0xcca   : > { %v2966_v44 = vadd.f32 %v2964_v48, %v2938_v0  ;;  %v2967_v60 = vadd.f32 %v2965_v25, %v2939_v38  ;;  %v2973_v42 = vpop.permute.xlu1 %2972  ;;  %v2975_v28 = vpop.permute.xlu0 %2974  ;;  %v4328_v0 = vld [vmem:[%s7018_s8 + $0x13] ss:$8 sm:$0x3] }
 0xccb   : > { %v2977_v59 = vsel %vm2976_vm8, %v2973_v42, %v2975_v28  ;;  %v2978_v17 = vsel %vm2976_vm8, %v2975_v28, %v2973_v42  ;;  %v6411_v25 = vpop.f32.mrf.mxu1  ;;  %v3931_v28 = vrot.slane %v6401_v20, 1  ;;  %vm3448_vm8 = vcmp.lt.s32.totalorder %v6283_v9, 1 }
 0xccc   : > { %v2992_v46 = vmul.f32 %v2985_v18, %v2978_v17  ;;  %v2993_v26 = vmul.f32 %v2989_v52, %v2977_v59  ;;  %3825 = vrot.lane.b32.xlu1 %v3821_v29, %s4872_s18  ;;  %3827 = vrot.lane.b32.xlu0 %v3822_v56, %s4872_s18  ;;  %v3123_v18 = vrot.slane %v4328_v0, %v6290_v21  ;;  %v3932_v17 = vrot.slane %v6411_v25, 1  ;;  %s4878_s18 = smov 82  }
 0xccd   : > { %v3127_v52 = vrot.slane %v4328_v0, %v6297_v34  ;;  %v4016_v0 = vrot.slane %v6411_v25, 4 }
 0xcce   : > { %v2994_v33 = vadd.f32 %v2992_v46, %v2966_v44  ;;  %v2995_v19 = vadd.f32 %v2993_v26, %v2967_v60  ;;  %v3001_v45 = vpop.permute.xlu1 %3000  ;;  %v3003_v4 = vpop.permute.xlu0 %3002  ;;  %v3151_v26 = vrot.slane %v4329_v10, %v6290_v21 }
 0xccf   : > { %v3005_v58 = vsel %vm3004_vm9, %v3001_v45, %v3003_v4  ;;  %v3006_v39 = vsel %vm3004_vm9, %v3003_v4, %v3001_v45  ;;  %vm3495_vm9 = vcmp.lt.s32.totalorder %v6283_v9, 127 }
 0xcd0   : > { %v3020_v13 = vmul.f32 %v3013_v32, %v3006_v39  ;;  %v3021_v27 = vmul.f32 %v3017_v49, %v3005_v58  ;;  %3853 = vrot.lane.b32.xlu1 %v3849_v14, %s4873_s21  ;;  %3855 = vrot.lane.b32.xlu0 %v3850_v50, %s4873_s21  ;;  %v3155_v32 = vrot.slane %v4329_v10, %v6297_v34  ;;  %v4330_v49 = vld [vmem:[%s7018_s8 + $0x15] ss:$8 sm:$0x3]  ;;  %v3960_v14 = vrot.slane %v6411_v25, 2  ;;  %s4881_s21 = smov 79  }
 0xcd1   : > { %v3179_v50 = vrot.slane %v4330_v49, %v6290_v21  ;;  %v4071_v10 = vrot.slane %v6401_v20, 6 }
 0xcd2   : > { %v3022_v53 = vadd.f32 %v3020_v13, %v2994_v33  ;;  %v3023_v47 = vadd.f32 %v3021_v27, %v2995_v19  ;;  %v3055_v57 = vpop.permute.xlu1 %3054  ;;  %v3057_v1 = vpop.permute.xlu0 %3056  ;;  %v3959_v19 = vrot.slane %v6401_v20, 2  ;;  %v3183_v13 = vrot.slane %v4330_v49, %v6297_v34  ;;  %v4331_v27 = vld [vmem:[%s7018_s8 + $0x16] ss:$8 sm:$0x3] }
 0xcd3   : > { %v3059_v31 = vsel %vm3058_vm10, %v3055_v57, %v3057_v1  ;;  %v3060_v55 = vsel %vm3058_vm10, %v3057_v1, %v3055_v57  ;;  %v3207_v1 = vrot.slane %v4331_v27, %v6290_v21  ;;  %vm3523_vm10 = vcmp.lt.s32.totalorder %v6283_v9, 126 }
 0xcd4   : > { %v3046_v15 = vadd.f32 %v3044_v5, %v3022_v53  ;;  %v3047_v23 = vadd.f32 %v3045_v41, %v3023_v47  ;;  %v3074_v35 = vmul.f32 %v3067_v61, %v3060_v55  ;;  %v3075_v2 = vmul.f32 %v3071_v3, %v3059_v31  ;;  %3881 = vrot.lane.b32.xlu1 %v3877_v16, %s4874_s24 }
 0xcd5   : > { %3883 = vrot.lane.b32.xlu0 %v3878_v22, %s4874_s24  ;;  %v3987_v22 = vrot.slane %v6401_v20, 3  ;;  %v3988_v53 = vrot.slane %v6411_v25, 3  ;;  %v3211_v31 = vrot.slane %v4331_v27, %v6297_v34 }
 0xcd6   : > { %v3076_v38 = vadd.f32 %v3074_v35, %v3046_v15  ;;  %v3077_v40 = vadd.f32 %v3075_v2, %v3047_v23  ;;  %v3083_v54 = vpop.permute.xlu1 %3082  ;;  %v3085_v63 = vpop.permute.xlu0 %3084  ;;  %v4015_v23 = vrot.slane %v6401_v20, 4 }
 0xcd7   : > { %v3087_v6 = vsel %vm3086_vm11, %v3083_v54, %v3085_v63  ;;  %v3088_v37 = vsel %vm3086_vm11, %v3085_v63, %v3083_v54  ;;  %vm3551_vm11 = vcmp.lt.s32.totalorder %v6283_v9, 125 }
 0xcd8   : > { %v3102_v30 = vmul.f32 %v3095_v24, %v3088_v37  ;;  %v3103_v48 = vmul.f32 %v3099_v8, %v3087_v6  ;;  %3905 = vrot.lane.b32.xlu1 %v6401_v20, %s4875_s27 }
 0xcd9   : > { %3907 = vrot.lane.b32.xlu0 %v6411_v25, %s4875_s27 }
 0xcda   : > { %v3104_v43 = vadd.f32 %v3102_v30, %v3076_v38  ;;  %v3105_v44 = vadd.f32 %v3103_v48, %v3077_v40  ;;  %v3111_v60 = vpop.permute.xlu1 %3110  ;;  %v3113_v42 = vpop.permute.xlu0 %3112  ;;  %v4043_v30 = vrot.slane %v6401_v20, 5  ;;  %v4044_v48 = vrot.slane %v6411_v25, 5 }
 0xcdb   : > { %v3115_v29 = vsel %vm3114_vm12, %v3111_v60, %v3113_v42  ;;  %v3116_v59 = vsel %vm3114_vm12, %v3113_v42, %v3111_v60  ;;  %v4099_v42 = vrot.slane %v6401_v20, 7  ;;  %vm3579_vm12 = vcmp.lt.s32.totalorder %v6283_v9, 115 }
 0xcdc   : > { %v3130_v56 = vmul.f32 %v3123_v18, %v3116_v59  ;;  %v3131_v46 = vmul.f32 %v3127_v52, %v3115_v29  ;;  %3935 = vrot.lane.b32.xlu1 %v3931_v28, %s4876_s30  ;;  %v4332_v28 = vld [vmem:[%s7018_s8 + $0x17] ss:$8 sm:$0x3]  ;;  %v4100_v29 = vrot.slane %v6411_v25, 7 }
 0xcdd   : > { %3937 = vrot.lane.b32.xlu0 %v3932_v17, %s4876_s30  ;;  %v4333_v59 = vld [vmem:[%s7018_s8 + $0x20] ss:$8 sm:$0x3]  ;;  %v2796_v17 = vpop.f32.mrf.mxu1  ;;  %v3235_v20 = vrot.slane %v4332_v28, %v6290_v21 }
 0xcde   : > { %v3132_v62 = vadd.f32 %v3130_v56, %v3104_v43  ;;  %v3133_v11 = vadd.f32 %v3131_v46, %v3105_v44  ;;  %v3139_v7 = vpop.permute.xlu1 %3138  ;;  %v3141_v33 = vpop.permute.xlu0 %3140  ;;  %v4072_v43 = vrot.slane %v6411_v25, 6  ;;  %v4334_v56 = vld [vmem:[%s7018_s8 + $0x21] ss:$8 sm:$0x3]  ;;  %v3239_v46 = vrot.slane %v4332_v28, %v6297_v34 }
 0xcdf   : > { %v3143_v45 = vsel %vm3142_vm13, %v3139_v7, %v3141_v33  ;;  %v3144_v4 = vsel %vm3142_vm13, %v3141_v33, %v3139_v7  ;;  %v3263_v7 = vrot.slane %v4333_v59, %v6297_v34  ;;  %v3289_v33 = vrot.slane %v4334_v56, %v6290_v21 }
 0xce0   : > { %v3158_v58 = vmul.f32 %v3151_v26, %v3144_v4  ;;  %v3159_v39 = vmul.f32 %v3155_v32, %v3143_v45  ;;  %3963 = vrot.lane.b32.xlu1 %v3959_v19, %s4877_s13  ;;  %v2798_v19 = vpop.f32.mrf.mxu1  ;;  %v4336_v45 = vld [vmem:[%s7018_s8 + $0x23] ss:$8 sm:$0x3]  ;;  %vm3607_vm13 = vcmp.lt.s32.totalorder %v6283_v9, 114 }
 0xce1   : > { %3965 = vrot.lane.b32.xlu0 %v3960_v14, %s4877_s13 }
 0xce2   : > { %v3160_v61 = vadd.f32 %v3158_v58, %v3132_v62  ;;  %v3161_v3 = vadd.f32 %v3159_v39, %v3133_v11  ;;  %v3167_v12 = vpop.permute.xlu1 %3166  ;;  %v3169_v16 = vpop.permute.xlu0 %3168  ;;  %v4335_v62 = vld [vmem:[%s7018_s8 + $0x22] ss:$8 sm:$0x3]  ;;  %v3259_v11 = vrot.slane %v4333_v59, %v6290_v21  ;;  %v3293_v58 = vrot.slane %v4334_v56, %v6297_v34 }
 0xce3   : > { %v3171_v5 = vsel %vm3170_vm14, %v3167_v12, %v3169_v16  ;;  %v3172_v41 = vsel %vm3170_vm14, %v3169_v16, %v3167_v12  ;;  %v3321_v27 = vrot.slane %v4335_v62, %v6297_v34  ;;  %v4337_v12 = vld [vmem:[%s7018_s8 + $0x24] ss:$8 sm:$0x3]  ;;  %vm3635_vm14 = vcmp.lt.s32.totalorder %v6283_v9, 113 }
 0xce4   : > { %v3186_v47 = vmul.f32 %v3179_v50, %v3172_v41  ;;  %v3187_v57 = vmul.f32 %v3183_v13, %v3171_v5  ;;  %3991 = vrot.lane.b32.xlu1 %v3987_v22, %s4878_s18  ;;  %v3317_v13 = vrot.slane %v4335_v62, %v6290_v21  ;;  %v3345_v5 = vrot.slane %v4336_v45, %v6290_v21 }
 0xce5   : > { %3993 = vrot.lane.b32.xlu0 %v3988_v53, %s4878_s18 }
 0xce6   : > { %v3188_v55 = vadd.f32 %v3186_v47, %v3160_v61  ;;  %v3189_v24 = vadd.f32 %v3187_v57, %v3161_v3  ;;  %v3195_v8 = vpop.permute.xlu1 %3194  ;;  %v3197_v15 = vpop.permute.xlu0 %3196  ;;  %v3349_v47 = vrot.slane %v4336_v45, %v6297_v34  ;;  %v4338_v57 = vld [vmem:[%s7018_s8 + $0x25] ss:$8 sm:$0x3] }
 0xce7   : > { %v3199_v35 = vsel %vm3198_vm15, %v3195_v8, %v3197_v15  ;;  %v3200_v2 = vsel %vm3198_vm15, %v3197_v15, %v3195_v8  ;;  %vm3663_vm15 = vcmp.lt.s32.totalorder %v6283_v9, 112 }
 0xce8   : > { %v3214_v38 = vmul.f32 %v3207_v1, %v3200_v2  ;;  %v3215_v40 = vmul.f32 %v3211_v31, %v3199_v35  ;;  %4019 = vrot.lane.b32.xlu1 %v4015_v23, %s4879_s19 }
 0xce9   : > { %4021 = vrot.lane.b32.xlu0 %v4016_v0, %s4879_s19 }
 0xcea   : > { %v6447_v54 = vadd.f32 %v3214_v38, %v3188_v55  ;;  %v6449_v63 = vadd.f32 %v3215_v40, %v3189_v24  ;;  %v3223_v6 = vpop.permute.xlu1 %3222  ;;  %v3225_v37 = vpop.permute.xlu0 %3224  ;;  %v3373_v55 = vrot.slane %v4337_v12, %v6290_v21  ;;  %v3377_v24 = vrot.slane %v4337_v12, %v6297_v34 }
 0xceb   : > { %v3227_v32 = vsel %vm3226_vm0, %v3223_v6, %v3225_v37  ;;  %v3228_v49 = vsel %vm3226_vm0, %v3225_v37, %v3223_v6  ;;  %v3401_v6 = vrot.slane %v4338_v57, %v6290_v21  ;;  %vm3687_vm0 = vcmp.lt.s32.totalorder %v6283_v9, 111 }
 0xcec   : > { %4047 = vrot.lane.b32.xlu1 %v4043_v30, %s4880_s20  ;;  %v3242_v39 = vmul.f32 %v3235_v20, %v3228_v49  ;;  %v3243_v50 = vmul.f32 %v3239_v46, %v3227_v32  ;;  %v4340_v49 = vld [vmem:[%s7018_s8 + $0x27] ss:$8 sm:$0x3] }
 0xced   : > { %4049 = vrot.lane.b32.xlu0 %v4044_v48, %s4880_s20  ;;  %s4151_s20 = sld [smem:[#allocation2]] }
 0xcee   : > { %v3247_v18 = vpop.permute.xlu1 %3246  ;;  %v3249_v52 = vpop.permute.xlu0 %3248  ;;  %v3244_v8 = vadd.f32 %v3242_v39, %v6447_v54  ;;  %v3245_v15 = vadd.f32 %v3243_v50, %v6449_v63  ;;  %v4339_v63 = vld [vmem:[%s7018_s8 + $0x26] ss:$8 sm:$0x3]  ;;  %v3461_v39 = vrot.slane %v4340_v49, %v6297_v34  ;;  %v4341_v50 = vld [vmem:[%s7018_s8 + $0x30] ss:$8 sm:$0x3] }
 0xcef   : > { %v3251_v4 = vsel %vm3250_vm1, %v3247_v18, %v3249_v52  ;;  %v3252_v14 = vsel %vm3250_vm1, %v3249_v52, %v3247_v18  ;;  %v3429_v56 = vrot.slane %v4339_v63, %v6290_v21  ;;  %v3433_v20 = vrot.slane %v4339_v63, %v6297_v34 }
 0xcf0   : > { %4075 = vrot.lane.b32.xlu1 %v4071_v10, %s4881_s21  ;;  %v3266_v41 = vmul.f32 %v3259_v11, %v3252_v14  ;;  %v3267_v53 = vmul.f32 %v3263_v7, %v3251_v4  ;;  %v3405_v10 = vrot.slane %v4338_v57, %v6297_v34  ;;  %vm3717_vm1 = vcmp.lt.s32.totalorder %v6283_v9, 110 }
 0xcf1   : > { %4077 = vrot.lane.b32.xlu0 %v4072_v43, %s4881_s21 }
 0xcf2   : > { %v3277_v44 = vpop.permute.xlu1 %3276  ;;  %v3279_v60 = vpop.permute.xlu0 %3278  ;;  %v3268_v37 = vadd.f32 %v3266_v41, %v3244_v8  ;;  %v3269_v30 = vadd.f32 %v3267_v53, %v3245_v15  ;;  %v3474_v41 = vrot.slane %v4341_v50, %v6290_v21  ;;  %v3478_v53 = vrot.slane %v4341_v50, %v6297_v34  ;;  %v6626_v50 = vld [vmem:[%s7018_s8 + $0x37] ss:$8 sm:$0x3] }
 0xcf3   : > { %v3281_v16 = vsel %vm3280_vm2, %v3277_v44, %v3279_v60  ;;  %v3282_v22 = vsel %vm3280_vm2, %v3279_v60, %v3277_v44  ;;  %vm3745_vm2 = vcmp.lt.s32.totalorder %v6283_v9, 109 }
 0xcf4   : > { %4103 = vrot.lane.b32.xlu1 %v4099_v42, %s4882_s26  ;;  %v3296_v23 = vmul.f32 %v3289_v33, %v3282_v22  ;;  %v3297_v35 = vmul.f32 %v3293_v58, %v3281_v16  ;;  %v3457_v58 = vrot.slane %v4340_v49, %v6290_v21 }
 0xcf5   : > { %4105 = vrot.lane.b32.xlu0 %v4100_v29, %s4882_s26 }
 0xcf6   : > { %v3305_v25 = vpop.permute.xlu1 %3304  ;;  %v3307_v26 = vpop.permute.xlu0 %3306  ;;  %v3298_v43 = vadd.f32 %v3296_v23, %v3268_v37  ;;  %v3299_v44 = vadd.f32 %v3297_v35, %v3269_v30  ;;  %v3481_v35 = vmul.f32 %v3474_v41, %v6269_v36 }
 0xcf7   : > { %v3309_v1 = vsel %vm3308_vm3, %v3305_v25, %v3307_v26  ;;  %v3310_v31 = vsel %vm3308_vm3, %v3307_v26, %v3305_v25  ;;  %vm3773_vm3 = vcmp.lt.s32.totalorder %v6283_v9, 99 }
 0xcf8   : > { %4127 = vrot.lane.b32.xlu1 %v2796_v17, %s4883_s11  ;;  %v3324_v48 = vmul.f32 %v3317_v13, %v3310_v31  ;;  %v3325_v54 = vmul.f32 %v3321_v27, %v3309_v1 }
 0xcf9   : > { %4129 = vrot.lane.b32.xlu0 %v2798_v19, %s4883_s11 }
 0xcfa   : > { %v3333_v61 = vpop.permute.xlu1 %3332  ;;  %v3335_v3 = vpop.permute.xlu0 %3334  ;;  %v3326_v46 = vadd.f32 %v3324_v48, %v3298_v43  ;;  %v3327_v25 = vadd.f32 %v3325_v54, %v3299_v44 }
 0xcfb   : > { %v3337_v38 = vsel %vm3336_vm4, %v3333_v61, %v3335_v3  ;;  %v3338_v40 = vsel %vm3336_vm4, %v3335_v3, %v3333_v61  ;;  %vm3801_vm4 = vcmp.lt.s32.totalorder %v6283_v9, 98 }
 0xcfc   : > { %v3352_v60 = vmul.f32 %v3345_v5, %v3338_v40  ;;  %v3353_v42 = vmul.f32 %v3349_v47, %v3337_v38 }
 0xcfe   : > { %v3361_v2 = vpop.permute.xlu1 %3360  ;;  %v3363_v0 = vpop.permute.xlu0 %3362  ;;  %v3354_v62 = vadd.f32 %v3352_v60, %v3326_v46  ;;  %v3355_v11 = vadd.f32 %v3353_v42, %v3327_v25  ;;  %v6592_v46 = vld [vmem:[%s7018_s8 + $0x34] ss:$8 sm:$0x3] }
 0xcff   : > { %v3365_v18 = vsel %vm3364_vm5, %v3361_v2, %v3363_v0  ;;  %v3366_v52 = vsel %vm3364_vm5, %v3363_v0, %v3361_v2  ;;  %v3482_v2 = vmul.f32 %v3478_v53, %v6271_v51  ;;  %vm3829_vm5 = vcmp.lt.s32.totalorder %v6283_v9, 97 }
 0xd00   : > { %v3380_v26 = vmul.f32 %v3373_v55, %v3366_v52  ;;  %v3381_v32 = vmul.f32 %v3377_v24, %v3365_v18 }
 0xd02   : > { %v3389_v28 = vpop.permute.xlu1 %3388  ;;  %v3391_v29 = vpop.permute.xlu0 %3390  ;;  %v3382_v13 = vadd.f32 %v3380_v26, %v3354_v62  ;;  %v3383_v27 = vadd.f32 %v3381_v32, %v3355_v11 }
 0xd03   : > { %v3393_v59 = vsel %vm3392_vm6, %v3389_v28, %v3391_v29  ;;  %v3394_v17 = vsel %vm3392_vm6, %v3391_v29, %v3389_v28  ;;  %vm3857_vm6 = vcmp.lt.s32.totalorder %v6283_v9, 96 }
 0xd04   : > { %v3408_v7 = vmul.f32 %v3401_v6, %v3394_v17  ;;  %v3409_v33 = vmul.f32 %v3405_v10, %v3393_v59  ;;  %v4342_v17 = vld [vmem:[%s7018_s8 + $0x31] ss:$8 sm:$0x3] }
 0xd05   : > { %v3504_v32 = vrot.slane %v4342_v17, %v6290_v21  ;;  %v3508_v49 = vrot.slane %v4342_v17, %v6297_v34 }
 0xd06   : > { %v3417_v19 = vpop.permute.xlu1 %3416  ;;  %v3419_v45 = vpop.permute.xlu0 %3418  ;;  %v3410_v12 = vadd.f32 %v3408_v7, %v3382_v13  ;;  %v3411_v16 = vadd.f32 %v3409_v33, %v3383_v27  ;;  %v6608_v7 = vld [vmem:[%s7018_s8 + $0x35] ss:$8 sm:$0x3]  ;;  %v6613_v33 = vld [vmem:[%s7018_s8 + $0x36] ss:$8 sm:$0x3] }
 0xd07   : > { %v3421_v4 = vsel %vm3420_vm7, %v3417_v19, %v3419_v45  ;;  %v3422_v14 = vsel %vm3420_vm7, %v3419_v45, %v3417_v19  ;;  %v3616_v27 = vrot.slane %v6608_v7, %v6290_v21  ;;  %v3648_v41 = vrot.slane %v6613_v33, %v6297_v34 }
 0xd08   : > { %v3436_v61 = vmul.f32 %v3429_v56, %v3422_v14  ;;  %v3437_v3 = vmul.f32 %v3433_v20, %v3421_v4  ;;  %v4343_v56 = vld [vmem:[%s7018_s8 + $0x32] ss:$8 sm:$0x3]  ;;  %v4344_v20 = vld [vmem:[%s7018_s8 + $0x33] ss:$8 sm:$0x3]  ;;  %v3588_v4 = vrot.slane %v6592_v46, %v6290_v21 }
 0xd09   : > { %v3532_v62 = vrot.slane %v4343_v56, %v6290_v21  ;;  %v3536_v11 = vrot.slane %v4343_v56, %v6297_v34  ;;  %v3560_v19 = vrot.slane %v4344_v20, %v6290_v21  ;;  %v3564_v45 = vrot.slane %v4344_v20, %v6297_v34 }
 0xd0a   : > { %v3445_v22 = vpop.permute.xlu1 %3444  ;;  %v3447_v5 = vpop.permute.xlu0 %3446  ;;  %v3438_v1 = vadd.f32 %v3436_v61, %v3410_v12  ;;  %v3439_v31 = vadd.f32 %v3437_v3, %v3411_v16  ;;  %v3620_v61 = vrot.slane %v6608_v7, %v6297_v34  ;;  %v3644_v3 = vrot.slane %v6613_v33, %v6290_v21  ;;  %v6640_v12 = vld [vmem:[%s7018_s8 + $0x40] ss:$8 sm:$0x3] }
 0xd0b   : > { %v3449_v47 = vsel %vm3448_vm8, %v3445_v22, %v3447_v5  ;;  %v3450_v57 = vsel %vm3448_vm8, %v3447_v5, %v3445_v22  ;;  %vm3885_vm7 = vcmp.lt.s32.totalorder %v6283_v9, 95  ;;  %vm3909_vm8 = vcmp.lt.s32.totalorder %v6283_v9, 94 }
 0xd0c   : > { %v3464_v55 = vmul.f32 %v3457_v58, %v3450_v57  ;;  %v3465_v24 = vmul.f32 %v3461_v39, %v3449_v47  ;;  %v3592_v39 = vrot.slane %v6592_v46, %v6297_v34  ;;  %v3672_v57 = vrot.slane %v6626_v50, %v6290_v21 }
 0xd0e   : > { %v3466_v8 = vadd.f32 %v3464_v55, %v3438_v1  ;;  %v3467_v15 = vadd.f32 %v3465_v24, %v3439_v31  ;;  %v3492_v23 = vpop.permute.xlu1 %3491  ;;  %v3494_v0 = vpop.permute.xlu0 %3493  ;;  %v3676_v1 = vrot.slane %v6626_v50, %v6297_v34  ;;  %v6658_v31 = vld [vmem:[%s7018_s8 + $0x41] ss:$8 sm:$0x3] }
 0xd0f   : > { %v3496_v14 = vsel %vm3495_vm9, %v3492_v23, %v3494_v0  ;;  %v3497_v58 = vsel %vm3495_vm9, %v3494_v0, %v3492_v23  ;;  %v6675_v0 = vld [vmem:[%s7018_s8 + $0x42] ss:$8 sm:$0x3]  ;;  %v3730_v17 = vrot.slane %v6658_v31, %v6297_v34  ;;  %vm3939_vm9 = vcmp.lt.s32.totalorder %v6283_v9, 93 }
 0xd10   : > { %v6548_v38 = vadd.f32 %v3481_v35, %v3466_v8  ;;  %v6550_v40 = vadd.f32 %v3482_v2, %v3467_v15  ;;  %v3511_v53 = vmul.f32 %v3504_v32, %v3496_v14  ;;  %v3512_v47 = vmul.f32 %v3508_v49, %v3497_v58  ;;  %v6697_v49 = vld [vmem:[%s7018_s8 + $0x43] ss:$8 sm:$0x3] }
 0xd11   : > { %v3696_v8 = vrot.slane %v6640_v12, %v6290_v21  ;;  %v3700_v2 = vrot.slane %v6640_v12, %v6297_v34  ;;  %v3782_v14 = vrot.slane %v6697_v49, %v6290_v21  ;;  %v3786_v58 = vrot.slane %v6697_v49, %v6297_v34 }
 0xd12   : > { %v3520_v6 = vpop.permute.xlu1 %3519  ;;  %v3522_v37 = vpop.permute.xlu0 %3521  ;;  %v3513_v56 = vadd.f32 %v3511_v53, %v6548_v38  ;;  %v3514_v20 = vadd.f32 %v3512_v47, %v6550_v40  ;;  %v3754_v40 = vrot.slane %v6675_v0, %v6290_v21  ;;  %v6737_v47 = vld [vmem:[%s7018_s8 + $0x45] ss:$8 sm:$0x3] }
 0xd13   : > { %v3524_v22 = vsel %vm3523_vm10, %v3520_v6, %v3522_v37  ;;  %v3525_v5 = vsel %vm3523_vm10, %v3522_v37, %v3520_v6  ;;  %vm3967_vm10 = vcmp.lt.s32.totalorder %v6283_v9, 83 }
 0xd14   : > { %v3539_v23 = vmul.f32 %v3532_v62, %v3524_v22  ;;  %v3540_v35 = vmul.f32 %v3536_v11, %v3525_v5 }
 0xd16   : > { %v3548_v30 = vpop.permute.xlu1 %3547  ;;  %v3550_v48 = vpop.permute.xlu0 %3549  ;;  %v3541_v11 = vadd.f32 %v3539_v23, %v3513_v56  ;;  %v3542_v7 = vadd.f32 %v3540_v35, %v3514_v20  ;;  %v3842_v56 = vrot.slane %v6737_v47, %v6297_v34 }
 0xd17   : > { %v3552_v55 = vsel %vm3551_vm11, %v3548_v30, %v3550_v48  ;;  %v3553_v24 = vsel %vm3551_vm11, %v3550_v48, %v3548_v30  ;;  %v3726_v48 = vrot.slane %v6658_v31, %v6290_v21  ;;  %vm3995_vm11 = vcmp.lt.s32.totalorder %v6283_v9, 82 }
 0xd18   : > { %v3567_v46 = vmul.f32 %v3560_v19, %v3552_v55  ;;  %v3568_v32 = vmul.f32 %v3564_v45, %v3553_v24  ;;  %v6717_v45 = vld [vmem:[%s7018_s8 + $0x44] ss:$8 sm:$0x3] }
 0xd1a   : > { %v6552_v54 = vpop.permute.xlu1 %3575  ;;  %v6554_v63 = vpop.permute.xlu0 %3577  ;;  %v3570_v22 = vadd.f32 %v3568_v32, %v3542_v7 }
 0xd1b   : > { %v3580_v37 = vsel %vm3579_vm12, %v6552_v54, %v6554_v63  ;;  %v3581_v30 = vsel %vm3579_vm12, %v6554_v63, %v6552_v54  ;;  %v3758_v63 = vrot.slane %v6675_v0, %v6297_v34  ;;  %vm4023_vm12 = vcmp.lt.s32.totalorder %v6283_v9, 81 }
 0xd1c   : > { %v3595_v33 = vmul.f32 %v3588_v4, %v3580_v37  ;;  %v3596_v19 = vmul.f32 %v3592_v39, %v3581_v30  ;;  %v3569_v39 = vadd.f32 %v3567_v46, %v3541_v11  ;;  %v6757_v30 = vld [vmem:[%s7018_s8 + $0x46] ss:$8 sm:$0x3] }
 0xd1d   : > { %v3866_v50 = vrot.slane %v6757_v30, %v6290_v21 }
 0xd1e   : > { %v6556_v18 = vpop.permute.xlu1 %3603  ;;  %v6558_v52 = vpop.permute.xlu0 %3605  ;;  %v3597_v24 = vadd.f32 %v3595_v33, %v3569_v39  ;;  %v3598_v23 = vadd.f32 %v3596_v19, %v3570_v22 }
 0xd1f   : > { %v3608_v54 = vsel %vm3607_vm13, %v6556_v18, %v6558_v52  ;;  %v3609_v38 = vsel %vm3607_vm13, %v6558_v52, %v6556_v18  ;;  %vm4051_vm13 = vcmp.lt.s32.totalorder %v6283_v9, 80 }
 0xd20   : > { %v3623_v5 = vmul.f32 %v3616_v27, %v3608_v54  ;;  %v3624_v53 = vmul.f32 %v3620_v61, %v3609_v38  ;;  %v3810_v27 = vrot.slane %v6717_v45, %v6290_v21  ;;  %v3814_v61 = vrot.slane %v6717_v45, %v6297_v34 }
 0xd22   : > { %v6560_v36 = vpop.permute.xlu1 %3631  ;;  %v6562_v51 = vpop.permute.xlu0 %3633  ;;  %v3625_v20 = vadd.f32 %v3623_v5, %v3597_v24  ;;  %v3626_v46 = vadd.f32 %v3624_v53, %v3598_v23 }
 0xd23   : > { %v3636_v52 = vsel %vm3635_vm14, %v6560_v36, %v6562_v51  ;;  %v3637_v4 = vsel %vm3635_vm14, %v6562_v51, %v6560_v36  ;;  %vm4079_vm14 = vcmp.lt.s32.totalorder %v6283_v9, 79 }
 0xd24   : > { %v3651_v35 = vmul.f32 %v3644_v3, %v3636_v52  ;;  %v3652_v37 = vmul.f32 %v3648_v41, %v3637_v4  ;;  %v3838_v41 = vrot.slane %v6737_v47, %v6290_v21 }
 0xd26   : > { %v6564_v10 = vpop.permute.xlu1 %3659  ;;  %v6566_v43 = vpop.permute.xlu0 %3661  ;;  %v3653_v11 = vadd.f32 %v3651_v35, %v3625_v20  ;;  %v3654_v7 = vadd.f32 %v3652_v37, %v3626_v46 }
 0xd27   : > { %v3664_v36 = vsel %vm3663_vm15, %v6564_v10, %v6566_v43  ;;  %v3665_v51 = vsel %vm3663_vm15, %v6566_v43, %v6564_v10  ;;  %vm4107_vm15 = vcmp.lt.s32.totalorder %v6283_v9, 78 }
 0xd28   : > { %v3679_v32 = vmul.f32 %v3672_v57, %v3664_v36  ;;  %v3680_v54 = vmul.f32 %v3676_v1, %v3665_v51  ;;  %v3870_v1 = vrot.slane %v6757_v30, %v6297_v34 }
 0xd2a   : > { %v6568_v44 = vpop.permute.xlu1 %3683  ;;  %v6570_v60 = vpop.permute.xlu0 %3685  ;;  %v3681_v4 = vadd.f32 %v3679_v32, %v3653_v11  ;;  %v3682_v39 = vadd.f32 %v3680_v54, %v3654_v7 }
 0xd2b   : > { %v3688_v43 = vsel %vm3687_vm0, %v6568_v44, %v6570_v60  ;;  %v3689_v3 = vsel %vm3687_vm0, %v6570_v60, %v6568_v44  ;;  %v6783_v44 = vld [vmem:[%s7018_s8 + $0x47] ss:$8 sm:$0x3]  ;;  %vm4131_vm0 = vcmp.lt.s32.totalorder %v6283_v9, 77 }
 0xd2c   : > { %v3703_v33 = vmul.f32 %v3696_v8, %v3688_v43  ;;  %v3704_v19 = vmul.f32 %v3700_v2, %v3689_v3  ;;  %v3894_v12 = vrot.slane %v6783_v44, %v6290_v21  ;;  %v3898_v2 = vrot.slane %v6783_v44, %v6297_v34  ;;  %v6871_v43 = vld [vmem:[%s7018_s8 + $0x52] ss:$8 sm:$0x3] }
 0xd2e   : > { %v6572_v42 = vpop.permute.xlu1 %3713  ;;  %v6574_v28 = vpop.permute.xlu0 %3715  ;;  %v3705_v36 = vadd.f32 %v3703_v33, %v3681_v4  ;;  %v3706_v51 = vadd.f32 %v3704_v19, %v3682_v39 }
 0xd2f   : > { %v3718_v60 = vsel %vm3717_vm1, %v6572_v42, %v6574_v28  ;;  %v3719_v57 = vsel %vm3717_vm1, %v6574_v28, %v6572_v42  ;;  %v6809_v42 = vld [vmem:[%s7018_s8 + $0x50] ss:$8 sm:$0x3] }
 0xd30   : > { %v3733_v22 = vmul.f32 %v3726_v48, %v3718_v60  ;;  %v3734_v5 = vmul.f32 %v3730_v17, %v3719_v57  ;;  %v3918_v53 = vrot.slane %v6809_v42, %v6290_v21  ;;  %v3922_v0 = vrot.slane %v6809_v42, %v6297_v34  ;;  %v4360_v57 = vld [vmem:[%s7018_s8 + $0x53] ss:$8 sm:$0x3] }
 0xd32   : > { %v6576_v29 = vpop.permute.xlu1 %3741  ;;  %v6578_v59 = vpop.permute.xlu0 %3743  ;;  %v3736_v23 = vadd.f32 %v3734_v5, %v3706_v51 }
 0xd33   : > { %v3746_v52 = vsel %vm3745_vm2, %v6576_v29, %v6578_v59  ;;  %v3747_v8 = vsel %vm3745_vm2, %v6578_v59, %v6576_v29 }
 0xd34   : > { %v3761_v31 = vmul.f32 %v3754_v40, %v3746_v52  ;;  %v3762_v17 = vmul.f32 %v3758_v63, %v3747_v8  ;;  %v3735_v63 = vadd.f32 %v3733_v22, %v3705_v36  ;;  %v4004_v52 = vrot.slane %v4360_v57, %v6290_v21 }
 0xd36   : > { %v6594_v25 = vpop.permute.xlu1 %3769  ;;  %v6599_v26 = vpop.permute.xlu0 %3771  ;;  %v3763_v3 = vadd.f32 %v3761_v31, %v3735_v63  ;;  %v3764_v20 = vadd.f32 %v3762_v17, %v3736_v23 }
 0xd37   : > { %v3774_v29 = vsel %vm3773_vm3, %v6594_v25, %v6599_v26  ;;  %v3775_v59 = vsel %vm3773_vm3, %v6599_v26, %v6594_v25  ;;  %v6849_v25 = vld [vmem:[%s7018_s8 + $0x51] ss:$8 sm:$0x3] }
 0xd38   : > { %v3789_v35 = vmul.f32 %v3782_v14, %v3774_v29  ;;  %v3790_v37 = vmul.f32 %v3786_v58, %v3775_v59  ;;  %v3948_v14 = vrot.slane %v6849_v25, %v6290_v21  ;;  %v3952_v49 = vrot.slane %v6849_v25, %v6297_v34 }
 0xd3a   : > { %v6628_v13 = vpop.permute.xlu1 %3797  ;;  %v6642_v16 = vpop.permute.xlu0 %3799  ;;  %v3791_v44 = vadd.f32 %v3789_v35, %v3763_v3  ;;  %v3792_v60 = vadd.f32 %v3790_v37, %v3764_v20 }
 0xd3b   : > { %v3802_v24 = vsel %vm3801_vm4, %v6628_v13, %v6642_v16  ;;  %v3803_v40 = vsel %vm3801_vm4, %v6642_v16, %v6628_v13 }
 0xd3c   : > { %v3817_v46 = vmul.f32 %v3810_v27, %v3802_v24  ;;  %v3818_v32 = vmul.f32 %v3814_v61, %v3803_v40  ;;  %v3976_v27 = vrot.slane %v6871_v43, %v6290_v21  ;;  %v4363_v24 = vld [vmem:[%s7018_s8 + $0x56] ss:$8 sm:$0x3] }
 0xd3d   : > { %v4088_v3 = vrot.slane %v4363_v24, %v6290_v21 }
 0xd3e   : > { %v6667_v15 = vpop.permute.xlu1 %3825  ;;  %v6677_v6 = vpop.permute.xlu0 %3827  ;;  %v3819_v47 = vadd.f32 %v3817_v46, %v3791_v44 }
 0xd3f   : > { %v3830_v13 = vsel %vm3829_vm5, %v6667_v15, %v6677_v6  ;;  %v3831_v16 = vsel %vm3829_vm5, %v6677_v6, %v6667_v15 }
 0xd40   : > { %v3845_v45 = vmul.f32 %v3838_v41, %v3830_v13  ;;  %v3846_v61 = vmul.f32 %v3842_v56, %v3831_v16  ;;  %v3980_v41 = vrot.slane %v6871_v43, %v6297_v34  ;;  %v3820_v56 = vadd.f32 %v3818_v32, %v3792_v60 }
 0xd41   : > { %v4092_v60 = vrot.slane %v4363_v24, %v6297_v34  ;;  %v4152_v24 = vstv %s4151_s20 }
 0xd42   : > { %v6711_v62 = vpop.permute.xlu1 %3853  ;;  %v6719_v18 = vpop.permute.xlu0 %3855  ;;  %v3847_v8 = vadd.f32 %v3845_v45, %v3819_v47  ;;  %v3848_v30 = vadd.f32 %v3846_v61, %v3820_v56 }
 0xd43   : > { %v3858_v15 = vsel %vm3857_vm6, %v6711_v62, %v6719_v18  ;;  %v3859_v6 = vsel %vm3857_vm6, %v6719_v18, %v6711_v62 }
 0xd44   : > { %v3873_v7 = vmul.f32 %v3866_v50, %v3858_v15  ;;  %v3874_v33 = vmul.f32 %v3870_v1, %v3859_v6  ;;  %v4008_v50 = vrot.slane %v4360_v57, %v6297_v34  ;;  %v4364_v15 = vld [vmem:[%s7018_s8 + $0x57] ss:$8 sm:$0x3] }
 0xd45   : > { %v4116_v47 = vrot.slane %v4364_v15, %v6290_v21  ;;  %v4120_v56 = vrot.slane %v4364_v15, %v6297_v34 }
 0xd46   : > { %v6751_v55 = vpop.permute.xlu1 %3881 }
 0xd47   : > { %v6759_v10 = vpop.permute.xlu0 %3883 }
 0xd48   : > { %v3886_v62 = vsel %vm3885_vm7, %v6751_v55, %v6759_v10  ;;  %v3887_v18 = vsel %vm3885_vm7, %v6759_v10, %v6751_v55  ;;  %v4361_v55 = vld [vmem:[%s7018_s8 + $0x54] ss:$8 sm:$0x3] }
 0xd49   : > { %v3901_v1 = vmul.f32 %v3894_v12, %v3886_v62  ;;  %v3902_v4 = vmul.f32 %v3898_v2, %v3887_v18  ;;  %v4032_v29 = vrot.slane %v4361_v55, %v6290_v21  ;;  %v4362_v12 = vld [vmem:[%s7018_s8 + $0x55] ss:$8 sm:$0x3]  ;;  %v4036_v31 = vrot.slane %v4361_v55, %v6297_v34 }
 0xd4a   : > { %v6797_v38 = vpop.permute.xlu1 %3905  ;;  %v4060_v23 = vrot.slane %v4362_v12, %v6290_v21  ;;  %v4064_v35 = vrot.slane %v4362_v12, %v6297_v34 }
 0xd4b   : > { %v3908_v28 = vpop.permute.xlu0 %3907 }
 0xd4c   : > { %v3910_v10 = vsel %vm3909_vm8, %v6797_v38, %v3908_v28  ;;  %v3911_v42 = vsel %vm3909_vm8, %v3908_v28, %v6797_v38  ;;  %v3875_v38 = vadd.f32 %v3873_v7, %v3847_v8  ;;  %v3876_v28 = vadd.f32 %v3874_v33, %v3848_v30 }
 0xd4d   : > { %v3925_v59 = vmul.f32 %v3918_v53, %v3910_v10  ;;  %v3926_v36 = vmul.f32 %v3922_v0, %v3911_v42  ;;  %v4365_v10 = vld [vmem:[%s7018_s8 + $0x60] ss:$8 sm:$0x3] }
 0xd4e   : > { %v3936_v48 = vpop.permute.xlu1 %3935  ;;  %v3903_v17 = vadd.f32 %v3901_v1, %v3875_v38  ;;  %v3904_v25 = vadd.f32 %v3902_v4, %v3876_v28 }
 0xd4f   : > { %v3938_v26 = vpop.permute.xlu0 %3937 }
 0xd50   : > { %v3940_v39 = vsel %vm3939_vm9, %v3936_v48, %v3938_v26  ;;  %v3941_v22 = vsel %vm3939_vm9, %v3938_v26, %v3936_v48  ;;  %v3927_v37 = vadd.f32 %v3925_v59, %v3903_v17  ;;  %v3928_v43 = vadd.f32 %v3926_v36, %v3904_v25 }
 0xd51   : > { %v3955_v26 = vmul.f32 %v3948_v14, %v3940_v39  ;;  %v3956_v53 = vmul.f32 %v3952_v49, %v3941_v22  ;;  %v4140_v22 = vrot.slane %v4365_v10, %v6290_v21 }
 0xd52   : > { %v3964_v58 = vpop.permute.xlu1 %3963 }
 0xd53   : > { %v3966_v54 = vpop.permute.xlu0 %3965  ;;  %v3957_v20 = vadd.f32 %v3955_v26, %v3927_v37  ;;  %v3958_v46 = vadd.f32 %v3956_v53, %v3928_v43 }
 0xd54   : > { %v3968_v2 = vsel %vm3967_vm10, %v3964_v58, %v3966_v54  ;;  %v3969_v48 = vsel %vm3967_vm10, %v3966_v54, %v3964_v58 }
 0xd55   : > { %v3983_v13 = vmul.f32 %v3976_v27, %v3968_v2  ;;  %v3984_v16 = vmul.f32 %v3980_v41, %v3969_v48 }
 0xd56   : > { %v3992_v11 = vpop.permute.xlu1 %3991 }
 0xd57   : > { %v3994_v19 = vpop.permute.xlu0 %3993  ;;  %v3985_v45 = vadd.f32 %v3983_v13, %v3957_v20  ;;  %v3986_v61 = vadd.f32 %v3984_v16, %v3958_v46  ;;  %v7205_v46 = vld [vmem:[#allocation9_spill] sm:$0xff] }
 0xd58   : > { %v3996_v40 = vsel %vm3995_vm11, %v3992_v11, %v3994_v19  ;;  %v3997_v0 = vsel %vm3995_vm11, %v3994_v19, %v3992_v11 }
 0xd59   : > { %v4011_v32 = vmul.f32 %v4004_v52, %v3996_v40  ;;  %v4012_v54 = vmul.f32 %v4008_v50, %v3997_v0 }
 0xd5a   : > { %v4020_v5 = vpop.permute.xlu1 %4019 }
 0xd5b   : > { %v4022_v51 = vpop.permute.xlu0 %4021  ;;  %v4013_v7 = vadd.f32 %v4011_v32, %v3985_v45  ;;  %v4014_v33 = vadd.f32 %v4012_v54, %v3986_v61 }
 0xd5c   : > { %v4024_v49 = vsel %vm4023_vm12, %v4020_v5, %v4022_v51  ;;  %v4025_v58 = vsel %vm4023_vm12, %v4022_v51, %v4020_v5  ;;  %v4144_v5 = vrot.slane %v4365_v10, %v6297_v34 }
 0xd5d   : > { %v4039_v57 = vmul.f32 %v4032_v29, %v4024_v49  ;;  %v4040_v62 = vmul.f32 %v4036_v31, %v4025_v58 }
 0xd5e   : > { %v4048_v63 = vpop.permute.xlu1 %4047 }
 0xd5f   : > { %v4050_v14 = vpop.permute.xlu0 %4049  ;;  %v4041_v52 = vadd.f32 %v4039_v57, %v4013_v7  ;;  %v4042_v50 = vadd.f32 %v4040_v62, %v4014_v33 }
 0xd60   : > { %v4052_v6 = vsel %vm4051_vm13, %v4048_v63, %v4050_v14  ;;  %v4053_v27 = vsel %vm4051_vm13, %v4050_v14, %v4048_v63 }
 0xd61   : > { %v4067_v19 = vmul.f32 %v4060_v23, %v4052_v6  ;;  %v4068_v55 = vmul.f32 %v4064_v35, %v4053_v27 }
 0xd62   : > { %v4076_v44 = vpop.permute.xlu1 %4075 }
 0xd63   : > { %v4078_v18 = vpop.permute.xlu0 %4077  ;;  %v4069_v29 = vadd.f32 %v4067_v19, %v4041_v52  ;;  %v4070_v38 = vadd.f32 %v4068_v55, %v4042_v50 }
 0xd64   : > { %v4080_v41 = vsel %vm4079_vm14, %v4076_v44, %v4078_v18  ;;  %v4081_v11 = vsel %vm4079_vm14, %v4078_v18, %v4076_v44 }
 0xd65   : > { %v4095_v8 = vmul.f32 %v4088_v3, %v4080_v41  ;;  %v4096_v30 = vmul.f32 %v4092_v60, %v4081_v11  ;;  %v7204_v3 = vld [vmem:[#allocation10_spill] sm:$0xff] }
 0xd66   : > { %v4104_v42 = vpop.permute.xlu1 %4103 }
 0xd67   : > { %v4106_v1 = vpop.permute.xlu0 %4105  ;;  %v4097_v51 = vadd.f32 %v4095_v8, %v4069_v29  ;;  %v4098_v12 = vadd.f32 %v4096_v30, %v4070_v38 }
 0xd68   : > { %v4108_v4 = vsel %vm4107_vm15, %v4104_v42, %v4106_v1  ;;  %v4109_v39 = vsel %vm4107_vm15, %v4106_v1, %v4104_v42 }
 0xd69   : > { %v4123_v28 = vmul.f32 %v4116_v47, %v4108_v4  ;;  %v4124_v59 = vmul.f32 %v4120_v56, %v4109_v39 }
 0xd6a   : > { %v4128_v36 = vpop.permute.xlu1 %4127 }
 0xd6b   : > { %v4130_v2 = vpop.permute.xlu0 %4129  ;;  %v4125_v17 = vadd.f32 %v4123_v28, %v4097_v51  ;;  %v4126_v25 = vadd.f32 %v4124_v59, %v4098_v12 }
 0xd6c   : > { %v4132_v48 = vsel %vm4131_vm0, %v4128_v36, %v4130_v2  ;;  %v4133_v31 = vsel %vm4131_vm0, %v4130_v2, %v4128_v36 }
 0xd6d   : > { %v4147_v26 = vmul.f32 %v4140_v22, %v4132_v48  ;;  %v4148_v53 = vmul.f32 %v4144_v5, %v4133_v31 }
 0xd6f   : > { %v4149_v34 = vadd.f32 %v4147_v26, %v4125_v17  ;;  %v4150_v40 = vadd.f32 %v4148_v53, %v4126_v25 }
 0xd71   : > { %v4153_v0 = vadd.f32 %v4152_v24, %v4149_v34  ;;  %v4154_v63 = vadd.f32 %v4152_v24, %v4150_v40 }
 0xd73   : > { %v4155_v23 = vmul.f32 0.5, %v4153_v0  ;;  %v4156_v35 = vmul.f32 0.5, %v4154_v63 }
 0xd75   : > { %4820 = vtanh.f32 %v4155_v23 }
 0xd76   : > { %4822 = vtanh.f32 %v4156_v35 }
 0xd82   : > { %v4821_v37 = vpop.eup %4820 }
 0xd83   : > { %v4823_v43 = vpop.eup %4822  ;;  %v4159_v13 = vadd.f32 1.0, %v4821_v37 }
 0xd84   : > { %v4160_v16 = vadd.f32 1.0, %v4823_v43 }
 0xd85   : > { %v4161_v9 = vmul.f32 0.5, %v4159_v13 }
 0xd86   : > { %v4162_v14 = vmul.f32 0.5, %v4160_v16 }
 0xd87   : > { %v4166_v49 = vrot.slane %v4161_v9, %v6290_v21 }
 0xd88   : > { %v4170_v58 = vrot.slane %v4162_v14, %v6290_v21 }
 0xd89   : > { %v4171_v20 = vmul.f32 %v4166_v49, %v7204_v3 }
 0xd8a   : > { %v4172_v32 = vmul.f32 %v4170_v58, %v7205_v46 }
 0xd8b   : > { %4173 = vst [vmem:[%s360_s23] sm:$0xff] %v4171_v20 }
 0xd8c   : > { %4174 = vst [vmem:[%s360_s23 + $0x8] sm:$0xff] %v4172_v32 }
 0xd8d PF: > { %s21_s15 = sadd.s32 1, %s4832_s15  }
 0xd8e   : > { %p18_p4 = scmp.ge.s32.totalorder %s21_s15, 4  }
 0xd90   :  { %20 = sbr.rel (!%p18_p4) target bundleno = 2 (0x2), region = 138 }

</bundles_post_ra>
